<compile_context>
chip_gen: v5e
topology: v5e:2x2
jax: 0.10.0
libtpu: 0.0.40
codegen_flags: <defaults>
</compile_context>

<pallas_src>
import numpy as np
import jax
import jax.numpy as jnp
from jax import lax
from jax.experimental import pallas as pl
from jax.experimental.pallas import tpu as pltpu


IMG_BLOCK = 8  # images per grid step (stacked along the matmul M dimension)


# ------------------------------ fused kernel ------------------------------- #

def _lenet_fused_kernel(x_ref, b1_ref, bias1_ref, sh1e_ref, sh1o_ref,
                        b2_ref, bias2_ref, sh2e_ref, sh2o_ref,
                        w1u_ref, fb1_ref, w2p_ref, fb2_ref, o_ref):
    f32 = jnp.float32
    cdt = b1_ref.dtype                      # MXU operand dtype (f32 or bf16)
    nimg = x_ref.shape[0]

    def dot(a, b):
        return jnp.dot(a, b, preferred_element_type=f32)

    # ---- conv1 (1->6, 5x5, valid): 5 banded matmuls, images stacked along M ----
    # a1 rows: b*24 + oh ; lanes: ow*6 + oc  (144 lanes)
    acc = dot(x_ref[:, 0:24, :].reshape(nimg * 24, 28).astype(cdt), b1_ref[0])
    for i in range(1, 5):
        xi = x_ref[:, i:i + 24, :].reshape(nimg * 24, 28).astype(cdt)
        acc = acc + dot(xi, b1_ref[i])
    a1 = jnp.maximum(acc + bias1_ref[...], 0.0).astype(cdt)      # [nimg*24, 144]

    # ---- pool1, width direction: max of lanes k and k+6 (valid at k = 12p+c) ----
    t1 = jnp.maximum(a1[:, :138], a1[:, 6:])                     # [nimg*24, 138]
    # ---- pool1, height direction + per-image repack (block-diag 0/1 matmuls) ----
    p1 = jnp.maximum(dot(sh1e_ref[...], t1),
                     dot(sh1o_ref[...], t1)).astype(cdt)         # [nimg*12+8, 138]
    # p1 row b*12 + q holds image b's pooled row q; padded tail rows are zero.

    # ---- conv2 (6->16, 3x3, valid): 3 banded matmuls; lane compaction folded
    #      into B2u's (zero-padded) K dimension ----
    m2 = nimg * 12
    acc2 = dot(p1[0:m2, :], b2_ref[0])
    for i in range(1, 3):
        acc2 = acc2 + dot(p1[i:i + m2, :], b2_ref[i])
    a2 = jnp.maximum(acc2 + bias2_ref[...], 0.0).astype(cdt)     # [nimg*12, 160]

    # ---- pool2, width direction (valid at k = 32p + c) ----
    t2 = jnp.maximum(a2[:, :144], a2[:, 16:])                    # [nimg*12, 144]
    # ---- pool2, height direction + regroup rows to (h, image) order for fc1 ----
    p2 = jnp.maximum(dot(sh2e_ref[...], t2),
                     dot(sh2o_ref[...], t2)).astype(cdt)         # [5*nimg, 144]

    # ---- fc1: NCHW flatten permutation + pool2 lane compaction folded into W1u ----
    h = fb1_ref[...]                                             # [1, H] broadcasts
    for r in range(5):
        h = h + dot(p2[r * nimg:(r + 1) * nimg, :], w1u_ref[r])
    h = jnp.maximum(h, 0.0).astype(cdt)                          # [nimg, H]

    # ---- fc2 ----
    o_ref[...] = (dot(h, w2p_ref[...]) + fb2_ref[...]).astype(o_ref.dtype)


def lenet_forward(consts, x_nchw):
    B = x_nchw.shape[0]
    H = consts['W2p'].shape[0]
    nimg = consts['SH2e'].shape[0] // 5          # images per grid step
    x = x_nchw.reshape(B, 28, 28).astype(jnp.float32)
    pad = (-B) % nimg
    if pad:
        x = jnp.concatenate([x, jnp.zeros((pad, 28, 28), x.dtype)], axis=0)
    Bp = B + pad
    steps = Bp // nimg

    names = ('B1', 'bias1', 'SH1e', 'SH1o', 'B2u', 'bias2',
             'SH2e', 'SH2o', 'W1u', 'fb1', 'W2p', 'fb2')
    cargs = [consts[k] for k in names]

    def cspec(a):
        z = (0,) * a.ndim
        return pl.BlockSpec(a.shape, lambda g, _z=z: _z)   # constant -> fetched once

    flops_per_step = (
        2 * 5 * (nimg * 24) * 28 * 144          # conv1 bands
        + 2 * 2 * (nimg * 12 + 8) * (nimg * 24) * 138   # pool1 row selection
        + 2 * 3 * (nimg * 12) * 138 * 160       # conv2 bands
        + 2 * 2 * (5 * nimg) * (nimg * 12) * 144        # pool2 row selection
        + 2 * 5 * nimg * 144 * H                # fc1
        + 2 * nimg * H * 10)                    # fc2
    const_bytes = sum(int(v.size) * v.dtype.itemsize for v in cargs)
    bytes_accessed = Bp * 28 * 28 * 4 + const_bytes + Bp * 10 * 4

    out = pl.pallas_call(
        _lenet_fused_kernel,
        out_shape=jax.ShapeDtypeStruct((Bp, 10), jnp.float32),
        grid=(steps,),
        in_specs=[pl.BlockSpec((nimg, 28, 28), lambda g: (g, 0, 0))]
                 + [cspec(a) for a in cargs],
        out_specs=pl.BlockSpec((nimg, 10), lambda g: (g, 0)),
        compiler_params=pltpu.CompilerParams(
            dimension_semantics=("parallel",)),
        cost_estimate=pl.CostEstimate(
            flops=int(steps * flops_per_step), transcendentals=0,
            bytes_accessed=int(bytes_accessed)),
    )(x, *cargs)
    return out[:B]


# -------------------- host-side constant preparation (init) ---------------- #

def prepare_kernel_constants(params, img_block=IMG_BLOCK, mxu_dtype=jnp.float32):
    w1 = np.asarray(params['conv1_w'], np.float32)   # [6,1,5,5]
    b1 = np.asarray(params['conv1_b'], np.float32)   # [6]
    w2 = np.asarray(params['conv2_w'], np.float32)   # [16,6,3,3]
    b2 = np.asarray(params['conv2_b'], np.float32)   # [16]
    f1 = np.asarray(params['fc1_w'], np.float32)     # [H,400]
    fb1 = np.asarray(params['fc1_b'], np.float32)    # [H]
    f2 = np.asarray(params['fc2_w'], np.float32)     # [10,H]
    fb2 = np.asarray(params['fc2_b'], np.float32)    # [10]
    H = f1.shape[0]
    C1, C2 = 6, 16
    NB = img_block

    # conv1 banded matrices: B1[i, w, ow*6+oc] = w1[oc,0,i,w-ow] for 0<=w-ow<5
    B1 = np.zeros((5, 28, 24 * C1), np.float32)
    for i in range(5):
        for ow in range(24):
            for j in range(5):
                B1[i, ow + j, ow * C1:(ow + 1) * C1] = w1[:, 0, i, j]
    bias1 = np.tile(b1, 24).reshape(1, 24 * C1)

    # pool1 height-selection (block-diagonal over the image block, padded rows 0)
    L1 = 24 * C1 - C1                 # 138 lanes after width-direction slice/max
    R1 = NB * 12 + 8                  # +8 pad so conv2 band slices stay in range
    SH1e = np.zeros((R1, NB * 24), np.float32)
    SH1o = np.zeros((R1, NB * 24), np.float32)
    for b in range(NB):
        for q in range(12):
            SH1e[b * 12 + q, b * 24 + 2 * q] = 1.0
            SH1o[b * 12 + q, b * 24 + 2 * q + 1] = 1.0

    # conv2 banded matrices with the pool1 lane compaction folded into K (zero rows)
    # input lane k = 12*p + ic (p = pooled width index, ic = input channel)
    B2u = np.zeros((3, L1, 10 * C2), np.float32)
    for i in range(3):
        for ow in range(10):
            for j in range(3):
                for ic in range(C1):
                    B2u[i, 12 * (ow + j) + ic, ow * C2:(ow + 1) * C2] = w2[:, ic, i, j]
    bias2 = np.tile(b2, 10).reshape(1, 10 * C2)

    # pool2 height-selection; also permutes rows to (h, image) order for fc1 bands
    L2 = 10 * C2 - C2                 # 144 lanes after width-direction slice/max
    SH2e = np.zeros((5 * NB, NB * 12), np.float32)
    SH2o = np.zeros((5 * NB, NB * 12), np.float32)
    for p in range(5):
        for b in range(NB):
            SH2e[p * NB + b, b * 12 + 2 * p] = 1.0
            SH2o[p * NB + b, b * 12 + 2 * p + 1] = 1.0

    # fc1 with PyTorch's NCHW flatten (c*25 + h*5 + w) and the pool2 lane
    # compaction (valid lane k = 32*w + c) folded in; stacked per h-row.
    W1u = np.zeros((5, L2, H), np.float32)
    for oh in range(5):
        for ow in range(5):
            for c in range(C2):
                W1u[oh, 32 * ow + c, :] = f1[:, c * 25 + oh * 5 + ow]

    mx = lambda a: jnp.asarray(a, mxu_dtype)       # MXU operands
    fp = lambda a: jnp.asarray(a, jnp.float32)     # biases stay f32
    return dict(B1=mx(B1), bias1=fp(bias1), SH1e=mx(SH1e), SH1o=mx(SH1o),
                B2u=mx(B2u), bias2=fp(bias2), SH2e=mx(SH2e), SH2o=mx(SH2o),
                W1u=mx(W1u), fb1=fp(fb1.reshape(1, H)),
                W2p=mx(f2.T.copy()), fb2=fp(fb2.reshape(1, 10)))


# -------------------------- reference + param init ------------------------- #

def reference_forward(params, x):
    """Pure-JAX reference (lax.conv / reduce_window), mirrors the PyTorch module."""
    dn = ('NCHW', 'OIHW', 'NCHW')
    y = lax.conv_general_dilated(x, params['conv1_w'], (1, 1), 'VALID',
                                 dimension_numbers=dn)
    y = jnp.maximum(y + params['conv1_b'].reshape(1, 6, 1, 1), 0.0)
    y = lax.reduce_window(y, -jnp.inf, lax.max, (1, 1, 2, 2), (1, 1, 2, 2), 'VALID')
    y = lax.conv_general_dilated(y, params['conv2_w'], (1, 1), 'VALID',
                                 dimension_numbers=dn)
    y = jnp.maximum(y + params['conv2_b'].reshape(1, 16, 1, 1), 0.0)
    y = lax.reduce_window(y, -jnp.inf, lax.max, (1, 1, 2, 2), (1, 1, 2, 2), 'VALID')
    y = y.reshape(y.shape[0], 400)
    h = jnp.maximum(y @ params['fc1_w'].T + params['fc1_b'], 0.0)
    return h @ params['fc2_w'].T + params['fc2_b']


def init_params(key, hidden_size):
    ks = jax.random.split(key, 8)

    def u(k, shape, fan_in):
        bound = 1.0 / float(np.sqrt(fan_in))
        return jax.random.uniform(k, shape, jnp.float32, -bound, bound)

    return {
        'conv1_w': u(ks[0], (6, 1, 5, 5), 25), 'conv1_b': u(ks[1], (6,), 25),
        'conv2_w': u(ks[2], (16, 6, 3, 3), 54), 'conv2_b': u(ks[3], (16,), 54),
        'fc1_w': u(ks[4], (hidden_size, 400), 400),
        'fc1_b': u(ks[5], (hidden_size,), 400),
        'fc2_w': u(ks[6], (10, hidden_size), hidden_size),
        'fc2_b': u(ks[7], (10,), hidden_size),
    }


if __name__ == "__main__":
    hidden_size = 32
    batch = 2

    key = jax.random.PRNGKey(0)
    k_param, k_x = jax.random.split(key)
    params = init_params(k_param, hidden_size)
    x = jax.random.normal(k_x, (batch, 1, 28, 28), jnp.float32)  # NCHW, MNIST-sized
    ref = jax.block_until_ready(reference_forward(params, x))

    # --- f32 MXU-operand path: strict reference check ---
    consts32 = prepare_kernel_constants(params, IMG_BLOCK, jnp.float32)
    out32 = jax.block_until_ready(jax.jit(lenet_forward)(consts32, x))
    assert out32.shape == (batch, 10), out32.shape
    assert jnp.allclose(out32, ref, rtol=1e-4, atol=1e-4), "f32 mismatch vs reference"

    # --- bf16 MXU-operand path (v6e/v7x-preferred); quantized weights/activations
    #     so a looser tolerance applies ---
    consts_bf = prepare_kernel_constants(params, IMG_BLOCK, jnp.bfloat16)
    out_bf = jax.block_until_ready(jax.jit(lenet_forward)(consts_bf, x))
    assert out_bf.shape == (batch, 10), out_bf.shape
    assert jnp.allclose(out_bf, ref, rtol=1e-1, atol=1e-1), "bf16 mismatch vs reference"

    # --- multi-step grid + batch-padding path (batch not a multiple of IMG_BLOCK) ---
    x2 = jax.random.normal(jax.random.PRNGKey(1), (19, 1, 28, 28), jnp.float32)
    ref2 = jax.block_until_ready(reference_forward(params, x2))
    out2 = jax.block_until_ready(jax.jit(lenet_forward)(consts32, x2))
    assert jnp.allclose(out2, ref2, rtol=1e-4, atol=1e-4), "batched-grid mismatch"

    print("KERNEL_OK")
</pallas_src>

<mosaic_0001>
module attributes {stable_mosaic.version = 11 : i64} {
  func.func @_lenet_fused_kernel(%arg0: i32, %arg1: memref<8x28x28xf32, #tpu.memory_space<vmem>>, %arg2: memref<5x28x144xf32, #tpu.memory_space<vmem>>, %arg3: memref<1x144xf32, #tpu.memory_space<vmem>>, %arg4: memref<104x192xf32, #tpu.memory_space<vmem>>, %arg5: memref<104x192xf32, #tpu.memory_space<vmem>>, %arg6: memref<3x138x160xf32, #tpu.memory_space<vmem>>, %arg7: memref<1x160xf32, #tpu.memory_space<vmem>>, %arg8: memref<40x96xf32, #tpu.memory_space<vmem>>, %arg9: memref<40x96xf32, #tpu.memory_space<vmem>>, %arg10: memref<5x144x32xf32, #tpu.memory_space<vmem>>, %arg11: memref<1x32xf32, #tpu.memory_space<vmem>>, %arg12: memref<32x10xf32, #tpu.memory_space<vmem>>, %arg13: memref<1x10xf32, #tpu.memory_space<vmem>>, %arg14: memref<8x10xf32, #tpu.memory_space<vmem>>) attributes {dimension_semantics = [#tpu.dimension_semantics<parallel>], iteration_bounds = array<i64: 1>, scalar_prefetch = 0 : i64, scratch_operands = 0 : i64, tpu.core_type = #tpu.core_type<tc>, window_params = [{transform_indices = @transform_0, window_bounds = array<i64: 8, 28, 28>}, {pipeline_mode = #tpu.pipeline_mode<synchronous>, transform_indices = @transform_1, window_bounds = array<i64: 5, 28, 144>}, {pipeline_mode = #tpu.pipeline_mode<synchronous>, transform_indices = @transform_2, window_bounds = array<i64: 1, 144>}, {pipeline_mode = #tpu.pipeline_mode<synchronous>, transform_indices = @transform_3, window_bounds = array<i64: 104, 192>}, {pipeline_mode = #tpu.pipeline_mode<synchronous>, transform_indices = @transform_4, window_bounds = array<i64: 104, 192>}, {pipeline_mode = #tpu.pipeline_mode<synchronous>, transform_indices = @transform_5, window_bounds = array<i64: 3, 138, 160>}, {pipeline_mode = #tpu.pipeline_mode<synchronous>, transform_indices = @transform_6, window_bounds = array<i64: 1, 160>}, {pipeline_mode = #tpu.pipeline_mode<synchronous>, transform_indices = @transform_7, window_bounds = array<i64: 40, 96>}, {pipeline_mode = #tpu.pipeline_mode<synchronous>, transform_indices = @transform_8, window_bounds = array<i64: 40, 96>}, {pipeline_mode = #tpu.pipeline_mode<synchronous>, transform_indices = @transform_9, window_bounds = array<i64: 5, 144, 32>}, {pipeline_mode = #tpu.pipeline_mode<synchronous>, transform_indices = @transform_10, window_bounds = array<i64: 1, 32>}, {pipeline_mode = #tpu.pipeline_mode<synchronous>, transform_indices = @transform_11, window_bounds = array<i64: 32, 10>}, {pipeline_mode = #tpu.pipeline_mode<synchronous>, transform_indices = @transform_12, window_bounds = array<i64: 1, 10>}, {transform_indices = @transform_13, window_bounds = array<i64: 8, 10>}]} {
    %c0 = arith.constant 0 : index
    %c0_0 = arith.constant 0 : index
    %c0_1 = arith.constant 0 : index
    %0 = vector.load %arg1[%c0, %c0_0, %c0_1] : memref<8x28x28xf32, #tpu.memory_space<vmem>>, vector<8x24x28xf32>
    %1 = vector.shape_cast %0 : vector<8x24x28xf32> to vector<192x28xf32>
    %c0_2 = arith.constant 0 : index
    %c0_3 = arith.constant 0 : index
    %c0_4 = arith.constant 0 : index
    %2 = vector.load %arg2[%c0_2, %c0_3, %c0_4] : memref<5x28x144xf32, #tpu.memory_space<vmem>>, vector<1x28x144xf32>
    %3 = vector.shape_cast %2 : vector<1x28x144xf32> to vector<28x144xf32>
    %cst = arith.constant dense<0.000000e+00> : vector<192x144xf32>
    %4 = tpu.matmul %1, %3, %cst {dimension_numbers = #tpu.dot_dimension_numbers<[1], [0], [0], [1], [0, 0, 1, 1], [], []>} : vector<192x28xf32>, vector<28x144xf32>, vector<192x144xf32> -> vector<192x144xf32>
    %c0_5 = arith.constant 0 : index
    %c1 = arith.constant 1 : index
    %c0_6 = arith.constant 0 : index
    %5 = vector.load %arg1[%c0_5, %c1, %c0_6] : memref<8x28x28xf32, #tpu.memory_space<vmem>>, vector<8x24x28xf32>
    %6 = vector.shape_cast %5 : vector<8x24x28xf32> to vector<192x28xf32>
    %c1_7 = arith.constant 1 : index
    %c0_8 = arith.constant 0 : index
    %c0_9 = arith.constant 0 : index
    %7 = vector.load %arg2[%c1_7, %c0_8, %c0_9] : memref<5x28x144xf32, #tpu.memory_space<vmem>>, vector<1x28x144xf32>
    %8 = vector.shape_cast %7 : vector<1x28x144xf32> to vector<28x144xf32>
    %cst_10 = arith.constant dense<0.000000e+00> : vector<192x144xf32>
    %9 = tpu.matmul %6, %8, %cst_10 {dimension_numbers = #tpu.dot_dimension_numbers<[1], [0], [0], [1], [0, 0, 1, 1], [], []>} : vector<192x28xf32>, vector<28x144xf32>, vector<192x144xf32> -> vector<192x144xf32>
    %10 = arith.addf %4, %9 : vector<192x144xf32>
    %c0_11 = arith.constant 0 : index
    %c2 = arith.constant 2 : index
    %c0_12 = arith.constant 0 : index
    %11 = vector.load %arg1[%c0_11, %c2, %c0_12] : memref<8x28x28xf32, #tpu.memory_space<vmem>>, vector<8x24x28xf32>
    %12 = vector.shape_cast %11 : vector<8x24x28xf32> to vector<192x28xf32>
    %c2_13 = arith.constant 2 : index
    %c0_14 = arith.constant 0 : index
    %c0_15 = arith.constant 0 : index
    %13 = vector.load %arg2[%c2_13, %c0_14, %c0_15] : memref<5x28x144xf32, #tpu.memory_space<vmem>>, vector<1x28x144xf32>
    %14 = vector.shape_cast %13 : vector<1x28x144xf32> to vector<28x144xf32>
    %cst_16 = arith.constant dense<0.000000e+00> : vector<192x144xf32>
    %15 = tpu.matmul %12, %14, %cst_16 {dimension_numbers = #tpu.dot_dimension_numbers<[1], [0], [0], [1], [0, 0, 1, 1], [], []>} : vector<192x28xf32>, vector<28x144xf32>, vector<192x144xf32> -> vector<192x144xf32>
    %16 = arith.addf %10, %15 : vector<192x144xf32>
    %c0_17 = arith.constant 0 : index
    %c3 = arith.constant 3 : index
    %c0_18 = arith.constant 0 : index
    %17 = vector.load %arg1[%c0_17, %c3, %c0_18] : memref<8x28x28xf32, #tpu.memory_space<vmem>>, vector<8x24x28xf32>
    %18 = vector.shape_cast %17 : vector<8x24x28xf32> to vector<192x28xf32>
    %c3_19 = arith.constant 3 : index
    %c0_20 = arith.constant 0 : index
    %c0_21 = arith.constant 0 : index
    %19 = vector.load %arg2[%c3_19, %c0_20, %c0_21] : memref<5x28x144xf32, #tpu.memory_space<vmem>>, vector<1x28x144xf32>
    %20 = vector.shape_cast %19 : vector<1x28x144xf32> to vector<28x144xf32>
    %cst_22 = arith.constant dense<0.000000e+00> : vector<192x144xf32>
    %21 = tpu.matmul %18, %20, %cst_22 {dimension_numbers = #tpu.dot_dimension_numbers<[1], [0], [0], [1], [0, 0, 1, 1], [], []>} : vector<192x28xf32>, vector<28x144xf32>, vector<192x144xf32> -> vector<192x144xf32>
    %22 = arith.addf %16, %21 : vector<192x144xf32>
    %c0_23 = arith.constant 0 : index
    %c4 = arith.constant 4 : index
    %c0_24 = arith.constant 0 : index
    %23 = vector.load %arg1[%c0_23, %c4, %c0_24] : memref<8x28x28xf32, #tpu.memory_space<vmem>>, vector<8x24x28xf32>
    %24 = vector.shape_cast %23 : vector<8x24x28xf32> to vector<192x28xf32>
    %c4_25 = arith.constant 4 : index
    %c0_26 = arith.constant 0 : index
    %c0_27 = arith.constant 0 : index
    %25 = vector.load %arg2[%c4_25, %c0_26, %c0_27] : memref<5x28x144xf32, #tpu.memory_space<vmem>>, vector<1x28x144xf32>
    %26 = vector.shape_cast %25 : vector<1x28x144xf32> to vector<28x144xf32>
    %cst_28 = arith.constant dense<0.000000e+00> : vector<192x144xf32>
    %27 = tpu.matmul %24, %26, %cst_28 {dimension_numbers = #tpu.dot_dimension_numbers<[1], [0], [0], [1], [0, 0, 1, 1], [], []>} : vector<192x28xf32>, vector<28x144xf32>, vector<192x144xf32> -> vector<192x144xf32>
    %28 = arith.addf %22, %27 : vector<192x144xf32>
    %c0_29 = arith.constant 0 : index
    %c0_30 = arith.constant 0 : index
    %29 = vector.load %arg3[%c0_29, %c0_30] : memref<1x144xf32, #tpu.memory_space<vmem>>, vector<1x144xf32>
    %30 = vector.broadcast %29 : vector<1x144xf32> to vector<192x144xf32>
    %31 = arith.addf %28, %30 : vector<192x144xf32>
    %cst_31 = arith.constant 0.000000e+00 : f32
    %32 = vector.broadcast %cst_31 : f32 to vector<192x144xf32>
    %33 = arith.maximumf %31, %32 : vector<192x144xf32>
    %34 = vector.extract_strided_slice %33 {offsets = [0, 0], sizes = [192, 138], strides = [1, 1]} : vector<192x144xf32> to vector<192x138xf32>
    %35 = vector.extract_strided_slice %33 {offsets = [0, 6], sizes = [192, 138], strides = [1, 1]} : vector<192x144xf32> to vector<192x138xf32>
    %36 = arith.maximumf %34, %35 : vector<192x138xf32>
    %c0_32 = arith.constant 0 : index
    %c0_33 = arith.constant 0 : index
    %37 = vector.load %arg4[%c0_32, %c0_33] : memref<104x192xf32, #tpu.memory_space<vmem>>, vector<104x192xf32>
    %cst_34 = arith.constant dense<0.000000e+00> : vector<104x138xf32>
    %38 = tpu.matmul %37, %36, %cst_34 {dimension_numbers = #tpu.dot_dimension_numbers<[1], [0], [0], [1], [0, 0, 1, 1], [], []>} : vector<104x192xf32>, vector<192x138xf32>, vector<104x138xf32> -> vector<104x138xf32>
    %c0_35 = arith.constant 0 : index
    %c0_36 = arith.constant 0 : index
    %39 = vector.load %arg5[%c0_35, %c0_36] : memref<104x192xf32, #tpu.memory_space<vmem>>, vector<104x192xf32>
    %cst_37 = arith.constant dense<0.000000e+00> : vector<104x138xf32>
    %40 = tpu.matmul %39, %36, %cst_37 {dimension_numbers = #tpu.dot_dimension_numbers<[1], [0], [0], [1], [0, 0, 1, 1], [], []>} : vector<104x192xf32>, vector<192x138xf32>, vector<104x138xf32> -> vector<104x138xf32>
    %41 = arith.maximumf %38, %40 : vector<104x138xf32>
    %42 = vector.extract_strided_slice %41 {offsets = [0, 0], sizes = [96, 138], strides = [1, 1]} : vector<104x138xf32> to vector<96x138xf32>
    %c0_38 = arith.constant 0 : index
    %c0_39 = arith.constant 0 : index
    %c0_40 = arith.constant 0 : index
    %43 = vector.load %arg6[%c0_38, %c0_39, %c0_40] : memref<3x138x160xf32, #tpu.memory_space<vmem>>, vector<1x138x160xf32>
    %44 = vector.shape_cast %43 : vector<1x138x160xf32> to vector<138x160xf32>
    %cst_41 = arith.constant dense<0.000000e+00> : vector<96x160xf32>
    %45 = tpu.matmul %42, %44, %cst_41 {dimension_numbers = #tpu.dot_dimension_numbers<[1], [0], [0], [1], [0, 0, 1, 1], [], []>} : vector<96x138xf32>, vector<138x160xf32>, vector<96x160xf32> -> vector<96x160xf32>
    %46 = vector.extract_strided_slice %41 {offsets = [1, 0], sizes = [96, 138], strides = [1, 1]} : vector<104x138xf32> to vector<96x138xf32>
    %c1_42 = arith.constant 1 : index
    %c0_43 = arith.constant 0 : index
    %c0_44 = arith.constant 0 : index
    %47 = vector.load %arg6[%c1_42, %c0_43, %c0_44] : memref<3x138x160xf32, #tpu.memory_space<vmem>>, vector<1x138x160xf32>
    %48 = vector.shape_cast %47 : vector<1x138x160xf32> to vector<138x160xf32>
    %cst_45 = arith.constant dense<0.000000e+00> : vector<96x160xf32>
    %49 = tpu.matmul %46, %48, %cst_45 {dimension_numbers = #tpu.dot_dimension_numbers<[1], [0], [0], [1], [0, 0, 1, 1], [], []>} : vector<96x138xf32>, vector<138x160xf32>, vector<96x160xf32> -> vector<96x160xf32>
    %50 = arith.addf %45, %49 : vector<96x160xf32>
    %51 = vector.extract_strided_slice %41 {offsets = [2, 0], sizes = [96, 138], strides = [1, 1]} : vector<104x138xf32> to vector<96x138xf32>
    %c2_46 = arith.constant 2 : index
    %c0_47 = arith.constant 0 : index
    %c0_48 = arith.constant 0 : index
    %52 = vector.load %arg6[%c2_46, %c0_47, %c0_48] : memref<3x138x160xf32, #tpu.memory_space<vmem>>, vector<1x138x160xf32>
    %53 = vector.shape_cast %52 : vector<1x138x160xf32> to vector<138x160xf32>
    %cst_49 = arith.constant dense<0.000000e+00> : vector<96x160xf32>
    %54 = tpu.matmul %51, %53, %cst_49 {dimension_numbers = #tpu.dot_dimension_numbers<[1], [0], [0], [1], [0, 0, 1, 1], [], []>} : vector<96x138xf32>, vector<138x160xf32>, vector<96x160xf32> -> vector<96x160xf32>
    %55 = arith.addf %50, %54 : vector<96x160xf32>
    %c0_50 = arith.constant 0 : index
    %c0_51 = arith.constant 0 : index
    %56 = vector.load %arg7[%c0_50, %c0_51] : memref<1x160xf32, #tpu.memory_space<vmem>>, vector<1x160xf32>
    %57 = vector.broadcast %56 : vector<1x160xf32> to vector<96x160xf32>
    %58 = arith.addf %55, %57 : vector<96x160xf32>
    %cst_52 = arith.constant 0.000000e+00 : f32
    %59 = vector.broadcast %cst_52 : f32 to vector<96x160xf32>
    %60 = arith.maximumf %58, %59 : vector<96x160xf32>
    %61 = vector.extract_strided_slice %60 {offsets = [0, 0], sizes = [96, 144], strides = [1, 1]} : vector<96x160xf32> to vector<96x144xf32>
    %62 = vector.extract_strided_slice %60 {offsets = [0, 16], sizes = [96, 144], strides = [1, 1]} : vector<96x160xf32> to vector<96x144xf32>
    %63 = arith.maximumf %61, %62 : vector<96x144xf32>
    %c0_53 = arith.constant 0 : index
    %c0_54 = arith.constant 0 : index
    %64 = vector.load %arg8[%c0_53, %c0_54] : memref<40x96xf32, #tpu.memory_space<vmem>>, vector<40x96xf32>
    %cst_55 = arith.constant dense<0.000000e+00> : vector<40x144xf32>
    %65 = tpu.matmul %64, %63, %cst_55 {dimension_numbers = #tpu.dot_dimension_numbers<[1], [0], [0], [1], [0, 0, 1, 1], [], []>} : vector<40x96xf32>, vector<96x144xf32>, vector<40x144xf32> -> vector<40x144xf32>
    %c0_56 = arith.constant 0 : index
    %c0_57 = arith.constant 0 : index
    %66 = vector.load %arg9[%c0_56, %c0_57] : memref<40x96xf32, #tpu.memory_space<vmem>>, vector<40x96xf32>
    %cst_58 = arith.constant dense<0.000000e+00> : vector<40x144xf32>
    %67 = tpu.matmul %66, %63, %cst_58 {dimension_numbers = #tpu.dot_dimension_numbers<[1], [0], [0], [1], [0, 0, 1, 1], [], []>} : vector<40x96xf32>, vector<96x144xf32>, vector<40x144xf32> -> vector<40x144xf32>
    %68 = arith.maximumf %65, %67 : vector<40x144xf32>
    %c0_59 = arith.constant 0 : index
    %c0_60 = arith.constant 0 : index
    %69 = vector.load %arg11[%c0_59, %c0_60] : memref<1x32xf32, #tpu.memory_space<vmem>>, vector<1x32xf32>
    %70 = vector.extract_strided_slice %68 {offsets = [0, 0], sizes = [8, 144], strides = [1, 1]} : vector<40x144xf32> to vector<8x144xf32>
    %c0_61 = arith.constant 0 : index
    %c0_62 = arith.constant 0 : index
    %c0_63 = arith.constant 0 : index
    %71 = vector.load %arg10[%c0_61, %c0_62, %c0_63] : memref<5x144x32xf32, #tpu.memory_space<vmem>>, vector<1x144x32xf32>
    %72 = vector.shape_cast %71 : vector<1x144x32xf32> to vector<144x32xf32>
    %cst_64 = arith.constant dense<0.000000e+00> : vector<8x32xf32>
    %73 = tpu.matmul %70, %72, %cst_64 {dimension_numbers = #tpu.dot_dimension_numbers<[1], [0], [0], [1], [0, 0, 1, 1], [], []>} : vector<8x144xf32>, vector<144x32xf32>, vector<8x32xf32> -> vector<8x32xf32>
    %74 = vector.broadcast %69 : vector<1x32xf32> to vector<8x32xf32>
    %75 = arith.addf %74, %73 : vector<8x32xf32>
    %76 = vector.extract_strided_slice %68 {offsets = [8, 0], sizes = [8, 144], strides = [1, 1]} : vector<40x144xf32> to vector<8x144xf32>
    %c1_65 = arith.constant 1 : index
    %c0_66 = arith.constant 0 : index
    %c0_67 = arith.constant 0 : index
    %77 = vector.load %arg10[%c1_65, %c0_66, %c0_67] : memref<5x144x32xf32, #tpu.memory_space<vmem>>, vector<1x144x32xf32>
    %78 = vector.shape_cast %77 : vector<1x144x32xf32> to vector<144x32xf32>
    %cst_68 = arith.constant dense<0.000000e+00> : vector<8x32xf32>
    %79 = tpu.matmul %76, %78, %cst_68 {dimension_numbers = #tpu.dot_dimension_numbers<[1], [0], [0], [1], [0, 0, 1, 1], [], []>} : vector<8x144xf32>, vector<144x32xf32>, vector<8x32xf32> -> vector<8x32xf32>
    %80 = arith.addf %75, %79 : vector<8x32xf32>
    %81 = vector.extract_strided_slice %68 {offsets = [16, 0], sizes = [8, 144], strides = [1, 1]} : vector<40x144xf32> to vector<8x144xf32>
    %c2_69 = arith.constant 2 : index
    %c0_70 = arith.constant 0 : index
    %c0_71 = arith.constant 0 : index
    %82 = vector.load %arg10[%c2_69, %c0_70, %c0_71] : memref<5x144x32xf32, #tpu.memory_space<vmem>>, vector<1x144x32xf32>
    %83 = vector.shape_cast %82 : vector<1x144x32xf32> to vector<144x32xf32>
    %cst_72 = arith.constant dense<0.000000e+00> : vector<8x32xf32>
    %84 = tpu.matmul %81, %83, %cst_72 {dimension_numbers = #tpu.dot_dimension_numbers<[1], [0], [0], [1], [0, 0, 1, 1], [], []>} : vector<8x144xf32>, vector<144x32xf32>, vector<8x32xf32> -> vector<8x32xf32>
    %85 = arith.addf %80, %84 : vector<8x32xf32>
    %86 = vector.extract_strided_slice %68 {offsets = [24, 0], sizes = [8, 144], strides = [1, 1]} : vector<40x144xf32> to vector<8x144xf32>
    %c3_73 = arith.constant 3 : index
    %c0_74 = arith.constant 0 : index
    %c0_75 = arith.constant 0 : index
    %87 = vector.load %arg10[%c3_73, %c0_74, %c0_75] : memref<5x144x32xf32, #tpu.memory_space<vmem>>, vector<1x144x32xf32>
    %88 = vector.shape_cast %87 : vector<1x144x32xf32> to vector<144x32xf32>
    %cst_76 = arith.constant dense<0.000000e+00> : vector<8x32xf32>
    %89 = tpu.matmul %86, %88, %cst_76 {dimension_numbers = #tpu.dot_dimension_numbers<[1], [0], [0], [1], [0, 0, 1, 1], [], []>} : vector<8x144xf32>, vector<144x32xf32>, vector<8x32xf32> -> vector<8x32xf32>
    %90 = arith.addf %85, %89 : vector<8x32xf32>
    %91 = vector.extract_strided_slice %68 {offsets = [32, 0], sizes = [8, 144], strides = [1, 1]} : vector<40x144xf32> to vector<8x144xf32>
    %c4_77 = arith.constant 4 : index
    %c0_78 = arith.constant 0 : index
    %c0_79 = arith.constant 0 : index
    %92 = vector.load %arg10[%c4_77, %c0_78, %c0_79] : memref<5x144x32xf32, #tpu.memory_space<vmem>>, vector<1x144x32xf32>
    %93 = vector.shape_cast %92 : vector<1x144x32xf32> to vector<144x32xf32>
    %cst_80 = arith.constant dense<0.000000e+00> : vector<8x32xf32>
    %94 = tpu.matmul %91, %93, %cst_80 {dimension_numbers = #tpu.dot_dimension_numbers<[1], [0], [0], [1], [0, 0, 1, 1], [], []>} : vector<8x144xf32>, vector<144x32xf32>, vector<8x32xf32> -> vector<8x32xf32>
    %95 = arith.addf %90, %94 : vector<8x32xf32>
    %cst_81 = arith.constant 0.000000e+00 : f32
    %96 = vector.broadcast %cst_81 : f32 to vector<8x32xf32>
    %97 = arith.maximumf %95, %96 : vector<8x32xf32>
    %c0_82 = arith.constant 0 : index
    %c0_83 = arith.constant 0 : index
    %98 = vector.load %arg12[%c0_82, %c0_83] : memref<32x10xf32, #tpu.memory_space<vmem>>, vector<32x10xf32>
    %cst_84 = arith.constant dense<0.000000e+00> : vector<8x10xf32>
    %99 = tpu.matmul %97, %98, %cst_84 {dimension_numbers = #tpu.dot_dimension_numbers<[1], [0], [0], [1], [0, 0, 1, 1], [], []>} : vector<8x32xf32>, vector<32x10xf32>, vector<8x10xf32> -> vector<8x10xf32>
    %c0_85 = arith.constant 0 : index
    %c0_86 = arith.constant 0 : index
    %100 = vector.load %arg13[%c0_85, %c0_86] : memref<1x10xf32, #tpu.memory_space<vmem>>, vector<1x10xf32>
    %101 = vector.broadcast %100 : vector<1x10xf32> to vector<8x10xf32>
    %102 = arith.addf %99, %101 : vector<8x10xf32>
    %c0_87 = arith.constant 0 : index
    %c0_88 = arith.constant 0 : index
    %103 = vector.load %arg14[%c0_87, %c0_88] : memref<8x10xf32, #tpu.memory_space<vmem>>, vector<8x10xf32>
    tpu.vector_store %arg14[%c0_87, %c0_88], %102 {strides = array<i32>} : memref<8x10xf32, #tpu.memory_space<vmem>>, vector<8x10xf32>,
    return
  }
  func.func @transform_0(%arg0: i32) -> (i32, i32, i32) {
    %c0_i32 = arith.constant 0 : i32
    %c0_i32_0 = arith.constant 0 : i32
    %c0_i32_1 = arith.constant 0 : i32
    return %arg0, %c0_i32, %c0_i32_0 : i32, i32, i32
  }
  func.func @transform_1(%arg0: i32) -> (i32, i32, i32) {
    %c0_i32 = arith.constant 0 : i32
    %c0_i32_0 = arith.constant 0 : i32
    %c0_i32_1 = arith.constant 0 : i32
    %c0_i32_2 = arith.constant 0 : i32
    return %c0_i32, %c0_i32_0, %c0_i32_1 : i32, i32, i32
  }
  func.func @transform_2(%arg0: i32) -> (i32, i32) {
    %c0_i32 = arith.constant 0 : i32
    %c0_i32_0 = arith.constant 0 : i32
    %c0_i32_1 = arith.constant 0 : i32
    return %c0_i32, %c0_i32_0 : i32, i32
  }
  func.func @transform_3(%arg0: i32) -> (i32, i32) {
    %c0_i32 = arith.constant 0 : i32
    %c0_i32_0 = arith.constant 0 : i32
    %c0_i32_1 = arith.constant 0 : i32
    return %c0_i32, %c0_i32_0 : i32, i32
  }
  func.func @transform_4(%arg0: i32) -> (i32, i32) {
    %c0_i32 = arith.constant 0 : i32
    %c0_i32_0 = arith.constant 0 : i32
    %c0_i32_1 = arith.constant 0 : i32
    return %c0_i32, %c0_i32_0 : i32, i32
  }
  func.func @transform_5(%arg0: i32) -> (i32, i32, i32) {
    %c0_i32 = arith.constant 0 : i32
    %c0_i32_0 = arith.constant 0 : i32
    %c0_i32_1 = arith.constant 0 : i32
    %c0_i32_2 = arith.constant 0 : i32
    return %c0_i32, %c0_i32_0, %c0_i32_1 : i32, i32, i32
  }
  func.func @transform_6(%arg0: i32) -> (i32, i32) {
    %c0_i32 = arith.constant 0 : i32
    %c0_i32_0 = arith.constant 0 : i32
    %c0_i32_1 = arith.constant 0 : i32
    return %c0_i32, %c0_i32_0 : i32, i32
  }
  func.func @transform_7(%arg0: i32) -> (i32, i32) {
    %c0_i32 = arith.constant 0 : i32
    %c0_i32_0 = arith.constant 0 : i32
    %c0_i32_1 = arith.constant 0 : i32
    return %c0_i32, %c0_i32_0 : i32, i32
  }
  func.func @transform_8(%arg0: i32) -> (i32, i32) {
    %c0_i32 = arith.constant 0 : i32
    %c0_i32_0 = arith.constant 0 : i32
    %c0_i32_1 = arith.constant 0 : i32
    return %c0_i32, %c0_i32_0 : i32, i32
  }
  func.func @transform_9(%arg0: i32) -> (i32, i32, i32) {
    %c0_i32 = arith.constant 0 : i32
    %c0_i32_0 = arith.constant 0 : i32
    %c0_i32_1 = arith.constant 0 : i32
    %c0_i32_2 = arith.constant 0 : i32
    return %c0_i32, %c0_i32_0, %c0_i32_1 : i32, i32, i32
  }
  func.func @transform_10(%arg0: i32) -> (i32, i32) {
    %c0_i32 = arith.constant 0 : i32
    %c0_i32_0 = arith.constant 0 : i32
    %c0_i32_1 = arith.constant 0 : i32
    return %c0_i32, %c0_i32_0 : i32, i32
  }
  func.func @transform_11(%arg0: i32) -> (i32, i32) {
    %c0_i32 = arith.constant 0 : i32
    %c0_i32_0 = arith.constant 0 : i32
    %c0_i32_1 = arith.constant 0 : i32
    return %c0_i32, %c0_i32_0 : i32, i32
  }
  func.func @transform_12(%arg0: i32) -> (i32, i32) {
    %c0_i32 = arith.constant 0 : i32
    %c0_i32_0 = arith.constant 0 : i32
    %c0_i32_1 = arith.constant 0 : i32
    return %c0_i32, %c0_i32_0 : i32, i32
  }
  func.func @transform_13(%arg0: i32) -> (i32, i32) {
    %c0_i32 = arith.constant 0 : i32
    %c0_i32_0 = arith.constant 0 : i32
    return %arg0, %c0_i32 : i32, i32
  }
}

</mosaic_0001>

<bundles_post_ra>
// kernel: lenet_forward.1
= control target key start
LH: loop header
LB: loop body
LE: loop exit
PB: predicated region body
PF: predicated region fallthrough
CT: control target
= control target key end

     0   :  { %vm182_vm0 = vcmask 1043456   ;;  %vm109_vm1 = vcmask 228352   ;;  %s5113_s16 = smov 122   ;;  %vm1880_vm2 = vcmask 998400   ;;  %vm2027_vm3 = vcmask 523264   ;;  %s9048_s1 = inlined_call_operand.vmem [shape: f32[5,28,144], index: 1, kind: input, shape index: {}]   ;;  %s9049_s0 = inlined_call_operand.vmem [shape: f32[8,28,28], index: 0, kind: input, shape index: {}]   ;;  %s9050_s2 = inlined_call_operand.vmem [shape: f32[1,144], index: 2, kind: input, shape index: {}]   ;;  %s9051_s3 = inlined_call_operand.vmem [shape: f32[104,192], index: 3, kind: input, shape index: {}]   ;;  %s9052_s4 = inlined_call_operand.vmem [shape: f32[104,192], index: 4, kind: input, shape index: {}]   ;;  %s9053_s5 = inlined_call_operand.vmem [shape: f32[3,138,160], index: 5, kind: input, shape index: {}]   ;;  %s9054_s6 = inlined_call_operand.vmem [shape: f32[1,160], index: 6, kind: input, shape index: {}]   ;;  %s9055_s8 = inlined_call_operand.vmem [shape: f32[40,96], index: 8, kind: input, shape index: {}]   ;;  %s9056_s7 = inlined_call_operand.vmem [shape: f32[40,96], index: 7, kind: input, shape index: {}]   ;;  %s9057_s9 = inlined_call_operand.vmem [shape: f32[5,144,32], index: 9, kind: input, shape index: {}]   ;;  %s9058_s10 = inlined_call_operand.vmem [shape: f32[1,32], index: 10, kind: input, shape index: {}]   ;;  %s9059_s12 = inlined_call_operand.vmem [shape: f32[1,10], index: 12, kind: input, shape index: {}]   ;;  %s9060_s11 = inlined_call_operand.vmem [shape: f32[32,10], index: 11, kind: input, shape index: {}]   ;;  %s9061_s13 = inlined_call_operand.vmem [shape: f32[8,10], index: 13, kind: output, shape index: {}]  }
   0x1   :  { %v4349_v0 = vld [vmem:[%s9048_s1 + $0x70] sm:$0xf]  ;;  %v4350_v1 = vld [vmem:[%s9048_s1 + $0x78] sm:$0xf]  ;;  %v4347_v3 = vld [vmem:[%s9048_s1 + $0x60] sm:$0xff]  ;;  %vm2705_vm4 = vcmask 1046528  }
   0x2   :  { %v75_v2 = vld [vmem:[%s9048_s1 + $0x38] sm:$0xf]  ;;  %4351 = vmatpush.msk.msra.mxu0 %vm182_vm0, %v4349_v0  ;;  %4376 = vmatpush.msk.msra.mxu1 %vm182_vm0, %v4350_v1  ;;  %v4348_v4 = vld [vmem:[%s9048_s1 + $0x68] sm:$0xff]  ;;  %v4345_v6 = vld [vmem:[%s9048_s1 + $0x50] sm:$0xff]  ;;  %vm2793_vm5 = vcmask 1041408   ;;  %vm3291_vm6 = vcmask 1045504  }
   0x3   :  { %v73_v5 = vld [vmem:[%s9048_s1 + $0x28] sm:$0xff]  ;;  %4925 = vmatpush.msk.msra.mxu2 %vm182_vm0, %v4350_v1  ;;  %4426 = vmatpush.msk.msra.mxu3 %vm182_vm0, %v75_v2  ;;  %v4346_v7 = vld [vmem:[%s9048_s1 + $0x58] sm:$0xff]  ;;  %v4343_v9 = vld [vmem:[%s9048_s1 + $0x40] sm:$0xff]  ;;  %vm2768_vm7 = vcmask 80896   ;;  %vm3746_vm8 = vcmask 916480   ;;  %vm3812_vm9 = vcmask 785408  }
   0x4   :  { %202 = vmatpush.msra.mxu0 %v4347_v3  ;;  %291 = vmatpush.msra.mxu1 %v4348_v4  ;;  %v71_v8 = vld [vmem:[%s9048_s1 + $0x18] sm:$0xff]  ;;  %v4344_v10 = vld [vmem:[%s9048_s1 + $0x48] sm:$0xff]  ;;  %v44_v14 = vld [vmem:[%s9049_s0] sm:$0xff]  ;;  %vm4005_vm10 = vcmask 130048   ;;  %vm4314_vm11 = vcmask 261120  }
   0x5   :  { %4926 = vmatpush.msra.mxu2 %v4348_v4  ;;  %547 = vmatpush.msra.mxu3 %v73_v5  ;;  %v69_v11 = vld [vmem:[%s9048_s1 + $0x8] sm:$0xff]  ;;  %v5231_v13 = vld [vmem:[%s9049_s0 + $0xf1] sm:$0xff]  ;;  %v72_v16 = vld [vmem:[%s9048_s1 + $0x20] sm:$0xff] }
   0x6   :  { %203 = vmatpush.msra.mxu0 %v4345_v6  ;;  %292 = vmatpush.msra.mxu1 %v4346_v7  ;;  %v76_v12 = vld [vmem:[%s9049_s0 + $0x1] sm:$0xff]  ;;  %v74_v15 = vld [vmem:[%s9048_s1 + $0x30] sm:$0xf]  ;;  %v4458_v5 = vld [vmem:[%s9048_s1 + $0xb8] sm:$0xf] }
   0x7   :  { %4927 = vmatpush.msra.mxu2 %v4346_v7  ;;  %548 = vmatpush.msra.mxu3 %v71_v8  ;;  %v70_v17 = vld [vmem:[%s9048_s1 + $0x10] sm:$0xff]  ;;  %v68_v18 = vld [vmem:[%s9048_s1] sm:$0xff]  ;;  %v45_v20 = vld [vmem:[%s9049_s0 + $0x8] sm:$0xff] }
   0x8   :  { %204 = vmatpush.msra.mxu0 %v4343_v9  ;;  %293 = vmatpush.msra.mxu1 %v4344_v10  ;;  %v77_v19 = vld [vmem:[%s9049_s0 + $0x9] sm:$0xff]  ;;  %v78_v21 = vld [vmem:[%s9049_s0 + $0x11] sm:$0xff]  ;;  %v79_v23 = vld [vmem:[%s9049_s0 + $0x21] sm:$0xff] }
   0x9   :  { %4928 = vmatpush.msra.mxu2 %v4344_v10  ;;  %549 = vmatpush.msra.mxu3 %v69_v11  ;;  %v46_v22 = vld [vmem:[%s9049_s0 + $0x10] sm:$0xff]  ;;  %v47_v24 = vld [vmem:[%s9049_s0 + $0x20] sm:$0xff]  ;;  %v48_v26 = vld [vmem:[%s9049_s0 + $0x28] sm:$0xff] }
   0xa   :  { %4352 = vmatmul.msk.f32.vlgmr.msra.gmra.mxu0 %vm109_vm1, %v76_v12  ;;  %4377 = vmatmul.msk.f32.vlgmr.msra.gmra.mxu1 %vm109_vm1, %v76_v12  ;;  %v80_v25 = vld [vmem:[%s9049_s0 + $0x29] sm:$0xff]  ;;  %v81_v27 = vld [vmem:[%s9049_s0 + $0x31] sm:$0xff]  ;;  %v82_v29 = vld [vmem:[%s9049_s0 + $0x41] sm:$0xff] }
   0xb   :  { %4400 = vmatmul.msk.f32.vlgmr.msra.gmra.mxu2 %vm109_vm1, %v5231_v13  ;;  %4427 = vmatmul.msk.f32.vlgmr.msra.gmra.mxu3 %vm109_vm1, %v44_v14  ;;  %v49_v28 = vld [vmem:[%s9049_s0 + $0x30] sm:$0xff]  ;;  %v50_v30 = vld [vmem:[%s9049_s0 + $0x40] sm:$0xff]  ;;  %v51_v32 = vld [vmem:[%s9049_s0 + $0x48] sm:$0xff] }
   0xc   :  { %4401 = vmatpush.msk.msrb.mxu2 %vm182_vm0, %v74_v15  ;;  %v83_v31 = vld [vmem:[%s9049_s0 + $0x49] sm:$0xff]  ;;  %v84_v33 = vld [vmem:[%s9049_s0 + $0x51] sm:$0xff]  ;;  %v85_v35 = vld [vmem:[%s9049_s0 + $0x61] sm:$0xff]  ;;  %4484 = vmatpush.msk.msrb.mxu1 %vm182_vm0, %v4458_v5 }
   0xd   :  { %v52_v34 = vld [vmem:[%s9049_s0 + $0x50] sm:$0xff]  ;;  %v53_v36 = vld [vmem:[%s9049_s0 + $0x60] sm:$0xff]  ;;  %v54_v38 = vld [vmem:[%s9049_s0 + $0x68] sm:$0xff] }
   0xe   :  { %458 = vmatpush.msrb.mxu2 %v72_v16  ;;  %v86_v37 = vld [vmem:[%s9049_s0 + $0x69] sm:$0xff]  ;;  %v87_v39 = vld [vmem:[%s9049_s0 + $0x71] sm:$0xff]  ;;  %v88_v41 = vld [vmem:[%s9049_s0 + $0x81] sm:$0xff] }
   0xf   :  { %v55_v40 = vld [vmem:[%s9049_s0 + $0x70] sm:$0xff]  ;;  %v56_v42 = vld [vmem:[%s9049_s0 + $0x80] sm:$0xff]  ;;  %v57_v44 = vld [vmem:[%s9049_s0 + $0x88] sm:$0xff] }
  0x10   :  { %459 = vmatpush.msrb.mxu2 %v70_v17  ;;  %v89_v43 = vld [vmem:[%s9049_s0 + $0x89] sm:$0xff]  ;;  %v90_v45 = vld [vmem:[%s9049_s0 + $0x91] sm:$0xff]  ;;  %v91_v47 = vld [vmem:[%s9049_s0 + $0xa1] sm:$0xff] }
  0x11   :  { %v58_v46 = vld [vmem:[%s9049_s0 + $0x90] sm:$0xff]  ;;  %v59_v48 = vld [vmem:[%s9049_s0 + $0xa0] sm:$0xff]  ;;  %v60_v52 = vld [vmem:[%s9049_s0 + $0xa8] sm:$0xff] }
  0x12   :  { %460 = vmatpush.msrb.mxu2 %v68_v18  ;;  %4353 = vmatmul.msk.f32.gmra.mxu0 %vm109_vm1, %v77_v19  ;;  %v92_v51 = vld [vmem:[%s9049_s0 + $0xa9] sm:$0xff]  ;;  %v93_v57 = vld [vmem:[%s9049_s0 + $0xb1] sm:$0xff]  ;;  %v94_v0 = vld [vmem:[%s9049_s0 + $0xc1] sm:$0xff] }
  0x13   :  { %4378 = vmatmul.msk.f32.gmra.mxu1 %vm109_vm1, %v77_v19  ;;  %4402 = vmatmul.msk.f32.vlgmr.msrb.gmra.mxu2 %vm109_vm1, %v44_v14  ;;  %v61_v59 = vld [vmem:[%s9049_s0 + $0xb0] sm:$0xff]  ;;  %v62_v4 = vld [vmem:[%s9049_s0 + $0xc0] sm:$0xff]  ;;  %v4456_v7 = vld [vmem:[%s9048_s1 + $0xa8] sm:$0xff] }
  0x14   :  { %4428 = vmatmul.msk.f32.gmra.mxu3 %vm109_vm1, %v45_v20  ;;  %v4457_v3 = vld [vmem:[%s9048_s1 + $0xb0] sm:$0xf]  ;;  %836 = vmatpush.msrb.mxu1 %v4456_v7  ;;  %v4454_v15 = vld [vmem:[%s9048_s1 + $0x98] sm:$0xff]  ;;  %v63_v16 = vld [vmem:[%s9049_s0 + $0xc8] sm:$0xff] }
  0x15   :  { %4459 = vmatpush.msk.msrb.mxu0 %vm182_vm0, %v4457_v3  ;;  %v95_v11 = vld [vmem:[%s9049_s0 + $0xc9] sm:$0xff]  ;;  %v4516_v18 = vld [vmem:[%s9048_s1 + $0xf8] sm:$0xf] }
  0x16   :  { %837 = vmatpush.msrb.mxu1 %v4454_v15  ;;  %v4452_v17 = vld [vmem:[%s9048_s1 + $0x88] sm:$0xff]  ;;  %4542 = vmatpush.msk.msrb.mxu3 %vm182_vm0, %v4516_v18 }
  0x17   :  { %v624_v7 = vld [vmem:[%s9049_s0 + $0xa] sm:$0xff] }
  0x18   :  { %838 = vmatpush.msrb.mxu1 %v4452_v17  ;;  %v625_v17 = vld [vmem:[%s9049_s0 + $0x12] sm:$0xff] }
  0x19   :  { %v961_v18 = vld [vmem:[%s9049_s0 + $0xb] sm:$0xff] }
  0x1a   :  { %4354 = vmatmul.msk.f32.gmra.mxu0 %vm109_vm1, %v78_v21 }
  0x1b   :  { %4379 = vmatmul.msk.f32.gmra.mxu1 %vm109_vm1, %v78_v21  ;;  %4403 = vmatmul.msk.f32.gmra.mxu2 %vm109_vm1, %v45_v20  ;;  %v4455_v20 = vld [vmem:[%s9048_s1 + $0xa0] sm:$0xff]  ;;  %v4514_v21 = vld [vmem:[%s9048_s1 + $0xe8] sm:$0xff] }
  0x1c   :  { %4429 = vmatmul.msk.f32.gmra.mxu3 %vm109_vm1, %v46_v22  ;;  %747 = vmatpush.msrb.mxu0 %v4455_v20 }
  0x1d   :  { %1173 = vmatpush.msrb.mxu3 %v4514_v21 }
  0x22   :  { %4355 = vmatmul.msk.f32.gmra.mxu0 %vm109_vm1, %v79_v23 }
  0x23   :  { %4380 = vmatmul.msk.f32.gmra.mxu1 %vm109_vm1, %v79_v23  ;;  %4404 = vmatmul.msk.f32.gmra.mxu2 %vm109_vm1, %v46_v22 }
  0x24   :  { %4430 = vmatmul.msk.f32.gmra.mxu3 %vm109_vm1, %v47_v24 }
  0x2a   :  { %4356 = vmatmul.msk.f32.gmra.mxu0 %vm109_vm1, %v80_v25 }
  0x2b   :  { %4381 = vmatmul.msk.f32.gmra.mxu1 %vm109_vm1, %v80_v25  ;;  %4405 = vmatmul.msk.f32.gmra.mxu2 %vm109_vm1, %v47_v24  ;;  %v96_v25 = vld [vmem:[%s9049_s0 + $0xd1] sm:$0xff] }
  0x2c   :  { %4431 = vmatmul.msk.f32.gmra.mxu3 %vm109_vm1, %v48_v26 }
  0x32   :  { %4357 = vmatmul.msk.f32.gmra.mxu0 %vm109_vm1, %v81_v27 }
  0x33   :  { %4382 = vmatmul.msk.f32.gmra.mxu1 %vm109_vm1, %v81_v27  ;;  %4406 = vmatmul.msk.f32.gmra.mxu2 %vm109_vm1, %v48_v26 }
  0x34   :  { %4432 = vmatmul.msk.f32.gmra.mxu3 %vm109_vm1, %v49_v28 }
  0x3a   :  { %4358 = vmatmul.msk.f32.gmra.mxu0 %vm109_vm1, %v82_v29 }
  0x3b   :  { %4383 = vmatmul.msk.f32.gmra.mxu1 %vm109_vm1, %v82_v29  ;;  %4407 = vmatmul.msk.f32.gmra.mxu2 %vm109_vm1, %v49_v28  ;;  %v4453_v28 = vld [vmem:[%s9048_s1 + $0x90] sm:$0xff]  ;;  %v4512_v29 = vld [vmem:[%s9048_s1 + $0xd8] sm:$0xff] }
  0x3c   :  { %4433 = vmatmul.msk.f32.gmra.mxu3 %vm109_vm1, %v50_v30  ;;  %748 = vmatpush.msrb.mxu0 %v4453_v28  ;;  %v962_v28 = vld [vmem:[%s9049_s0 + $0x13] sm:$0xff] }
  0x3d   :  { %1174 = vmatpush.msrb.mxu3 %v4512_v29 }
  0x42   :  { %4359 = vmatmul.msk.f32.gmra.mxu0 %vm109_vm1, %v83_v31 }
  0x43   :  { %4384 = vmatmul.msk.f32.gmra.mxu1 %vm109_vm1, %v83_v31  ;;  %4408 = vmatmul.msk.f32.gmra.mxu2 %vm109_vm1, %v50_v30  ;;  %v64_v30 = vld [vmem:[%s9049_s0 + $0xd0] sm:$0xff]  ;;  %v4451_v31 = vld [vmem:[%s9048_s1 + $0x80] sm:$0xff] }
  0x44   :  { %4434 = vmatmul.msk.f32.gmra.mxu3 %vm109_vm1, %v51_v32  ;;  %749 = vmatpush.msrb.mxu0 %v4451_v31 }
  0x4a   :  { %4360 = vmatmul.msk.f32.gmra.mxu0 %vm109_vm1, %v84_v33 }
  0x4b   :  { %4385 = vmatmul.msk.f32.gmra.mxu1 %vm109_vm1, %v84_v33  ;;  %4409 = vmatmul.msk.f32.gmra.mxu2 %vm109_vm1, %v51_v32  ;;  %v4510_v32 = vld [vmem:[%s9048_s1 + $0xc8] sm:$0xff]  ;;  %v4515_v33 = vld [vmem:[%s9048_s1 + $0xf0] sm:$0xf] }
  0x4c   :  { %4435 = vmatmul.msk.f32.gmra.mxu3 %vm109_vm1, %v52_v34  ;;  %4517 = vmatpush.msk.msra.mxu2 %vm182_vm0, %v4515_v33 }
  0x4d   :  { %1175 = vmatpush.msrb.mxu3 %v4510_v32 }
  0x52   :  { %4361 = vmatmul.msk.f32.gmra.mxu0 %vm109_vm1, %v85_v35 }
  0x53   :  { %4386 = vmatmul.msk.f32.gmra.mxu1 %vm109_vm1, %v85_v35  ;;  %4410 = vmatmul.msk.f32.gmra.mxu2 %vm109_vm1, %v52_v34  ;;  %v4513_v35 = vld [vmem:[%s9048_s1 + $0xe0] sm:$0xff] }
  0x54   :  { %4436 = vmatmul.msk.f32.gmra.mxu3 %vm109_vm1, %v53_v36  ;;  %1084 = vmatpush.msra.mxu2 %v4513_v35  ;;  %v627_v35 = vld [vmem:[%s9049_s0 + $0x2a] sm:$0xff] }
  0x5a   :  { %4362 = vmatmul.msk.f32.gmra.mxu0 %vm109_vm1, %v86_v37 }
  0x5b   :  { %4387 = vmatmul.msk.f32.gmra.mxu1 %vm109_vm1, %v86_v37  ;;  %4411 = vmatmul.msk.f32.gmra.mxu2 %vm109_vm1, %v53_v36 }
  0x5c   :  { %4437 = vmatmul.msk.f32.gmra.mxu3 %vm109_vm1, %v54_v38 }
  0x62   :  { %4363 = vmatmul.msk.f32.gmra.mxu0 %vm109_vm1, %v87_v39 }
  0x63   :  { %4388 = vmatmul.msk.f32.gmra.mxu1 %vm109_vm1, %v87_v39  ;;  %4412 = vmatmul.msk.f32.gmra.mxu2 %vm109_vm1, %v54_v38  ;;  %v97_v39 = vld [vmem:[%s9049_s0 + $0xe1] sm:$0xff] }
  0x64   :  { %4438 = vmatmul.msk.f32.gmra.mxu3 %vm109_vm1, %v55_v40 }
  0x6a   :  { %4364 = vmatmul.msk.f32.gmra.mxu0 %vm109_vm1, %v88_v41 }
  0x6b   :  { %4389 = vmatmul.msk.f32.gmra.mxu1 %vm109_vm1, %v88_v41  ;;  %4413 = vmatmul.msk.f32.gmra.mxu2 %vm109_vm1, %v55_v40 }
  0x6c   :  { %4439 = vmatmul.msk.f32.gmra.mxu3 %vm109_vm1, %v56_v42 }
  0x72   :  { %4365 = vmatmul.msk.f32.gmra.mxu0 %vm109_vm1, %v89_v43 }
  0x73   :  { %4390 = vmatmul.msk.f32.gmra.mxu1 %vm109_vm1, %v89_v43  ;;  %4414 = vmatmul.msk.f32.gmra.mxu2 %vm109_vm1, %v56_v42  ;;  %v4511_v42 = vld [vmem:[%s9048_s1 + $0xd0] sm:$0xff]  ;;  %v65_v43 = vld [vmem:[%s9049_s0 + $0xe0] sm:$0xff] }
  0x74   :  { %4440 = vmatmul.msk.f32.gmra.mxu3 %vm109_vm1, %v57_v44  ;;  %1085 = vmatpush.msra.mxu2 %v4511_v42 }
  0x7a   :  { %4366 = vmatmul.msk.f32.gmra.mxu0 %vm109_vm1, %v90_v45 }
  0x7b   :  { %4391 = vmatmul.msk.f32.gmra.mxu1 %vm109_vm1, %v90_v45  ;;  %4415 = vmatmul.msk.f32.gmra.mxu2 %vm109_vm1, %v57_v44  ;;  %v4509_v44 = vld [vmem:[%s9048_s1 + $0xc0] sm:$0xff] }
  0x7c   :  { %4441 = vmatmul.msk.f32.gmra.mxu3 %vm109_vm1, %v58_v46  ;;  %1086 = vmatpush.msra.mxu2 %v4509_v44 }
  0x82   :  { %4367 = vmatmul.msk.f32.gmra.mxu0 %vm109_vm1, %v91_v47 }
  0x83   :  { %4392 = vmatmul.msk.f32.gmra.mxu1 %vm109_vm1, %v91_v47  ;;  %4416 = vmatmul.msk.f32.gmra.mxu2 %vm109_vm1, %v58_v46 }
  0x84   :  { %4442 = vmatmul.msk.f32.gmra.mxu3 %vm109_vm1, %v59_v48 }
  0x87   :  { %v206_v49 = vpop.f32.mrf.mxu0  ;;  %v295_v50 = vpop.f32.mrf.mxu1 }
  0x8a   :  { %4368 = vmatmul.msk.f32.gmra.mxu0 %vm109_vm1, %v92_v51 }
  0x8b   :  { %4393 = vmatmul.msk.f32.gmra.mxu1 %vm109_vm1, %v92_v51  ;;  %4417 = vmatmul.msk.f32.gmra.mxu2 %vm109_vm1, %v59_v48 }
  0x8c   :  { %4443 = vmatmul.msk.f32.gmra.mxu3 %vm109_vm1, %v60_v52 }
  0x8e   :  { %v5414_v53 = vpop.f32.mrf.mxu2  ;;  %v551_v54 = vpop.f32.mrf.mxu3 }
  0x8f   :  { %9134 = vst [vmem:[#allocation2_spill] sm:$0xff] %v5414_v53  ;;  %v5416_v55 = vadd.f32 %v551_v54, %v295_v50  ;;  %v209_v56 = vpop.f32.mrf.mxu0 }
  0x90   :  { %v298_v58 = vpop.f32.mrf.mxu1 }
  0x91   :  { %9135 = vst [vmem:[#allocation3_spill] sm:$0xff] %v5416_v55 }
  0x92   :  { %4369 = vmatmul.msk.f32.gmra.mxu0 %vm109_vm1, %v93_v57 }
  0x93   :  { %4394 = vmatmul.msk.f32.gmra.mxu1 %vm109_vm1, %v93_v57  ;;  %4418 = vmatmul.msk.f32.gmra.mxu2 %vm109_vm1, %v60_v52  ;;  %v66_v52 = vld [vmem:[%s9049_s0 + $0xe8] sm:$0xff] }
  0x94   :  { %4444 = vmatmul.msk.f32.gmra.mxu3 %vm109_vm1, %v61_v59 }
  0x96   :  { %v462_v60 = vpop.f32.mrf.mxu2 }
  0x97   :  { %v5428_v61 = vadd.f32 %v462_v60, %v206_v49  ;;  %v554_v62 = vpop.f32.mrf.mxu3  ;;  %v212_v63 = vpop.f32.mrf.mxu0  ;;  %v98_v49 = vld [vmem:[%s9049_s0 + $0xe9] sm:$0xff] }
  0x98   :  { %v5433_v1 = vadd.f32 %v554_v62, %v298_v58  ;;  %v301_v2 = vpop.f32.mrf.mxu1  ;;  %v623_v62 = vld [vmem:[%s9049_s0 + $0x2] sm:$0xff] }
  0x99   :  { %9136 = vst [vmem:[#allocation4_spill] sm:$0xff] %v5428_v61 }
  0x9a   :  { %9137 = vst [vmem:[#allocation5_spill] sm:$0xff] %v5433_v1  ;;  %4370 = vmatmul.msk.f32.gmra.mxu0 %vm109_vm1, %v94_v0 }
  0x9b   :  { %4395 = vmatmul.msk.f32.gmra.mxu1 %vm109_vm1, %v94_v0  ;;  %4419 = vmatmul.msk.f32.gmra.mxu2 %vm109_vm1, %v61_v59 }
  0x9c   :  { %4445 = vmatmul.msk.f32.gmra.mxu3 %vm109_vm1, %v62_v4 }
  0x9e   :  { %v465_v6 = vpop.f32.mrf.mxu2 }
  0x9f   :  { %v5453_v8 = vadd.f32 %v465_v6, %v209_v56  ;;  %v557_v9 = vpop.f32.mrf.mxu3  ;;  %v215_v10 = vpop.f32.mrf.mxu0 }
  0xa0   :  { %v5458_v12 = vadd.f32 %v557_v9, %v301_v2  ;;  %v304_v14 = vpop.f32.mrf.mxu1 }
  0xa1   :  { %9138 = vst [vmem:[#allocation6_spill] sm:$0xff] %v5453_v8 }
  0xa2   :  { %9139 = vst [vmem:[#allocation7_spill] sm:$0xff] %v5458_v12  ;;  %4371 = vmatmul.msk.f32.gmra.mxu0 %vm109_vm1, %v95_v11 }
  0xa3   :  { %4396 = vmatmul.msk.f32.gmra.mxu1 %vm109_vm1, %v95_v11  ;;  %4420 = vmatmul.msk.f32.gmra.mxu2 %vm109_vm1, %v62_v4 }
  0xa4   :  { %4446 = vmatmul.msk.f32.gmra.mxu3 %vm109_vm1, %v63_v16 }
  0xa6   :  { %v468_v19 = vpop.f32.mrf.mxu2 }
  0xa7   :  { %v5483_v22 = vadd.f32 %v468_v19, %v212_v63  ;;  %v560_v23 = vpop.f32.mrf.mxu3  ;;  %v218_v24 = vpop.f32.mrf.mxu0  ;;  %v67_v63 = vld [vmem:[%s9049_s0 + $0xf0] sm:$0xff] }
  0xa8   :  { %v5488_v26 = vadd.f32 %v560_v23, %v304_v14  ;;  %v307_v27 = vpop.f32.mrf.mxu1 }
  0xa9   :  { %9140 = vst [vmem:[#allocation8_spill] sm:$0xff] %v5483_v22  ;;  %v1297_v22 = vld [vmem:[%s9049_s0 + $0x4] sm:$0xff] }
  0xaa   :  { %4372 = vmatmul.msk.f32.gmra.mxu0 %vm109_vm1, %v96_v25 }
  0xab   :  { %4397 = vmatmul.msk.f32.gmra.mxu1 %vm109_vm1, %v96_v25  ;;  %4421 = vmatmul.msk.f32.gmra.mxu2 %vm109_vm1, %v63_v16 }
  0xac   :  { %4447 = vmatmul.msk.f32.gmra.mxu3 %vm109_vm1, %v64_v30 }
  0xae   :  { %v471_v34 = vpop.f32.mrf.mxu2 }
  0xaf   :  { %v5516_v36 = vadd.f32 %v471_v34, %v215_v10  ;;  %v563_v37 = vpop.f32.mrf.mxu3  ;;  %v221_v38 = vpop.f32.mrf.mxu0 }
  0xb0   :  { %v5521_v40 = vadd.f32 %v563_v37, %v307_v27  ;;  %v310_v41 = vpop.f32.mrf.mxu1  ;;  %v626_v27 = vld [vmem:[%s9049_s0 + $0x22] sm:$0xff] }
  0xb1   :  { %v963_v37 = vld [vmem:[%s9049_s0 + $0x23] sm:$0xff] }
  0xb2   :  { %4373 = vmatmul.msk.f32.gmra.mxu0 %vm109_vm1, %v97_v39 }
  0xb3   :  { %4398 = vmatmul.msk.f32.gmra.mxu1 %vm109_vm1, %v97_v39  ;;  %4422 = vmatmul.msk.f32.gmra.mxu2 %vm109_vm1, %v64_v30 }
  0xb4   :  { %4448 = vmatmul.msk.f32.gmra.mxu3 %vm109_vm1, %v65_v43 }
  0xb6   :  { %v474_v45 = vpop.f32.mrf.mxu2 }
  0xb7   :  { %v5536_v46 = vadd.f32 %v474_v45, %v218_v24  ;;  %v566_v47 = vpop.f32.mrf.mxu3  ;;  %v224_v48 = vpop.f32.mrf.mxu0  ;;  %v628_v45 = vld [vmem:[%s9049_s0 + $0x32] sm:$0xff] }
  0xb8   :  { %v5541_v50 = vadd.f32 %v566_v47, %v310_v41  ;;  %v313_v51 = vpop.f32.mrf.mxu1  ;;  %v964_v47 = vld [vmem:[%s9049_s0 + $0x2b] sm:$0xff] }
  0xba   :  { %4374 = vmatmul.msk.f32.gmra.mxu0 %vm109_vm1, %v98_v49 }
  0xbb   :  { %4399 = vmatmul.msk.f32.gmra.mxu1 %vm109_vm1, %v98_v49  ;;  %4423 = vmatmul.msk.f32.gmra.mxu2 %vm109_vm1, %v65_v43 }
  0xbc   :  { %4449 = vmatmul.msk.f32.gmra.mxu3 %vm109_vm1, %v66_v52 }
  0xbe   :  { %v477_v54 = vpop.f32.mrf.mxu2 }
  0xbf   :  { %v5550_v56 = vadd.f32 %v477_v54, %v221_v38  ;;  %v569_v57 = vpop.f32.mrf.mxu3  ;;  %v227_v58 = vpop.f32.mrf.mxu0 }
  0xc0   :  { %v5552_v59 = vadd.f32 %v569_v57, %v313_v51  ;;  %v316_v60 = vpop.f32.mrf.mxu1 }
  0xc2   :  { %4375 = vmatmul.msk.f32.gmra.mxu0 %vm109_vm1, %v5231_v13  ;;  %v960_v13 = vld [vmem:[%s9049_s0 + $0x3] sm:$0xff] }
  0xc3   :  { %4424 = vmatmul.msk.f32.gmra.mxu2 %vm109_vm1, %v66_v52  ;;  %4485 = vmatmul.msk.f32.vlgmr.msrb.gmra.mxu1 %vm109_vm1, %v623_v62 }
  0xc4   :  { %4450 = vmatmul.msk.f32.gmra.mxu3 %vm109_vm1, %v67_v63 }
  0xc6   :  { %v480_v0 = vpop.f32.mrf.mxu2 }
  0xc7   :  { %v5565_v2 = vadd.f32 %v480_v0, %v224_v48  ;;  %v572_v3 = vpop.f32.mrf.mxu3  ;;  %v230_v4 = vpop.f32.mrf.mxu0 }
  0xc8   :  { %v5567_v5 = vadd.f32 %v572_v3, %v316_v60  ;;  %v319_v6 = vpop.f32.mrf.mxu1  ;;  %v965_v60 = vld [vmem:[%s9049_s0 + $0x33] sm:$0xff] }
  0xca   :  { %4460 = vmatmul.msk.f32.vlgmr.msrb.gmra.mxu0 %vm109_vm1, %v623_v62 }
  0xcb   :  { %4425 = vmatmul.msk.f32.gmra.mxu2 %vm109_vm1, %v67_v63  ;;  %4486 = vmatmul.msk.f32.gmra.mxu1 %vm109_vm1, %v624_v7 }
  0xcc   :  { %4543 = vmatmul.msk.f32.vlgmr.msrb.gmra.mxu3 %vm109_vm1, %v960_v13 }
  0xce   :  { %v483_v9 = vpop.f32.mrf.mxu2 }
  0xcf   :  { %v5579_v10 = vadd.f32 %v483_v9, %v227_v58  ;;  %v575_v11 = vpop.f32.mrf.mxu3  ;;  %v233_v14 = vpop.f32.mrf.mxu0  ;;  %v629_v58 = vld [vmem:[%s9049_s0 + $0x42] sm:$0xff] }
  0xd0   :  { %v5581_v15 = vadd.f32 %v575_v11, %v319_v6  ;;  %v322_v16 = vpop.f32.mrf.mxu1 }
  0xd2   :  { %4461 = vmatmul.msk.f32.gmra.mxu0 %vm109_vm1, %v624_v7  ;;  %v630_v7 = vld [vmem:[%s9049_s0 + $0x4a] sm:$0xff] }
  0xd3   :  { %4487 = vmatmul.msk.f32.gmra.mxu1 %vm109_vm1, %v625_v17  ;;  %4518 = vmatmul.msk.f32.vlgmr.msra.gmra.mxu2 %vm109_vm1, %v960_v13  ;;  %v966_v13 = vld [vmem:[%s9049_s0 + $0x43] sm:$0xff] }
  0xd4   :  { %4544 = vmatmul.msk.f32.gmra.mxu3 %vm109_vm1, %v961_v18 }
  0xd6   :  { %v486_v19 = vpop.f32.mrf.mxu2 }
  0xd7   :  { %v5593_v20 = vadd.f32 %v486_v19, %v230_v4  ;;  %v578_v21 = vpop.f32.mrf.mxu3  ;;  %v236_v23 = vpop.f32.mrf.mxu0  ;;  %v631_v19 = vld [vmem:[%s9049_s0 + $0x52] sm:$0xff] }
  0xd8   :  { %v5595_v24 = vadd.f32 %v578_v21, %v322_v16  ;;  %v325_v25 = vpop.f32.mrf.mxu1  ;;  %v967_v21 = vld [vmem:[%s9049_s0 + $0x4b] sm:$0xff] }
  0xda   :  { %4462 = vmatmul.msk.f32.gmra.mxu0 %vm109_vm1, %v625_v17 }
  0xdb   :  { %4488 = vmatmul.msk.f32.gmra.mxu1 %vm109_vm1, %v626_v27  ;;  %4519 = vmatmul.msk.f32.gmra.mxu2 %vm109_vm1, %v961_v18 }
  0xdc   :  { %4545 = vmatmul.msk.f32.gmra.mxu3 %vm109_vm1, %v962_v28 }
  0xde   :  { %v489_v29 = vpop.f32.mrf.mxu2 }
  0xdf   :  { %v5607_v30 = vadd.f32 %v489_v29, %v233_v14  ;;  %v581_v31 = vpop.f32.mrf.mxu3  ;;  %v239_v32 = vpop.f32.mrf.mxu0 }
  0xe0   :  { %v5609_v33 = vadd.f32 %v581_v31, %v325_v25  ;;  %v328_v34 = vpop.f32.mrf.mxu1 }
  0xe2   :  { %4463 = vmatmul.msk.f32.gmra.mxu0 %vm109_vm1, %v626_v27 }
  0xe3   :  { %4489 = vmatmul.msk.f32.gmra.mxu1 %vm109_vm1, %v627_v35  ;;  %4520 = vmatmul.msk.f32.gmra.mxu2 %vm109_vm1, %v962_v28 }
  0xe4   :  { %4546 = vmatmul.msk.f32.gmra.mxu3 %vm109_vm1, %v963_v37 }
  0xe6   :  { %v492_v38 = vpop.f32.mrf.mxu2 }
  0xe7   :  { %v5621_v39 = vadd.f32 %v492_v38, %v236_v23  ;;  %v584_v41 = vpop.f32.mrf.mxu3  ;;  %v242_v42 = vpop.f32.mrf.mxu0 }
  0xe8   :  { %v5623_v43 = vadd.f32 %v584_v41, %v328_v34  ;;  %v331_v44 = vpop.f32.mrf.mxu1  ;;  %v968_v34 = vld [vmem:[%s9049_s0 + $0x53] sm:$0xff] }
  0xea   :  { %4464 = vmatmul.msk.f32.gmra.mxu0 %vm109_vm1, %v627_v35 }
  0xeb   :  { %4490 = vmatmul.msk.f32.gmra.mxu1 %vm109_vm1, %v628_v45  ;;  %4521 = vmatmul.msk.f32.gmra.mxu2 %vm109_vm1, %v963_v37 }
  0xec   :  { %4547 = vmatmul.msk.f32.gmra.mxu3 %vm109_vm1, %v964_v47 }
  0xee   :  { %v495_v48 = vpop.f32.mrf.mxu2 }
  0xef   :  { %v5635_v49 = vadd.f32 %v495_v48, %v239_v32  ;;  %v587_v51 = vpop.f32.mrf.mxu3  ;;  %v245_v52 = vpop.f32.mrf.mxu0  ;;  %v632_v32 = vld [vmem:[%s9049_s0 + $0x62] sm:$0xff] }
  0xf0   :  { %v5637_v54 = vadd.f32 %v587_v51, %v331_v44  ;;  %v334_v57 = vpop.f32.mrf.mxu1 }
  0xf2   :  { %4465 = vmatmul.msk.f32.gmra.mxu0 %vm109_vm1, %v628_v45  ;;  %v633_v45 = vld [vmem:[%s9049_s0 + $0x6a] sm:$0xff] }
  0xf3   :  { %4491 = vmatmul.msk.f32.gmra.mxu1 %vm109_vm1, %v629_v58  ;;  %4522 = vmatmul.msk.f32.gmra.mxu2 %vm109_vm1, %v964_v47  ;;  %v969_v47 = vld [vmem:[%s9049_s0 + $0x63] sm:$0xff] }
  0xf4   :  { %4548 = vmatmul.msk.f32.gmra.mxu3 %vm109_vm1, %v965_v60 }
  0xf6   :  { %v498_v62 = vpop.f32.mrf.mxu2 }
  0xf7   :  { %v5649_v63 = vadd.f32 %v498_v62, %v242_v42  ;;  %v590_v0 = vpop.f32.mrf.mxu3  ;;  %v248_v3 = vpop.f32.mrf.mxu0  ;;  %v634_v62 = vld [vmem:[%s9049_s0 + $0x72] sm:$0xff] }
  0xf8   :  { %v5651_v4 = vadd.f32 %v590_v0, %v334_v57  ;;  %v337_v6 = vpop.f32.mrf.mxu1  ;;  %v970_v0 = vld [vmem:[%s9049_s0 + $0x6b] sm:$0xff] }
  0xfa   :  { %4466 = vmatmul.msk.f32.gmra.mxu0 %vm109_vm1, %v629_v58 }
  0xfb   :  { %4492 = vmatmul.msk.f32.gmra.mxu1 %vm109_vm1, %v630_v7  ;;  %4523 = vmatmul.msk.f32.gmra.mxu2 %vm109_vm1, %v965_v60 }
  0xfc   :  { %4549 = vmatmul.msk.f32.gmra.mxu3 %vm109_vm1, %v966_v13 }
  0xfe   :  { %v501_v9 = vpop.f32.mrf.mxu2 }
  0xff   :  { %v5663_v11 = vadd.f32 %v501_v9, %v245_v52  ;;  %v593_v14 = vpop.f32.mrf.mxu3  ;;  %v251_v16 = vpop.f32.mrf.mxu0 }
 0x100   :  { %v5665_v17 = vadd.f32 %v593_v14, %v337_v6  ;;  %v340_v18 = vpop.f32.mrf.mxu1 }
 0x102   :  { %9141 = vst [vmem:[#allocation9_spill] sm:$0xff] %v5665_v17  ;;  %4467 = vmatmul.msk.f32.gmra.mxu0 %vm109_vm1, %v630_v7 }
 0x103   :  { %4493 = vmatmul.msk.f32.gmra.mxu1 %vm109_vm1, %v631_v19  ;;  %4524 = vmatmul.msk.f32.gmra.mxu2 %vm109_vm1, %v966_v13 }
 0x104   :  { %4550 = vmatmul.msk.f32.gmra.mxu3 %vm109_vm1, %v967_v21 }
 0x106   :  { %v504_v23 = vpop.f32.mrf.mxu2 }
 0x107   :  { %v5677_v25 = vadd.f32 %v504_v23, %v248_v3  ;;  %v596_v27 = vpop.f32.mrf.mxu3  ;;  %v254_v28 = vpop.f32.mrf.mxu0 }
 0x108   :  { %v5679_v29 = vadd.f32 %v596_v27, %v340_v18  ;;  %v343_v31 = vpop.f32.mrf.mxu1  ;;  %v971_v18 = vld [vmem:[%s9049_s0 + $0x73] sm:$0xff] }
 0x109   :  { %9142 = vst [vmem:[#allocation10_spill] sm:$0xff] %v5677_v25 }
 0x10a   :  { %9143 = vst [vmem:[#allocation11_spill] sm:$0xff] %v5679_v29  ;;  %4468 = vmatmul.msk.f32.gmra.mxu0 %vm109_vm1, %v631_v19 }
 0x10b   :  { %4494 = vmatmul.msk.f32.gmra.mxu1 %vm109_vm1, %v632_v32  ;;  %4525 = vmatmul.msk.f32.gmra.mxu2 %vm109_vm1, %v967_v21 }
 0x10c   :  { %4551 = vmatmul.msk.f32.gmra.mxu3 %vm109_vm1, %v968_v34 }
 0x10e   :  { %v507_v35 = vpop.f32.mrf.mxu2 }
 0x10f   :  { %v5691_v37 = vadd.f32 %v507_v35, %v251_v16  ;;  %v599_v38 = vpop.f32.mrf.mxu3  ;;  %v257_v41 = vpop.f32.mrf.mxu0  ;;  %v635_v16 = vld [vmem:[%s9049_s0 + $0x82] sm:$0xff] }
 0x110   :  { %v5693_v42 = vadd.f32 %v599_v38, %v343_v31  ;;  %v346_v44 = vpop.f32.mrf.mxu1 }
 0x111   :  { %9144 = vst [vmem:[#allocation12_spill] sm:$0xff] %v5691_v37  ;;  %v1315_v37 = vld [vmem:[%s9049_s0 + $0xc4] sm:$0xff] }
 0x112   :  { %9145 = vst [vmem:[#allocation13_spill] sm:$0xff] %v5693_v42  ;;  %4469 = vmatmul.msk.f32.gmra.mxu0 %vm109_vm1, %v632_v32  ;;  %v636_v32 = vld [vmem:[%s9049_s0 + $0x8a] sm:$0xff] }
 0x113   :  { %4495 = vmatmul.msk.f32.gmra.mxu1 %vm109_vm1, %v633_v45  ;;  %4526 = vmatmul.msk.f32.gmra.mxu2 %vm109_vm1, %v968_v34  ;;  %v972_v34 = vld [vmem:[%s9049_s0 + $0x83] sm:$0xff] }
 0x114   :  { %4552 = vmatmul.msk.f32.gmra.mxu3 %vm109_vm1, %v969_v47 }
 0x116   :  { %v510_v48 = vpop.f32.mrf.mxu2 }
 0x117   :  { %v5705_v51 = vadd.f32 %v510_v48, %v254_v28  ;;  %v602_v52 = vpop.f32.mrf.mxu3  ;;  %v260_v57 = vpop.f32.mrf.mxu0  ;;  %v637_v48 = vld [vmem:[%s9049_s0 + $0x92] sm:$0xff] }
 0x118   :  { %v5707_v58 = vadd.f32 %v602_v52, %v346_v44  ;;  %v349_v60 = vpop.f32.mrf.mxu1  ;;  %v973_v52 = vld [vmem:[%s9049_s0 + $0x8b] sm:$0xff] }
 0x119   :  { %9146 = vst [vmem:[#allocation14_spill] sm:$0xff] %v5705_v51  ;;  %v981_v51 = vld [vmem:[%s9049_s0 + $0xe3] sm:$0xff] }
 0x11a   :  { %9147 = vst [vmem:[#allocation15_spill] sm:$0xff] %v5707_v58  ;;  %4470 = vmatmul.msk.f32.gmra.mxu0 %vm109_vm1, %v633_v45 }
 0x11b   :  { %4496 = vmatmul.msk.f32.gmra.mxu1 %vm109_vm1, %v634_v62  ;;  %4527 = vmatmul.msk.f32.gmra.mxu2 %vm109_vm1, %v969_v47 }
 0x11c   :  { %4553 = vmatmul.msk.f32.gmra.mxu3 %vm109_vm1, %v970_v0 }
 0x11e   :  { %v513_v3 = vpop.f32.mrf.mxu2 }
 0x11f   :  { %v5719_v6 = vadd.f32 %v513_v3, %v257_v41  ;;  %v605_v7 = vpop.f32.mrf.mxu3  ;;  %v263_v13 = vpop.f32.mrf.mxu0 }
 0x120   :  { %v5721_v9 = vadd.f32 %v605_v7, %v349_v60  ;;  %v352_v14 = vpop.f32.mrf.mxu1 }
 0x121   :  { %9148 = vst [vmem:[#allocation16_spill] sm:$0xff] %v5719_v6  ;;  %v4567_v6 = vld [vmem:[%s9048_s1 + $0x100] sm:$0xff] }
 0x122   :  { %9149 = vst [vmem:[#allocation17_spill] sm:$0xff] %v5721_v9  ;;  %4471 = vmatmul.msk.f32.gmra.mxu0 %vm109_vm1, %v634_v62 }
 0x123   :  { %4497 = vmatmul.msk.f32.gmra.mxu1 %vm109_vm1, %v635_v16  ;;  %4528 = vmatmul.msk.f32.gmra.mxu2 %vm109_vm1, %v970_v0 }
 0x124   :  { %4554 = vmatmul.msk.f32.gmra.mxu3 %vm109_vm1, %v971_v18 }
 0x126   :  { %v516_v19 = vpop.f32.mrf.mxu2 }
 0x127   :  { %v5733_v21 = vadd.f32 %v516_v19, %v260_v57  ;;  %v608_v23 = vpop.f32.mrf.mxu3  ;;  %v266_v27 = vpop.f32.mrf.mxu0 }
 0x128   :  { %v5735_v28 = vadd.f32 %v608_v23, %v352_v14  ;;  %v355_v31 = vpop.f32.mrf.mxu1  ;;  %v974_v14 = vld [vmem:[%s9049_s0 + $0x93] sm:$0xff] }
 0x129   :  { %9150 = vst [vmem:[#allocation18_spill] sm:$0xff] %v5733_v21 }
 0x12a   :  { %9151 = vst [vmem:[#allocation19_spill] sm:$0xff] %v5735_v28  ;;  %4472 = vmatmul.msk.f32.gmra.mxu0 %vm109_vm1, %v635_v16 }
 0x12b   :  { %4498 = vmatmul.msk.f32.gmra.mxu1 %vm109_vm1, %v636_v32  ;;  %4529 = vmatmul.msk.f32.gmra.mxu2 %vm109_vm1, %v971_v18 }
 0x12c   :  { %4555 = vmatmul.msk.f32.gmra.mxu3 %vm109_vm1, %v972_v34 }
 0x12e   :  { %v519_v35 = vpop.f32.mrf.mxu2 }
 0x12f   :  { %v5747_v38 = vadd.f32 %v519_v35, %v263_v13  ;;  %v611_v41 = vpop.f32.mrf.mxu3  ;;  %v269_v44 = vpop.f32.mrf.mxu0  ;;  %v638_v13 = vld [vmem:[%s9049_s0 + $0xa2] sm:$0xff] }
 0x130   :  { %v5749_v45 = vadd.f32 %v611_v41, %v355_v31  ;;  %v358_v47 = vpop.f32.mrf.mxu1 }
 0x131   :  { %9152 = vst [vmem:[#allocation20_spill] sm:$0xff] %v5747_v38 }
 0x132   :  { %9153 = vst [vmem:[#allocation21_spill] sm:$0xff] %v5749_v45  ;;  %4473 = vmatmul.msk.f32.gmra.mxu0 %vm109_vm1, %v636_v32  ;;  %v639_v32 = vld [vmem:[%s9049_s0 + $0xaa] sm:$0xff] }
 0x133   :  { %4499 = vmatmul.msk.f32.gmra.mxu1 %vm109_vm1, %v637_v48  ;;  %4530 = vmatmul.msk.f32.gmra.mxu2 %vm109_vm1, %v972_v34  ;;  %v975_v34 = vld [vmem:[%s9049_s0 + $0xa3] sm:$0xff] }
 0x134   :  { %4556 = vmatmul.msk.f32.gmra.mxu3 %vm109_vm1, %v973_v52 }
 0x136   :  { %v522_v57 = vpop.f32.mrf.mxu2 }
 0x137   :  { %v5761_v60 = vadd.f32 %v522_v57, %v266_v27  ;;  %v614_v62 = vpop.f32.mrf.mxu3  ;;  %v272_v0 = vpop.f32.mrf.mxu0 }
 0x138   :  { %v5763_v3 = vadd.f32 %v614_v62, %v358_v47  ;;  %v361_v7 = vpop.f32.mrf.mxu1 }
 0x139   :  { %9154 = vst [vmem:[#allocation22_spill] sm:$0xff] %v5761_v60 }
 0x13a   :  { %9155 = vst [vmem:[#allocation23_spill] sm:$0xff] %v5763_v3  ;;  %4474 = vmatmul.msk.f32.gmra.mxu0 %vm109_vm1, %v637_v48  ;;  %v640_v48 = vld [vmem:[%s9049_s0 + $0xb2] sm:$0xff] }
 0x13b   :  { %4500 = vmatmul.msk.f32.gmra.mxu1 %vm109_vm1, %v638_v13  ;;  %4531 = vmatmul.msk.f32.gmra.mxu2 %vm109_vm1, %v973_v52  ;;  %v976_v52 = vld [vmem:[%s9049_s0 + $0xab] sm:$0xff] }
 0x13c   :  { %4557 = vmatmul.msk.f32.gmra.mxu3 %vm109_vm1, %v974_v14 }
 0x13e   :  { %v525_v16 = vpop.f32.mrf.mxu2 }
 0x13f   :  { %v5775_v18 = vadd.f32 %v525_v16, %v269_v44  ;;  %v617_v19 = vpop.f32.mrf.mxu3  ;;  %v275_v23 = vpop.f32.mrf.mxu0 }
 0x140   :  { %v5777_v27 = vadd.f32 %v617_v19, %v361_v7  ;;  %v5779_v31 = vpop.f32.mrf.mxu1 }
 0x141   :  { %9156 = vst [vmem:[#allocation24_spill] sm:$0xff] %v5775_v18 }
 0x142   :  { %9157 = vst [vmem:[#allocation25_spill] sm:$0xff] %v5777_v27  ;;  %4475 = vmatmul.msk.f32.gmra.mxu0 %vm109_vm1, %v638_v13  ;;  %v641_v13 = vld [vmem:[%s9049_s0 + $0xc2] sm:$0xff] }
 0x143   :  { %9158 = vst [vmem:[#allocation26_spill] sm:$0xff] %v5779_v31  ;;  %4501 = vmatmul.msk.f32.gmra.mxu1 %vm109_vm1, %v639_v32  ;;  %4532 = vmatmul.msk.f32.gmra.mxu2 %vm109_vm1, %v974_v14  ;;  %v977_v14 = vld [vmem:[%s9049_s0 + $0xb3] sm:$0xff] }
 0x144   :  { %4558 = vmatmul.msk.f32.gmra.mxu3 %vm109_vm1, %v975_v34  ;;  %v1299_v31 = vld [vmem:[%s9049_s0 + $0x14] sm:$0xff] }
 0x146   :  { %v528_v35 = vpop.f32.mrf.mxu2 }
 0x147   :  { %v5791_v41 = vadd.f32 %v528_v35, %v272_v0  ;;  %v5793_v44 = vpop.f32.mrf.mxu0  ;;  %v4574_v35 = vld [vmem:[%s9048_s1 + $0x138] sm:$0xf] }
 0x148   :  { %9160 = vst [vmem:[#allocation28_spill] sm:$0xff] %v5793_v44  ;;  %v5795_v47 = vpop.f32.mrf.mxu1  ;;  %4600 = vmatpush.msk.msra.mxu1 %vm182_vm0, %v4574_v35  ;;  %v4568_v35 = vld [vmem:[%s9048_s1 + $0x108] sm:$0xff] }
 0x149   :  { %9159 = vst [vmem:[#allocation27_spill] sm:$0xff] %v5791_v41 }
 0x14a   :  { %9161 = vst [vmem:[#allocation29_spill] sm:$0xff] %v5795_v47  ;;  %4476 = vmatmul.msk.f32.gmra.mxu0 %vm109_vm1, %v639_v32  ;;  %v978_v32 = vld [vmem:[%s9049_s0 + $0xc3] sm:$0xff] }
 0x14b   :  { %4502 = vmatmul.msk.f32.gmra.mxu1 %vm109_vm1, %v640_v48  ;;  %4533 = vmatmul.msk.f32.gmra.mxu2 %vm109_vm1, %v975_v34  ;;  %v4573_v34 = vld [vmem:[%s9048_s1 + $0x130] sm:$0xf] }
 0x14c   :  { %4559 = vmatmul.msk.f32.gmra.mxu3 %vm109_vm1, %v976_v52  ;;  %4575 = vmatpush.msk.msra.mxu0 %vm182_vm0, %v4573_v34  ;;  %v979_v34 = vld [vmem:[%s9049_s0 + $0xcb] sm:$0xff] }
 0x14e   :  { %v531_v57 = vpop.f32.mrf.mxu2 }
 0x14f   :  { %v5807_v62 = vadd.f32 %v531_v57, %v275_v23  ;;  %v5809_v0 = vpop.f32.mrf.mxu0  ;;  %v642_v23 = vld [vmem:[%s9049_s0 + $0xca] sm:$0xff] }
 0x150   :  { %9163 = vst [vmem:[#allocation31_spill] sm:$0xff] %v5809_v0  ;;  %v5811_v7 = vpop.f32.mrf.mxu1 }
 0x151   :  { %9162 = vst [vmem:[#allocation30_spill] sm:$0xff] %v5807_v62  ;;  %v1298_v62 = vld [vmem:[%s9049_s0 + $0xc] sm:$0xff] }
 0x152   :  { %9164 = vst [vmem:[#allocation32_spill] sm:$0xff] %v5811_v7  ;;  %4477 = vmatmul.msk.f32.gmra.mxu0 %vm109_vm1, %v640_v48  ;;  %v4572_v48 = vld [vmem:[%s9048_s1 + $0x128] sm:$0xff]  ;;  %v983_v7 = vld [vmem:[%s9049_s0 + $0xf3] sm:$0xff] }
 0x153   :  { %4503 = vmatmul.msk.f32.gmra.mxu1 %vm109_vm1, %v641_v13  ;;  %4534 = vmatmul.msk.f32.gmra.mxu2 %vm109_vm1, %v976_v52 }
 0x154   :  { %4560 = vmatmul.msk.f32.gmra.mxu3 %vm109_vm1, %v977_v14  ;;  %1510 = vmatpush.msra.mxu1 %v4572_v48  ;;  %v4571_v48 = vld [vmem:[%s9048_s1 + $0x120] sm:$0xff] }
 0x155   :  { %1421 = vmatpush.msra.mxu0 %v4571_v48 }
 0x157   :  { %v5823_v16 = vpop.f32.mrf.mxu0 }
 0x158   :  { %9165 = vst [vmem:[#allocation33_spill] sm:$0xff] %v5823_v16  ;;  %v5825_v19 = vpop.f32.mrf.mxu1  ;;  %v982_v16 = vld [vmem:[%s9049_s0 + $0xeb] sm:$0xff] }
 0x159   :  { %9166 = vst [vmem:[#allocation34_spill] sm:$0xff] %v5825_v19 }
 0x15a   :  { %4478 = vmatmul.msk.f32.gmra.mxu0 %vm109_vm1, %v641_v13  ;;  %v643_v13 = vld [vmem:[%s9049_s0 + $0xd2] sm:$0xff] }
 0x15b   :  { %4504 = vmatmul.msk.f32.gmra.mxu1 %vm109_vm1, %v642_v23  ;;  %4535 = vmatmul.msk.f32.gmra.mxu2 %vm109_vm1, %v977_v14  ;;  %v4570_v14 = vld [vmem:[%s9048_s1 + $0x118] sm:$0xff] }
 0x15c   :  { %4561 = vmatmul.msk.f32.gmra.mxu3 %vm109_vm1, %v978_v32  ;;  %1511 = vmatpush.msra.mxu1 %v4570_v14 }
 0x15e   :  { %1512 = vmatpush.msra.mxu1 %v4568_v35  ;;  %v980_v35 = vld [vmem:[%s9049_s0 + $0xd3] sm:$0xff] }
 0x15f   :  { %v5848_v52 = vpop.f32.mrf.mxu0 }
 0x160   :  { %v5850_v57 = vpop.f32.mrf.mxu1 }
 0x162   :  { %4479 = vmatmul.msk.f32.gmra.mxu0 %vm109_vm1, %v642_v23  ;;  %v644_v23 = vld [vmem:[%s9049_s0 + $0xe2] sm:$0xff] }
 0x163   :  { %4505 = vmatmul.msk.f32.gmra.mxu1 %vm109_vm1, %v643_v13  ;;  %4536 = vmatmul.msk.f32.gmra.mxu2 %vm109_vm1, %v978_v32  ;;  %v4569_v32 = vld [vmem:[%s9048_s1 + $0x110] sm:$0xff] }
 0x164   :  { %4562 = vmatmul.msk.f32.gmra.mxu3 %vm109_vm1, %v979_v34  ;;  %1422 = vmatpush.msra.mxu0 %v4569_v32  ;;  %v645_v32 = vld [vmem:[%s9049_s0 + $0xea] sm:$0xff] }
 0x166   :  { %1423 = vmatpush.msra.mxu0 %v4567_v6 }
 0x167   :  { %v5871_v58 = vpop.f32.mrf.mxu0 }
 0x168   :  { %v5873_v14 = vpop.f32.mrf.mxu1 }
 0x16a   :  { %4480 = vmatmul.msk.f32.gmra.mxu0 %vm109_vm1, %v643_v13 }
 0x16b   :  { %4506 = vmatmul.msk.f32.gmra.mxu1 %vm109_vm1, %v644_v23  ;;  %4537 = vmatmul.msk.f32.gmra.mxu2 %vm109_vm1, %v979_v34  ;;  %v646_v34 = vld [vmem:[%s9049_s0 + $0xf2] sm:$0xff] }
 0x16c   :  { %4563 = vmatmul.msk.f32.gmra.mxu3 %vm109_vm1, %v980_v35 }
 0x16f   :  { %v5891_v48 = vpop.f32.mrf.mxu0 }
 0x170   :  { %v5893_v42 = vpop.f32.mrf.mxu1 }
 0x172   :  { %4481 = vmatmul.msk.f32.gmra.mxu0 %vm109_vm1, %v644_v23 }
 0x173   :  { %4507 = vmatmul.msk.f32.gmra.mxu1 %vm109_vm1, %v645_v32  ;;  %4538 = vmatmul.msk.f32.gmra.mxu2 %vm109_vm1, %v980_v35 }
 0x174   :  { %4564 = vmatmul.msk.f32.gmra.mxu3 %vm109_vm1, %v981_v51 }
 0x177   :  { %v5905_v6 = vpop.f32.mrf.mxu0 }
 0x178   :  { %v5907_v13 = vpop.f32.mrf.mxu1 }
 0x17a   :  { %4482 = vmatmul.msk.f32.gmra.mxu0 %vm109_vm1, %v645_v32 }
 0x17b   :  { %4508 = vmatmul.msk.f32.gmra.mxu1 %vm109_vm1, %v646_v34  ;;  %4539 = vmatmul.msk.f32.gmra.mxu2 %vm109_vm1, %v981_v51  ;;  %v5932_v51 = vpop.f32.mrf.mxu3 }
 0x17c   :  { %4565 = vmatmul.msk.f32.gmra.mxu3 %vm109_vm1, %v982_v16  ;;  %9167 = vst [vmem:[#allocation35_spill] sm:$0xff] %v5932_v51 }
 0x17f   :  { %v5919_v23 = vpop.f32.mrf.mxu0 }
 0x180   :  { %v5921_v35 = vpop.f32.mrf.mxu1 }
 0x182   :  { %4483 = vmatmul.msk.f32.gmra.mxu0 %vm109_vm1, %v646_v34 }
 0x183   :  { %4540 = vmatmul.msk.f32.gmra.mxu2 %vm109_vm1, %v982_v16  ;;  %4601 = vmatmul.msk.f32.vlgmr.msra.gmra.mxu1 %vm109_vm1, %v1297_v22  ;;  %v6024_v3 = vpop.f32.mrf.mxu3 }
 0x184   :  { %4566 = vmatmul.msk.f32.gmra.mxu3 %vm109_vm1, %v983_v7  ;;  %9177 = vst [vmem:[#allocation45_spill] sm:$0xff] %v6024_v3 }
 0x187   :  { %v5935_v32 = vpop.f32.mrf.mxu0 }
 0x188   :  { %v5937_v12 = vpop.f32.mrf.mxu1 }
 0x18a   :  { %4576 = vmatmul.msk.f32.vlgmr.msra.gmra.mxu0 %vm109_vm1, %v1297_v22  ;;  %v1300_v22 = vld [vmem:[%s9049_s0 + $0x24] sm:$0xff] }
 0x18b   :  { %4541 = vmatmul.msk.f32.gmra.mxu2 %vm109_vm1, %v983_v7  ;;  %4602 = vmatmul.msk.f32.gmra.mxu1 %vm109_vm1, %v1298_v62 }
 0x18f   :  { %v5945_v16 = vpop.f32.mrf.mxu0 }
 0x190   :  { %v5947_v34 = vpop.f32.mrf.mxu1 }
 0x192   :  { %4577 = vmatmul.msk.f32.gmra.mxu0 %vm109_vm1, %v1298_v62  ;;  %v1301_v62 = vld [vmem:[%s9049_s0 + $0x2c] sm:$0xff] }
 0x193   :  { %4603 = vmatmul.msk.f32.gmra.mxu1 %vm109_vm1, %v1299_v31 }
 0x197   :  { %v5954_v55 = vpop.f32.mrf.mxu0 }
 0x198   :  { %v5956_v47 = vpop.f32.mrf.mxu1 }
 0x19a   :  { %4578 = vmatmul.msk.f32.gmra.mxu0 %vm109_vm1, %v1299_v31  ;;  %v1302_v31 = vld [vmem:[%s9049_s0 + $0x34] sm:$0xff] }
 0x19b   :  { %4604 = vmatmul.msk.f32.gmra.mxu1 %vm109_vm1, %v1300_v22 }
 0x19f   :  { %v5963_v7 = vpop.f32.mrf.mxu0 }
 0x1a0   :  { %v5965_v1 = vpop.f32.mrf.mxu1 }
 0x1a2   :  { %4579 = vmatmul.msk.f32.gmra.mxu0 %vm109_vm1, %v1300_v22  ;;  %v1303_v22 = vld [vmem:[%s9049_s0 + $0x44] sm:$0xff] }
 0x1a3   :  { %4605 = vmatmul.msk.f32.gmra.mxu1 %vm109_vm1, %v1301_v62 }
 0x1a7   :  { %v5972_v44 = vpop.f32.mrf.mxu0 }
 0x1a8   :  { %v5974_v61 = vpop.f32.mrf.mxu1 }
 0x1aa   :  { %4580 = vmatmul.msk.f32.gmra.mxu0 %vm109_vm1, %v1301_v62  ;;  %v1304_v62 = vld [vmem:[%s9049_s0 + $0x4c] sm:$0xff] }
 0x1ab   :  { %4606 = vmatmul.msk.f32.gmra.mxu1 %vm109_vm1, %v1302_v31 }
 0x1af   :  { %v5981_v51 = vpop.f32.mrf.mxu0 }
 0x1b0   :  { %v5983_v53 = vpop.f32.mrf.mxu1 }
 0x1b1   :  { %9168 = vst [vmem:[#allocation36_spill] sm:$0xff] %v5983_v53 }
 0x1b2   :  { %4581 = vmatmul.msk.f32.gmra.mxu0 %vm109_vm1, %v1302_v31  ;;  %v1305_v31 = vld [vmem:[%s9049_s0 + $0x54] sm:$0xff] }
 0x1b3   :  { %4607 = vmatmul.msk.f32.gmra.mxu1 %vm109_vm1, %v1303_v22 }
 0x1b7   :  { %v5990_v0 = vpop.f32.mrf.mxu0 }
 0x1b8   :  { %9169 = vst [vmem:[#allocation37_spill] sm:$0xff] %v5990_v0  ;;  %v5992_v8 = vpop.f32.mrf.mxu1 }
 0x1b9   :  { %9170 = vst [vmem:[#allocation38_spill] sm:$0xff] %v5992_v8 }
 0x1ba   :  { %4582 = vmatmul.msk.f32.gmra.mxu0 %vm109_vm1, %v1303_v22  ;;  %v1306_v22 = vld [vmem:[%s9049_s0 + $0x64] sm:$0xff] }
 0x1bb   :  { %4608 = vmatmul.msk.f32.gmra.mxu1 %vm109_vm1, %v1304_v62 }
 0x1bf   :  { %v5999_v41 = vpop.f32.mrf.mxu0 }
 0x1c0   :  { %9171 = vst [vmem:[#allocation39_spill] sm:$0xff] %v5999_v41  ;;  %v6001_v27 = vpop.f32.mrf.mxu1 }
 0x1c1   :  { %9172 = vst [vmem:[#allocation40_spill] sm:$0xff] %v6001_v27 }
 0x1c2   :  { %4583 = vmatmul.msk.f32.gmra.mxu0 %vm109_vm1, %v1304_v62  ;;  %v1307_v62 = vld [vmem:[%s9049_s0 + $0x6c] sm:$0xff] }
 0x1c3   :  { %4609 = vmatmul.msk.f32.gmra.mxu1 %vm109_vm1, %v1305_v31 }
 0x1c7   :  { %v6008_v9 = vpop.f32.mrf.mxu0 }
 0x1c8   :  { %9173 = vst [vmem:[#allocation41_spill] sm:$0xff] %v6008_v9  ;;  %v6010_v21 = vpop.f32.mrf.mxu1 }
 0x1c9   :  { %9174 = vst [vmem:[#allocation42_spill] sm:$0xff] %v6010_v21  ;;  %v6028_v21 = vpop.f32.mrf.mxu2 }
 0x1ca   :  { %4584 = vmatmul.msk.f32.gmra.mxu0 %vm109_vm1, %v1305_v31  ;;  %9178 = vst [vmem:[#allocation46_spill] sm:$0xff] %v6028_v21  ;;  %v1309_v21 = vld [vmem:[%s9049_s0 + $0x84] sm:$0xff] }
 0x1cb   :  { %4610 = vmatmul.msk.f32.gmra.mxu1 %vm109_vm1, %v1306_v22 }
 0x1cf   :  { %v6017_v27 = vpop.f32.mrf.mxu0 }
 0x1d0   :  { %9175 = vst [vmem:[#allocation43_spill] sm:$0xff] %v6017_v27  ;;  %v6019_v18 = vpop.f32.mrf.mxu1  ;;  %v1308_v27 = vld [vmem:[%s9049_s0 + $0x74] sm:$0xff] }
 0x1d1   :  { %9176 = vst [vmem:[#allocation44_spill] sm:$0xff] %v6019_v18  ;;  %v6038_v18 = vpop.f32.mrf.mxu3  ;;  %v6041_v3 = vpop.f32.mrf.mxu2 }
 0x1d2   :  { %4585 = vmatmul.msk.f32.gmra.mxu0 %vm109_vm1, %v1306_v22  ;;  %9181 = vst [vmem:[#allocation49_spill] sm:$0xff] %v6038_v18 }
 0x1d3   :  { %4611 = vmatmul.msk.f32.gmra.mxu1 %vm109_vm1, %v1307_v62  ;;  %9182 = vst [vmem:[#allocation50_spill] sm:$0xff] %v6041_v3  ;;  %v1310_v3 = vld [vmem:[%s9049_s0 + $0x8c] sm:$0xff] }
 0x1d7   :  { %v6030_v9 = vpop.f32.mrf.mxu0 }
 0x1d8   :  { %9179 = vst [vmem:[#allocation47_spill] sm:$0xff] %v6030_v9  ;;  %v6032_v31 = vpop.f32.mrf.mxu1 }
 0x1d9   :  { %9180 = vst [vmem:[#allocation48_spill] sm:$0xff] %v6032_v31  ;;  %v6052_v9 = vpop.f32.mrf.mxu3  ;;  %v6061_v45 = vpop.f32.mrf.mxu2 }
 0x1da   :  { %4586 = vmatmul.msk.f32.gmra.mxu0 %vm109_vm1, %v1307_v62  ;;  %9185 = vst [vmem:[#allocation53_spill] sm:$0xff] %v6052_v9  ;;  %v1311_v9 = vld [vmem:[%s9049_s0 + $0x94] sm:$0xff] }
 0x1db   :  { %4612 = vmatmul.msk.f32.gmra.mxu1 %vm109_vm1, %v1308_v27  ;;  %9188 = vst [vmem:[#allocation56_spill] sm:$0xff] %v6061_v45 }
 0x1df   :  { %v6043_v22 = vpop.f32.mrf.mxu0 }
 0x1e0   :  { %9183 = vst [vmem:[#allocation51_spill] sm:$0xff] %v6043_v22  ;;  %v6045_v60 = vpop.f32.mrf.mxu1 }
 0x1e1   :  { %9184 = vst [vmem:[#allocation52_spill] sm:$0xff] %v6045_v60  ;;  %v6065_v60 = vpop.f32.mrf.mxu3 }
 0x1e2   :  { %4587 = vmatmul.msk.f32.gmra.mxu0 %vm109_vm1, %v1308_v27  ;;  %9189 = vst [vmem:[#allocation57_spill] sm:$0xff] %v6065_v60 }
 0x1e3   :  { %4613 = vmatmul.msk.f32.gmra.mxu1 %vm109_vm1, %v1309_v21 }
 0x1e7   :  { %v6054_v62 = vpop.f32.mrf.mxu0 }
 0x1e8   :  { %9186 = vst [vmem:[#allocation54_spill] sm:$0xff] %v6054_v62  ;;  %v6056_v18 = vpop.f32.mrf.mxu1 }
 0x1e9   :  { %9187 = vst [vmem:[#allocation55_spill] sm:$0xff] %v6056_v18  ;;  %v6075_v18 = vpop.f32.mrf.mxu2  ;;  %v1189_v62 = vpop.f32.mrf.mxu3 }
 0x1ea   :  { %4588 = vmatmul.msk.f32.gmra.mxu0 %vm109_vm1, %v1309_v21  ;;  %9192 = vst [vmem:[#allocation60_spill] sm:$0xff] %v6075_v18 }
 0x1eb   :  { %4614 = vmatmul.msk.f32.gmra.mxu1 %vm109_vm1, %v1310_v3 }
 0x1ef   :  { %v6067_v27 = vpop.f32.mrf.mxu0 }
 0x1f0   :  { %9190 = vst [vmem:[#allocation58_spill] sm:$0xff] %v6067_v27  ;;  %v6069_v22 = vpop.f32.mrf.mxu1  ;;  %v1312_v27 = vld [vmem:[%s9049_s0 + $0xa4] sm:$0xff] }
 0x1f1   :  { %9191 = vst [vmem:[#allocation59_spill] sm:$0xff] %v6069_v22  ;;  %v1100_v22 = vpop.f32.mrf.mxu2 }
 0x1f2   :  { %4589 = vmatmul.msk.f32.gmra.mxu0 %vm109_vm1, %v1310_v3 }
 0x1f3   :  { %4615 = vmatmul.msk.f32.gmra.mxu1 %vm109_vm1, %v1311_v9 }
 0x1f7   :  { %v6078_v45 = vpop.f32.mrf.mxu0 }
 0x1f8   :  { %9193 = vst [vmem:[#allocation61_spill] sm:$0xff] %v6078_v45  ;;  %v6080_v21 = vpop.f32.mrf.mxu1  ;;  %v1313_v45 = vld [vmem:[%s9049_s0 + $0xac] sm:$0xff] }
 0x1f9   :  { %9194 = vst [vmem:[#allocation62_spill] sm:$0xff] %v6080_v21  ;;  %v1192_v21 = vpop.f32.mrf.mxu3  ;;  %v1103_v31 = vpop.f32.mrf.mxu2 }
 0x1fa   :  { %4590 = vmatmul.msk.f32.gmra.mxu0 %vm109_vm1, %v1311_v9 }
 0x1fb   :  { %4616 = vmatmul.msk.f32.gmra.mxu1 %vm109_vm1, %v1312_v27 }
 0x1ff   :  { %v6087_v38 = vpop.f32.mrf.mxu0 }
 0x200   :  { %9195 = vst [vmem:[#allocation63_spill] sm:$0xff] %v6087_v38  ;;  %v6089_v3 = vpop.f32.mrf.mxu1  ;;  %v1314_v38 = vld [vmem:[%s9049_s0 + $0xb4] sm:$0xff] }
 0x201   :  { %9196 = vst [vmem:[#allocation64_spill] sm:$0xff] %v6089_v3  ;;  %v1195_v3 = vpop.f32.mrf.mxu3 }
 0x202   :  { %4591 = vmatmul.msk.f32.gmra.mxu0 %vm109_vm1, %v1312_v27 }
 0x203   :  { %4617 = vmatmul.msk.f32.gmra.mxu1 %vm109_vm1, %v1313_v45 }
 0x207   :  { %v6096_v28 = vpop.f32.mrf.mxu0 }
 0x208   :  { %9197 = vst [vmem:[#allocation65_spill] sm:$0xff] %v6096_v28  ;;  %v6098_v9 = vpop.f32.mrf.mxu1  ;;  %v1106_v28 = vpop.f32.mrf.mxu2 }
 0x209   :  { %9198 = vst [vmem:[#allocation66_spill] sm:$0xff] %v6098_v9  ;;  %v6114_v9 = vpop.f32.mrf.mxu3 }
 0x20a   :  { %4592 = vmatmul.msk.f32.gmra.mxu0 %vm109_vm1, %v1313_v45 }
 0x20b   :  { %4618 = vmatmul.msk.f32.gmra.mxu1 %vm109_vm1, %v1314_v38 }
 0x20f   :  { %v6105_v41 = vpop.f32.mrf.mxu0 }
 0x210   :  { %9199 = vst [vmem:[#allocation67_spill] sm:$0xff] %v6105_v41  ;;  %v6107_v27 = vpop.f32.mrf.mxu1  ;;  %v1316_v41 = vld [vmem:[%s9049_s0 + $0xcc] sm:$0xff] }
 0x211   :  { %9200 = vst [vmem:[#allocation68_spill] sm:$0xff] %v6107_v27  ;;  %v6124_v27 = vpop.f32.mrf.mxu2 }
 0x212   :  { %4593 = vmatmul.msk.f32.gmra.mxu0 %vm109_vm1, %v1314_v38  ;;  %v921_v38 = vadd.f32 %v5850_v57, %v5521_v40 }
 0x213   :  { %4619 = vmatmul.msk.f32.gmra.mxu1 %vm109_vm1, %v1315_v37 }
 0x214   :  { %v1258_v25 = vadd.f32 %v1189_v62, %v921_v38  ;;  %v923_v62 = vadd.f32 %v5873_v14, %v5541_v50  ;;  %v922_v50 = vadd.f32 %v5891_v48, %v5550_v56  ;;  %v1319_v48 = vld [vmem:[%s9049_s0 + $0xec] sm:$0xff] }
 0x216   :  { %v1259_v14 = vadd.f32 %v1103_v31, %v922_v50 }
 0x217   :  { %v6116_v8 = vpop.f32.mrf.mxu0 }
 0x218   :  { %9201 = vst [vmem:[#allocation69_spill] sm:$0xff] %v6116_v8  ;;  %v6118_v45 = vpop.f32.mrf.mxu1  ;;  %v1317_v8 = vld [vmem:[%s9049_s0 + $0xd4] sm:$0xff] }
 0x219   :  { %9202 = vst [vmem:[#allocation70_spill] sm:$0xff] %v6118_v45  ;;  %v6134_v45 = vpop.f32.mrf.mxu3  ;;  %v6143_v57 = vpop.f32.mrf.mxu2 }
 0x21a   :  { %4594 = vmatmul.msk.f32.gmra.mxu0 %vm109_vm1, %v1315_v37  ;;  %v1634_v37 = vld [vmem:[%s9050_s2] sm:$0x3] }
 0x21b   :  { %4620 = vmatmul.msk.f32.gmra.mxu1 %vm109_vm1, %v1316_v41  ;;  %v6145_v53 = vperm.slane %v1634_v37, 1 }
 0x21f   :  { %v6127_v29 = vpop.f32.mrf.mxu0 }
 0x220   :  { %9203 = vst [vmem:[#allocation71_spill] sm:$0xff] %v6127_v29  ;;  %v1526_v0 = vpop.f32.mrf.mxu1  ;;  %v920_v29 = vadd.f32 %v5871_v58, %v5536_v46  ;;  %v1318_v46 = vld [vmem:[%s9049_s0 + $0xe4] sm:$0xff] }
 0x221   :  { %v1595_v40 = vadd.f32 %v1526_v0, %v1258_v25  ;;  %v1260_v25 = vadd.f32 %v1192_v21, %v923_v62  ;;  %v6161_v58 = vpop.f32.mrf.mxu3  ;;  %v925_v21 = vadd.f32 %v5893_v42, %v5552_v59  ;;  %v924_v59 = vadd.f32 %v5905_v6, %v5565_v2 }
 0x222   :  { %4595 = vmatmul.msk.f32.gmra.mxu0 %vm109_vm1, %v1316_v41  ;;  %v1257_v60 = vadd.f32 %v1100_v22, %v920_v29  ;;  %v6149_v41 = vperm.slane %v1634_v37, 0  ;;  %v6172_v22 = vpop.f32.mrf.mxu2 }
 0x223   :  { %4621 = vmatmul.msk.f32.gmra.mxu1 %vm109_vm1, %v1317_v8  ;;  %v6152_v38 = vadd.f32 %v6145_v53, %v1595_v40  ;;  %v1262_v31 = vadd.f32 %v1195_v3, %v925_v21 }
 0x225   :  { %9204 = vst [vmem:[#allocation72_spill] sm:$0xff] %v6152_v38 }
 0x227   :  { %v1437_v17 = vpop.f32.mrf.mxu0 }
 0x228   :  { %v1594_v18 = vadd.f32 %v1437_v17, %v1257_v60  ;;  %v1529_v19 = vpop.f32.mrf.mxu1  ;;  %v9062_v60 = vmax.f32 %v6152_v38, 0.0 }
 0x229   :  { %v1597_v0 = vadd.f32 %v1529_v19, %v1260_v25  ;;  %v1207_v50 = vpop.f32.mrf.mxu3 }
 0x22a   :  { %v6158_v29 = vadd.f32 %v6149_v41, %v1594_v18  ;;  %4596 = vmatmul.msk.f32.gmra.mxu0 %vm109_vm1, %v1317_v8 }
 0x22b   :  { %4622 = vmatmul.msk.f32.gmra.mxu1 %vm109_vm1, %v1318_v46  ;;  %v6177_v37 = vadd.f32 %v6145_v53, %v1597_v0  ;;  %v1261_v0 = vadd.f32 %v1106_v28, %v924_v59  ;;  %v1320_v28 = vld [vmem:[%s9049_s0 + $0xf4] sm:$0xff] }
 0x22c   :  { %v9076_v17 = vmax.f32 %v6158_v29, 0.0 }
 0x22d   :  { %9205 = vst [vmem:[#allocation73_spill] sm:$0xff] %v6177_v37  ;;  %v9063_v25 = vmax.f32 %v6177_v37, 0.0  ;;  %v9247_v37 = vld [vmem:[#allocation35_spill] sm:$0xff] }
 0x22e   :  { %v4931_v18 = vpack.i.bf16 %v9062_v60, %v9076_v17 }
 0x22f   :  { %v1440_v8 = vpop.f32.mrf.mxu0 }
 0x230   :  { %v1596_v56 = vadd.f32 %v1440_v8, %v1259_v14  ;;  %v1532_v19 = vpop.f32.mrf.mxu1  ;;  %4932 = vrot.lane.b32.xlu2 %v4931_v18, %s5113_s16  ;;  %v1118_v8 = vpop.f32.mrf.mxu2 }
 0x231   :  { %v1599_v42 = vadd.f32 %v1532_v19, %v1262_v31 }
 0x232   :  { %v6184_v40 = vadd.f32 %v6149_v41, %v1596_v56  ;;  %4597 = vmatmul.msk.f32.gmra.mxu0 %vm109_vm1, %v1318_v46  ;;  %v927_v46 = vadd.f32 %v5907_v13, %v5567_v5  ;;  %v926_v5 = vadd.f32 %v5919_v23, %v5579_v10 }
 0x233   :  { %4623 = vmatmul.msk.f32.gmra.mxu1 %vm109_vm1, %v1319_v48  ;;  %v6199_v18 = vadd.f32 %v6145_v53, %v1599_v42  ;;  %v1210_v42 = vpop.f32.mrf.mxu3 }
 0x234   :  { %v9077_v62 = vmax.f32 %v6184_v40, 0.0  ;;  %v1264_v21 = vadd.f32 %v6114_v9, %v927_v46  ;;  %v1263_v59 = vadd.f32 %v6124_v27, %v926_v5 }
 0x235   :  { %9206 = vst [vmem:[#allocation74_spill] sm:$0xff] %v6199_v18  ;;  %v9065_v31 = vmax.f32 %v6199_v18, 0.0  ;;  %v9258_v18 = vld [vmem:[#allocation67_spill] sm:$0xff] }
 0x236   :  { %v4936_v3 = vpack.i.bf16 %v9063_v25, %v9077_v62 }
 0x237   :  { %v1443_v14 = vpop.f32.mrf.mxu0 }
 0x238   :  { %v1598_v2 = vadd.f32 %v1443_v14, %v1261_v0  ;;  %v1535_v6 = vpop.f32.mrf.mxu1  ;;  %4937 = vrot.lane.b32.xlu0 %v4936_v3, %s5113_s16  ;;  %v1121_v46 = vpop.f32.mrf.mxu2 }
 0x239   :  { %v1601_v13 = vadd.f32 %v1535_v6, %v1264_v21 }
 0x23a   :  { %v6207_v56 = vadd.f32 %v6149_v41, %v1598_v2  ;;  %4598 = vmatmul.msk.f32.gmra.mxu0 %vm109_vm1, %v1319_v48  ;;  %v929_v48 = vadd.f32 %v5921_v35, %v5581_v15  ;;  %v928_v2 = vadd.f32 %v5935_v32, %v5593_v20 }
 0x23b   :  { %4624 = vmatmul.msk.f32.gmra.mxu1 %vm109_vm1, %v1320_v28  ;;  %v6223_v3 = vadd.f32 %v6145_v53, %v1601_v13 }
 0x23c   :  { %v9078_v19 = vmax.f32 %v6207_v56, 0.0  ;;  %v1266_v14 = vadd.f32 %v6134_v45, %v929_v48  ;;  %v1265_v21 = vadd.f32 %v6143_v57, %v928_v2  ;;  %v933_v2 = vadd.f32 %v5947_v34, %v5609_v33 }
 0x23d   :  { %9207 = vst [vmem:[#allocation75_spill] sm:$0xff] %v6223_v3  ;;  %v9066_v15 = vmax.f32 %v6223_v3, 0.0 }
 0x23e   :  { %v4941_v9 = vpack.i.bf16 %v9065_v31, %v9078_v19 }
 0x23f   :  { %v1446_v0 = vpop.f32.mrf.mxu0 }
 0x240   :  { %v1600_v10 = vadd.f32 %v1446_v0, %v1263_v59  ;;  %v1538_v23 = vpop.f32.mrf.mxu1  ;;  %4942 = vrot.lane.b32.xlu1 %v4941_v9, %s5113_s16  ;;  %v1213_v59 = vpop.f32.mrf.mxu3  ;;  %v930_v0 = vadd.f32 %v5945_v16, %v5607_v30 }
 0x241   :  { %v1603_v6 = vadd.f32 %v1538_v23, %v1266_v14 }
 0x242   :  { %v6228_v27 = vadd.f32 %v6149_v41, %v1600_v10  ;;  %4599 = vmatmul.msk.f32.gmra.mxu0 %vm109_vm1, %v1320_v28  ;;  %v931_v28 = vadd.f32 %v5937_v12, %v5595_v24  ;;  %v1124_v10 = vpop.f32.mrf.mxu2  ;;  %v1267_v23 = vadd.f32 %v6172_v22, %v930_v0  ;;  %v935_v0 = vadd.f32 %v5956_v47, %v5623_v43 }
 0x243   :  { %v6243_v13 = vadd.f32 %v6145_v53, %v1603_v6 }
 0x244   :  { %v9079_v35 = vmax.f32 %v6228_v27, 0.0  ;;  %v1268_v9 = vadd.f32 %v6161_v58, %v931_v28 }
 0x245   :  { %9208 = vst [vmem:[#allocation76_spill] sm:$0xff] %v6243_v13  ;;  %v9067_v48 = vmax.f32 %v6243_v13, 0.0  ;;  %v9268_v13 = vld [vmem:[#allocation14_spill] sm:$0xff] }
 0x246   :  { %v4946_v45 = vpack.i.bf16 %v9066_v15, %v9079_v35  ;;  %v9227_v35 = vld [vmem:[#allocation21_spill] sm:$0xff] }
 0x247   :  { %v1449_v5 = vpop.f32.mrf.mxu0 }
 0x248   :  { %v1602_v20 = vadd.f32 %v1449_v5, %v1265_v21  ;;  %v1541_v32 = vpop.f32.mrf.mxu1  ;;  %4947 = vrot.lane.b32.xlu2 %v4946_v45, %s5113_s16  ;;  %v1270_v21 = vadd.f32 %v1207_v50, %v933_v2  ;;  %v1216_v22 = vpop.f32.mrf.mxu3  ;;  %v932_v5 = vadd.f32 %v5954_v55, %v5621_v39 }
 0x249   :  { %v1605_v24 = vadd.f32 %v1541_v32, %v1268_v9 }
 0x24a   :  { %v6248_v57 = vadd.f32 %v6149_v41, %v1602_v20  ;;  %v1269_v34 = vadd.f32 %v1118_v8, %v932_v5  ;;  %v1127_v9 = vpop.f32.mrf.mxu2 }
 0x24b   :  { %v6262_v6 = vadd.f32 %v6145_v53, %v1605_v24 }
 0x24c   :  { %v9080_v12 = vmax.f32 %v6248_v57, 0.0 }
 0x24d   :  { %v9068_v28 = vmax.f32 %v6262_v6, 0.0 }
 0x24e   :  { %v4951_v14 = vpack.i.bf16 %v9067_v48, %v9080_v12  ;;  %v9223_v48 = vld [vmem:[#allocation19_spill] sm:$0xff]  ;;  %v9228_v12 = vld [vmem:[#allocation52_spill] sm:$0xff] }
 0x24f   :  { %v1452_v58 = vpop.f32.mrf.mxu0 }
 0x250   :  { %v1604_v30 = vadd.f32 %v1452_v58, %v1267_v23  ;;  %v1544_v16 = vpop.f32.mrf.mxu1  ;;  %4952 = vrot.lane.b32.xlu1 %v4951_v14, %s5113_s16  ;;  %v1272_v23 = vadd.f32 %v1210_v42, %v935_v0  ;;  %v934_v14 = vadd.f32 %v5963_v7, %v5635_v49  ;;  %v1219_v43 = vpop.f32.mrf.mxu3  ;;  %v937_v42 = vadd.f32 %v5965_v1, %v5637_v54 }
 0x251   :  { %v1607_v33 = vadd.f32 %v1544_v16, %v1270_v21 }
 0x252   :  { %v6266_v45 = vadd.f32 %v6149_v41, %v1604_v30  ;;  %v1271_v47 = vadd.f32 %v1121_v46, %v934_v14 }
 0x253   :  { %v6279_v24 = vadd.f32 %v6145_v53, %v1607_v33  ;;  %v1130_v33 = vpop.f32.mrf.mxu2 }
 0x254   :  { %v9081_v20 = vmax.f32 %v6266_v45, 0.0 }
 0x255   :  { %v9069_v58 = vmax.f32 %v6279_v24, 0.0 }
 0x256   :  { %v4956_v32 = vpack.i.bf16 %v9068_v28, %v9081_v20  ;;  %v9224_v28 = vld [vmem:[#allocation48_spill] sm:$0xff]  ;;  %v953_v20 = vadd.f32 %v9228_v12, %v9227_v35  ;;  %v9232_v12 = vld [vmem:[#allocation23_spill] sm:$0xff] }
 0x257   :  { %v1455_v50 = vpop.f32.mrf.mxu0 }
 0x258   :  { %v1606_v55 = vadd.f32 %v1455_v50, %v1269_v34  ;;  %v1547_v39 = vpop.f32.mrf.mxu1  ;;  %4957 = vrot.lane.b32.xlu0 %v4956_v32, %s5113_s16  ;;  %v1274_v34 = vadd.f32 %v1213_v59, %v937_v42  ;;  %v936_v32 = vadd.f32 %v5972_v44, %v5649_v63  ;;  %v939_v59 = vadd.f32 %v5974_v61, %v5651_v4 }
 0x259   :  { %v1609_v30 = vadd.f32 %v1547_v39, %v1272_v23  ;;  %v1222_v39 = vpop.f32.mrf.mxu3  ;;  %v918_v4 = vadd.f32 %v5848_v52, %v5516_v36 }
 0x25a   :  { %v6283_v8 = vadd.f32 %v6149_v41, %v1606_v55  ;;  %v1273_v54 = vadd.f32 %v1124_v10, %v936_v32 }
 0x25b   :  { %v6296_v5 = vadd.f32 %v6145_v53, %v1609_v30  ;;  %v1276_v30 = vadd.f32 %v1216_v22, %v939_v59 }
 0x25c   :  { %v9082_v2 = vmax.f32 %v6283_v8, 0.0 }
 0x25d   :  { %v9070_v50 = vmax.f32 %v6296_v5, 0.0 }
 0x25e   :  { %v4961_v16 = vpack.i.bf16 %v9069_v58, %v9082_v2  ;;  %v951_v58 = vadd.f32 %v9224_v28, %v9223_v48 }
 0x25f   :  { %v1458_v21 = vpop.f32.mrf.mxu0 }
 0x260   :  { %v1608_v49 = vadd.f32 %v1458_v21, %v1271_v47  ;;  %v1550_v7 = vpop.f32.mrf.mxu1  ;;  %4962 = vrot.lane.b32.xlu2 %v4961_v16, %s5113_s16  ;;  %v1133_v47 = vpop.f32.mrf.mxu2  ;;  %v938_v16 = vadd.f32 %v5981_v51, %v5663_v11  ;;  %v9211_v51 = vld [vmem:[#allocation9_spill] sm:$0xff] }
 0x261   :  { %v1611_v1 = vadd.f32 %v1550_v7, %v1274_v34  ;;  %v9209_v7 = vld [vmem:[#allocation34_spill] sm:$0xff]  ;;  %v6338_v52 = vpop.f32.mrf.mxu3 }
 0x262   :  { %v6300_v46 = vadd.f32 %v6149_v41, %v1608_v49  ;;  %v1275_v49 = vadd.f32 %v1127_v9, %v938_v16  ;;  %v919_v34 = vadd.f32 %v9209_v7, %v5488_v26  ;;  %v9213_v9 = vld [vmem:[#allocation57_spill] sm:$0xff] }
 0x263   :  { %v6313_v14 = vadd.f32 %v6145_v53, %v1611_v1  ;;  %v9210_v1 = vld [vmem:[#allocation60_spill] sm:$0xff]  ;;  %v9216_v7 = vld [vmem:[#allocation37_spill] sm:$0xff] }
 0x264   :  { %v9083_v0 = vmax.f32 %v6300_v46, 0.0  ;;  %v1255_v11 = vadd.f32 %v9210_v1, %v918_v4  ;;  %v9215_v4 = vld [vmem:[#allocation10_spill] sm:$0xff] }
 0x265   :  { %v9071_v21 = vmax.f32 %v6313_v14, 0.0  ;;  %v940_v1 = vadd.f32 %v9216_v7, %v9215_v4  ;;  %v9221_v7 = vld [vmem:[#allocation12_spill] sm:$0xff] }
 0x266   :  { %v4966_v55 = vpack.i.bf16 %v9070_v50, %v9083_v0 }
 0x267   :  { %v1461_v23 = vpop.f32.mrf.mxu0  ;;  %v1277_v60 = vadd.f32 %v1130_v33, %v940_v1  ;;  %v9222_v1 = vld [vmem:[#allocation39_spill] sm:$0xff] }
 0x268   :  { %v1610_v63 = vadd.f32 %v1461_v23, %v1273_v54  ;;  %v1553_v44 = vpop.f32.mrf.mxu1  ;;  %4967 = vrot.lane.b32.xlu2 %v4966_v55, %s5113_s16  ;;  %v9212_v54 = vld [vmem:[#allocation36_spill] sm:$0xff] }
 0x269   :  { %v1613_v61 = vadd.f32 %v1553_v44, %v1276_v30  ;;  %v941_v55 = vadd.f32 %v9212_v54, %v9211_v51  ;;  %v9214_v30 = vld [vmem:[#allocation71_spill] sm:$0xff]  ;;  %v9217_v51 = vld [vmem:[#allocation70_spill] sm:$0xff]  ;;  %v6350_v54 = vpop.f32.mrf.mxu2 }
 0x26a   :  { %v6317_v10 = vadd.f32 %v6149_v41, %v1610_v63  ;;  %v1256_v63 = vadd.f32 %v9213_v9, %v919_v34  ;;  %v1592_v26 = vadd.f32 %v9214_v30, %v1255_v11 }
 0x26b   :  { %v6335_v23 = vadd.f32 %v6145_v53, %v1613_v61  ;;  %v1278_v44 = vadd.f32 %v1219_v43, %v941_v55  ;;  %v9218_v55 = vld [vmem:[#allocation11_spill] sm:$0xff] }
 0x26c   :  { %v9084_v42 = vmax.f32 %v6317_v10, 0.0  ;;  %v1593_v61 = vadd.f32 %v9217_v51, %v1256_v63  ;;  %v6353_v43 = vadd.f32 %v6149_v41, %v1592_v26  ;;  %v942_v51 = vadd.f32 %v9222_v1, %v9221_v7 }
 0x26e   :  { %v4971_v22 = vpack.i.bf16 %v9071_v21, %v9084_v42  ;;  %v6362_v63 = vadd.f32 %v6145_v53, %v1593_v61  ;;  %v9075_v26 = vmax.f32 %v6353_v43, 0.0 }
 0x26f   :  { %v1464_v32 = vpop.f32.mrf.mxu0 }
 0x270   :  { %v1612_v59 = vadd.f32 %v1464_v32, %v1275_v49  ;;  %v1556_v36 = vpop.f32.mrf.mxu1  ;;  %4972 = vrot.lane.b32.xlu1 %v4971_v22, %s5113_s16  ;;  %v9072_v49 = vmax.f32 %v6335_v23, 0.0  ;;  %9220 = vst [vmem:[#allocation34_spill] sm:$0xff] %v6362_v63  ;;  %v9064_v61 = vmax.f32 %v6362_v63, 0.0 }
 0x271   :  { %v1615_v22 = vadd.f32 %v1556_v36, %v1278_v44 }
 0x272   :  { %v6343_v16 = vadd.f32 %v6149_v41, %v1612_v59  ;;  %v9219_v59 = vld [vmem:[#allocation38_spill] sm:$0xff] }
 0x273   :  { %v943_v9 = vadd.f32 %v9219_v59, %v9218_v55  ;;  %v6365_v36 = vadd.f32 %v6145_v53, %v1615_v22  ;;  %v6374_v55 = vpop.f32.mrf.mxu3  ;;  %v1279_v59 = vadd.f32 %v1133_v47, %v942_v51 }
 0x274   :  { %v9085_v32 = vmax.f32 %v6343_v16, 0.0 }
 0x275   :  { %v1280_v30 = vadd.f32 %v1222_v39, %v943_v9  ;;  %v9073_v22 = vmax.f32 %v6365_v36, 0.0  ;;  %v6387_v9 = vpop.f32.mrf.mxu2 }
 0x276   :  { %v4976_v34 = vpack.i.bf16 %v9072_v49, %v9085_v32 }
 0x277   :  { %v1467_v11 = vpop.f32.mrf.mxu0 }
 0x278   :  { %v1614_v44 = vadd.f32 %v1467_v11, %v1277_v60  ;;  %v1559_v33 = vpop.f32.mrf.mxu1  ;;  %4977 = vrot.lane.b32.xlu1 %v4976_v34, %s5113_s16  ;;  %v4981_v34 = vpack.i.bf16 %v9064_v61, %v9075_v26 }
 0x279   :  { %v1617_v11 = vadd.f32 %v1559_v33, %v1280_v30 }
 0x27a   :  { %v6370_v4 = vadd.f32 %v6149_v41, %v1614_v44 }
 0x27b   :  { %v6390_v7 = vadd.f32 %v6145_v53, %v1617_v11  ;;  %v1231_v51 = vpop.f32.mrf.mxu3 }
 0x27c   :  { %v9088_v60 = vmax.f32 %v6370_v4, 0.0 }
 0x27d   :  { %v9074_v33 = vmax.f32 %v6390_v7, 0.0 }
 0x27e   :  { %v4986_v39 = vpack.i.bf16 %v9073_v22, %v9088_v60  ;;  %v9225_v22 = vld [vmem:[#allocation20_spill] sm:$0xff] }
 0x27f   :  { %v1470_v44 = vpop.f32.mrf.mxu0 }
 0x280   :  { %v1616_v1 = vadd.f32 %v1470_v44, %v1279_v59  ;;  %v6392_v25 = vpop.f32.mrf.mxu1  ;;  %4987 = vrot.lane.b32.xlu0 %v4986_v39, %s5113_s16  ;;  %4982 = vrot.lane.b32.xlu1 %v4981_v34, %s5113_s16  ;;  %v1142_v39 = vpop.f32.mrf.mxu2 }
 0x282   :  { %v6397_v47 = vadd.f32 %v6149_v41, %v1616_v1 }
 0x283   :  { %v1234_v34 = vpop.f32.mrf.mxu3 }
 0x284   :  { %v9089_v30 = vmax.f32 %v6397_v47, 0.0  ;;  %v1288_v49 = vadd.f32 %v1234_v34, %v951_v58  ;;  %v9230_v58 = vld [vmem:[#allocation22_spill] sm:$0xff] }
 0x285   :  { %v9231_v34 = vld [vmem:[#allocation54_spill] sm:$0xff] }
 0x286   :  { %v4991_v11 = vpack.i.bf16 %v9074_v33, %v9089_v30  ;;  %v9226_v33 = vld [vmem:[#allocation51_spill] sm:$0xff] }
 0x287   :  { %v6405_v59 = vpop.f32.mrf.mxu0  ;;  %v950_v26 = vadd.f32 %v9226_v33, %v9225_v22  ;;  %v952_v22 = vadd.f32 %v9231_v34, %v9230_v58  ;;  %v9241_v30 = vld [vmem:[#allocation59_spill] sm:$0xff] }
 0x288   :  { %v6407_v44 = vpop.f32.mrf.mxu1  ;;  %4992 = vrot.lane.b32.xlu0 %v4991_v11, %s5113_s16  ;;  %v1145_v31 = vpop.f32.mrf.mxu2 }
 0x289   :  { %v1287_v19 = vadd.f32 %v1145_v31, %v950_v26 }
 0x28b   :  { %v1237_v21 = vpop.f32.mrf.mxu3 }
 0x28c   :  { %v1290_v32 = vadd.f32 %v1237_v21, %v953_v20  ;;  %v9233_v20 = vld [vmem:[#allocation55_spill] sm:$0xff] }
 0x28f   :  { %v6410_v1 = vpop.f32.mrf.mxu0 }
 0x290   :  { %v1568_v61 = vpop.f32.mrf.mxu1  ;;  %v1148_v62 = vpop.f32.mrf.mxu2 }
 0x291   :  { %v1289_v26 = vadd.f32 %v1148_v62, %v952_v22 }
 0x293   :  { %v1240_v28 = vpop.f32.mrf.mxu3 }
 0x297   :  { %v1479_v15 = vpop.f32.mrf.mxu0 }
 0x298   :  { %v1571_v50 = vpop.f32.mrf.mxu1 }
 0x299   :  { %v1625_v17 = vadd.f32 %v1571_v50, %v1288_v49 }
 0x29b   :  { %v6419_v2 = vadd.f32 %v6145_v53, %v1625_v17 }
 0x29d   :  { %9229 = vst [vmem:[#allocation60_spill] sm:$0xff] %v6419_v2  ;;  %v9086_v50 = vmax.f32 %v6419_v2, 0.0  ;;  %v9262_v2 = vld [vmem:[#allocation65_spill] sm:$0xff] }
 0x29f   :  { %v1482_v11 = vpop.f32.mrf.mxu0 }
 0x2a0   :  { %v1624_v0 = vadd.f32 %v1482_v11, %v1287_v19  ;;  %v1574_v42 = vpop.f32.mrf.mxu1  ;;  %v1151_v19 = vpop.f32.mrf.mxu2 }
 0x2a1   :  { %v1627_v49 = vadd.f32 %v1574_v42, %v1290_v32  ;;  %v9234_v42 = vld [vmem:[#allocation24_spill] sm:$0xff]  ;;  %v9235_v32 = vld [vmem:[#allocation58_spill] sm:$0xff] }
 0x2a2   :  { %v6422_v48 = vadd.f32 %v6149_v41, %v1624_v0  ;;  %v955_v0 = vadd.f32 %v9233_v20, %v9232_v12  ;;  %v954_v34 = vadd.f32 %v9235_v32, %v9234_v42  ;;  %v1243_v12 = vpop.f32.mrf.mxu3  ;;  %v9236_v20 = vld [vmem:[#allocation18_spill] sm:$0xff]  ;;  %v9240_v32 = vld [vmem:[#allocation25_spill] sm:$0xff] }
 0x2a3   :  { %v6435_v21 = vadd.f32 %v6145_v53, %v1627_v49  ;;  %v9237_v49 = vld [vmem:[#allocation47_spill] sm:$0xff]  ;;  %v957_v63 = vadd.f32 %v9241_v30, %v9240_v32 }
 0x2a4   :  { %v9087_v31 = vmax.f32 %v6422_v48, 0.0  ;;  %v1292_v58 = vadd.f32 %v1240_v28, %v955_v0  ;;  %v948_v60 = vadd.f32 %v9237_v49, %v9236_v20 }
 0x2a5   :  { %v9092_v22 = vmax.f32 %v6435_v21, 0.0  ;;  %v1294_v20 = vadd.f32 %v1243_v12, %v957_v63  ;;  %v9248_v12 = vld [vmem:[#allocation4_spill] sm:$0xff] }
 0x2a6   :  { %v4996_v17 = vpack.i.bf16 %v9086_v50, %v9087_v31  ;;  %v1285_v42 = vadd.f32 %v1142_v39, %v948_v60 }
 0x2a7   :  { %v1485_v35 = vpop.f32.mrf.mxu0 }
 0x2a8   :  { %v1626_v33 = vadd.f32 %v1485_v35, %v1289_v26  ;;  %v1577_v11 = vpop.f32.mrf.mxu1  ;;  %4997 = vrot.lane.b32.xlu2 %v4996_v17, %s5113_s16  ;;  %v1291_v26 = vadd.f32 %v1151_v19, %v954_v34  ;;  %v9238_v17 = vld [vmem:[#allocation17_spill] sm:$0xff]  ;;  %v9239_v35 = vld [vmem:[#allocation44_spill] sm:$0xff]  ;;  %v1154_v19 = vpop.f32.mrf.mxu2  ;;  %v1622_v49 = vadd.f32 %v1479_v15, %v1285_v42 }
 0x2a9   :  { %v1629_v31 = vadd.f32 %v1577_v11, %v1292_v58  ;;  %v949_v0 = vadd.f32 %v9239_v35, %v9238_v17  ;;  %v9242_v17 = vld [vmem:[#allocation27_spill] sm:$0xff]  ;;  %v9243_v35 = vld [vmem:[#allocation61_spill] sm:$0xff] }
 0x2aa   :  { %v6439_v62 = vadd.f32 %v6149_v41, %v1626_v33  ;;  %v956_v60 = vadd.f32 %v9243_v35, %v9242_v17  ;;  %v6471_v15 = vadd.f32 %v6149_v41, %v1622_v49  ;;  %v1246_v35 = vpop.f32.mrf.mxu3 }
 0x2ab   :  { %v6456_v11 = vadd.f32 %v6145_v53, %v1629_v31  ;;  %v1286_v34 = vadd.f32 %v1231_v51, %v949_v0  ;;  %v9249_v0 = vld [vmem:[#allocation28_spill] sm:$0xff] }
 0x2ac   :  { %v9093_v50 = vmax.f32 %v6439_v62, 0.0  ;;  %v1293_v63 = vadd.f32 %v1154_v19, %v956_v60  ;;  %v912_v42 = vadd.f32 %v9249_v0, %v9248_v12  ;;  %v9255_v12 = vld [vmem:[#allocation26_spill] sm:$0xff] }
 0x2ad   :  { %v1623_v39 = vadd.f32 %v1568_v61, %v1286_v34  ;;  %v9095_v30 = vmax.f32 %v6456_v11, 0.0 }
 0x2ae   :  { %v5001_v28 = vpack.i.bf16 %v9092_v22, %v9093_v50 }
 0x2af   :  { %v1488_v33 = vpop.f32.mrf.mxu0  ;;  %v6484_v49 = vadd.f32 %v6145_v53, %v1623_v39  ;;  %v9266_v39 = vld [vmem:[#allocation8_spill] sm:$0xff] }
 0x2b0   :  { %v1628_v58 = vadd.f32 %v1488_v33, %v1291_v26  ;;  %v1580_v38 = vpop.f32.mrf.mxu1  ;;  %5002 = vrot.lane.b32.xlu0 %v5001_v28, %s5113_s16  ;;  %v9244_v26 = vld [vmem:[#allocation6_spill] sm:$0xff]  ;;  %v9245_v33 = vld [vmem:[#allocation31_spill] sm:$0xff] }
 0x2b1   :  { %v1631_v32 = vadd.f32 %v1580_v38, %v1294_v20  ;;  %v914_v50 = vadd.f32 %v9245_v33, %v9244_v26  ;;  %v9246_v28 = vld [vmem:[#allocation2_spill] sm:$0xff]  ;;  %v9251_v38 = vld [vmem:[#allocation29_spill] sm:$0xff] }
 0x2b2   :  { %v6460_v22 = vadd.f32 %v6149_v41, %v1628_v58  ;;  %v621_v51 = vadd.f32 %v9247_v37, %v9246_v28  ;;  %v9250_v58 = vld [vmem:[#allocation5_spill] sm:$0xff]  ;;  %v9252_v20 = vld [vmem:[#allocation50_spill] sm:$0xff]  ;;  %v9254_v28 = vld [vmem:[#allocation3_spill] sm:$0xff] }
 0x2b3   :  { %v915_v34 = vadd.f32 %v9251_v38, %v9250_v58  ;;  %v1251_v17 = vadd.f32 %v9252_v20, %v914_v50  ;;  %v9253_v37 = vld [vmem:[#allocation62_spill] sm:$0xff]  ;;  %v6487_v60 = vadd.f32 %v6145_v53, %v1631_v32  ;;  %v913_v0 = vadd.f32 %v9255_v12, %v9254_v28  ;;  %v9257_v38 = vld [vmem:[#allocation49_spill] sm:$0xff] }
 0x2b4   :  { %v9096_v31 = vmax.f32 %v6460_v22, 0.0  ;;  %v959_v19 = vadd.f32 %v9253_v37, %v621_v51  ;;  %v9259_v32 = vld [vmem:[#allocation45_spill] sm:$0xff]  ;;  %v9263_v12 = vld [vmem:[#allocation66_spill] sm:$0xff] }
 0x2b5   :  { %v1252_v50 = vadd.f32 %v9257_v38, %v915_v34  ;;  %v1588_v51 = vadd.f32 %v9258_v18, %v1251_v17  ;;  %v9107_v34 = vmax.f32 %v6484_v49, 0.0 }
 0x2b6   :  { %v5006_v61 = vpack.i.bf16 %v9095_v30, %v9096_v31  ;;  %v9256_v30 = vld [vmem:[#allocation46_spill] sm:$0xff]  ;;  %v1296_v31 = vadd.f32 %v1246_v35, %v959_v19  ;;  %v9101_v35 = vmax.f32 %v6487_v60, 0.0  ;;  %v9264_v19 = vld [vmem:[#allocation7_spill] sm:$0xff] }
 0x2b7   :  { %v1491_v26 = vpop.f32.mrf.mxu0  ;;  %v1249_v58 = vadd.f32 %v9256_v30, %v912_v42  ;;  %v1589_v30 = vadd.f32 %v9263_v12, %v1252_v50  ;;  %v1157_v42 = vpop.f32.mrf.mxu2  ;;  %v6515_v12 = vadd.f32 %v6149_v41, %v1588_v51 }
 0x2b8   :  { %v1630_v33 = vadd.f32 %v1491_v26, %v1293_v63  ;;  %5007 = vrot.lane.b32.xlu1 %v5006_v61, %s5113_s16  ;;  %v1583_v20 = vpop.f32.mrf.mxu1  ;;  %v1250_v63 = vadd.f32 %v9259_v32, %v913_v0  ;;  %v9260_v26 = vld [vmem:[#allocation30_spill] sm:$0xff]  ;;  %v9261_v61 = vld [vmem:[#allocation63_spill] sm:$0xff]  ;;  %v9267_v0 = vld [vmem:[#allocation33_spill] sm:$0xff] }
 0x2b9   :  { %v958_v3 = vadd.f32 %v9261_v61, %v9260_v26  ;;  %v1586_v28 = vadd.f32 %v9262_v2, %v1249_v58  ;;  %v1633_v17 = vadd.f32 %v1583_v20, %v1296_v31  ;;  %v916_v32 = vadd.f32 %v9267_v0, %v9266_v39  ;;  %v9269_v26 = vld [vmem:[#allocation41_spill] sm:$0xff]  ;;  %v9270_v2 = vld [vmem:[#allocation64_spill] sm:$0xff] }
 0x2ba   :  { %v6497_v37 = vadd.f32 %v6149_v41, %v1630_v33  ;;  %v9265_v33 = vld [vmem:[#allocation32_spill] sm:$0xff]  ;;  %v944_v61 = vadd.f32 %v9269_v26, %v9268_v13  ;;  %v1587_v58 = vadd.f32 %v9270_v2, %v1250_v63  ;;  %v9271_v20 = vmax.f32 %v6471_v15, 0.0  ;;  %v9273_v0 = vld [vmem:[#allocation13_spill] sm:$0xff] }
 0x2bb   :  { %v917_v38 = vadd.f32 %v9265_v33, %v9264_v19  ;;  %v1295_v50 = vadd.f32 %v1157_v42, %v958_v3  ;;  %v9272_v39 = vld [vmem:[#allocation56_spill] sm:$0xff]  ;;  %v6529_v3 = vadd.f32 %v6149_v41, %v1586_v28  ;;  %v6532_v51 = vadd.f32 %v6145_v53, %v1589_v30 }
 0x2bc   :  { %v9114_v18 = vmax.f32 %v6497_v37, 0.0  ;;  %v5026_v19 = vpack.i.bf16 %v9107_v34, %v9271_v20  ;;  %v1253_v33 = vadd.f32 %v9272_v39, %v916_v32  ;;  %v9274_v13 = vld [vmem:[#allocation40_spill] sm:$0xff]  ;;  %v1281_v42 = vadd.f32 %v6350_v54, %v944_v61  ;;  %v9276_v32 = vld [vmem:[#allocation53_spill] sm:$0xff] }
 0x2bd   :  { %v945_v26 = vadd.f32 %v9274_v13, %v9273_v0  ;;  %9275 = vst [vmem:[#allocation9_spill] sm:$0xff] %v6532_v51  ;;  %v6536_v2 = vadd.f32 %v6145_v53, %v1633_v17  ;;  %v1254_v20 = vadd.f32 %v9276_v32, %v917_v38  ;;  %v6543_v28 = vadd.f32 %v6145_v53, %v1587_v58  ;;  %v9278_v0 = vld [vmem:[#allocation69_spill] sm:$0xff] }
 0x2be   :  { %v5011_v31 = vpack.i.bf16 %v9101_v35, %v9114_v18  ;;  %v9112_v30 = vmax.f32 %v6515_v12, 0.0  ;;  %v1590_v13 = vadd.f32 %v9278_v0, %v1253_v33  ;;  %v1618_v54 = vadd.f32 %v6405_v59, %v1281_v42 }
 0x2bf   :  { %v1494_v63 = vpop.f32.mrf.mxu0  ;;  %v1282_v39 = vadd.f32 %v6338_v52, %v945_v26  ;;  %9277 = vst [vmem:[#allocation36_spill] sm:$0xff] %v6543_v28  ;;  %v9111_v61 = vmax.f32 %v6529_v3, 0.0  ;;  %v9108_v58 = vmax.f32 %v6536_v2, 0.0  ;;  %v9280_v26 = vld [vmem:[#allocation16_spill] sm:$0xff]  ;;  %v9102_v59 = vmax.f32 %v6543_v28, 0.0 }
 0x2c0   :  { %v1632_v35 = vadd.f32 %v1494_v63, %v1295_v50  ;;  %5012 = vrot.lane.b32.xlu2 %v5011_v31, %s5113_s16  ;;  %5027 = vrot.lane.b32.xlu1 %v5026_v19, %s5113_s16  ;;  %v9103_v50 = vmax.f32 %v6532_v51, 0.0  ;;  %v9279_v31 = vld [vmem:[#allocation68_spill] sm:$0xff]  ;;  %v9281_v63 = vld [vmem:[#allocation43_spill] sm:$0xff]  ;;  %v6564_v42 = vadd.f32 %v6149_v41, %v1618_v54 }
 0x2c1   :  { %v1591_v38 = vadd.f32 %v9279_v31, %v1254_v20  ;;  %v1619_v52 = vadd.f32 %v6392_v25, %v1282_v39  ;;  %v946_v33 = vadd.f32 %v9281_v63, %v9280_v26  ;;  %v9282_v20 = vld [vmem:[#allocation15_spill] sm:$0xff]  ;;  %v9283_v39 = vld [vmem:[#allocation42_spill] sm:$0xff] }
 0x2c2   :  { %v6549_v17 = vadd.f32 %v6149_v41, %v1632_v35  ;;  %v6561_v35 = vadd.f32 %v6149_v41, %v1590_v13  ;;  %v5031_v32 = vpack.i.bf16 %v9103_v50, %v9112_v30  ;;  %v947_v0 = vadd.f32 %v9283_v39, %v9282_v20 }
 0x2c3   :  { %v5041_v13 = vpack.i.bf16 %v9102_v59, %v9111_v61  ;;  %v1283_v54 = vadd.f32 %v6387_v9, %v946_v33  ;;  %v6582_v31 = vadd.f32 %v6145_v53, %v1591_v38  ;;  %v6585_v26 = vadd.f32 %v6145_v53, %v1619_v52 }
 0x2c4   :  { %v9115_v19 = vmax.f32 %v6549_v17, 0.0  ;;  %v1284_v63 = vadd.f32 %v6374_v55, %v947_v0  ;;  %v9113_v20 = vmax.f32 %v6561_v35, 0.0  ;;  %v9109_v39 = vmax.f32 %v6564_v42, 0.0 }
 0x2c5   :  { %9284 = vst [vmem:[#allocation57_spill] sm:$0xff] %v6582_v31  ;;  %v1620_v9 = vadd.f32 %v6410_v1, %v1283_v54  ;;  %v9104_v38 = vmax.f32 %v6582_v31, 0.0  ;;  %v9105_v33 = vmax.f32 %v6585_v26, 0.0  ;;  %v6622_v54 = vpop.permute.xlu2 %4932 }
 0x2c6   :  { %v5016_v25 = vpack.i.bf16 %v9108_v58, %v9115_v19  ;;  %9285 = vst [vmem:[#allocation71_spill] sm:$0xff] %v6585_v26  ;;  %v1621_v52 = vadd.f32 %v6407_v44, %v1284_v63  ;;  %v9286_v19 = vmax.f32 %v6397_v47, 0.0  ;;  %v9288_v26 = vmax.f32 %v6370_v4, 0.0 }
 0x2c7   :  { %v5021_v55 = vpack.i.bf16 %v9104_v38, %v9113_v20 }
 0x2c8   :  { %5017 = vrot.lane.b32.xlu0 %v5016_v25, %s5113_s16  ;;  %5032 = vrot.lane.b32.xlu2 %v5031_v32, %s5113_s16  ;;  %v6598_v25 = vadd.f32 %v6149_v41, %v1620_v9  ;;  %v5046_v32 = vpack.i.bf16 %v9105_v33, %v9109_v39  ;;  %v6609_v1 = vadd.f32 %v6145_v53, %v1621_v52  ;;  %v6624_v53 = vpop.permute.xlu0 %4937 }
 0x2c9   :  { %5042 = vrot.lane.b32.xlu1 %v5041_v13, %s5113_s16  ;;  %v6620_v13 = vpop.permute.xlu1 %4942 }
 0x2ca   :  { %v9110_v41 = vmax.f32 %v6598_v25, 0.0  ;;  %v9106_v44 = vmax.f32 %v6609_v1, 0.0 }
 0x2cc   :  { %v5036_v0 = vpack.i.bf16 %v9106_v44, %v9110_v41 }
 0x2cd   :  { %v6628_v9 = vpop.permute.xlu2 %4947 }
 0x2d0   :  { %5022 = vrot.lane.b32.xlu0 %v5021_v55, %s5113_s16  ;;  %5047 = vrot.lane.b32.xlu2 %v5046_v32, %s5113_s16  ;;  %v6630_v52 = vpop.permute.xlu0 %4957 }
 0x2d1   :  { %v6626_v63 = vpop.permute.xlu1 %4952 }
 0x2d5   :  { %v6634_v32 = vpop.permute.xlu2 %4962 }
 0x2d8   :  { %5037 = vrot.lane.b32.xlu0 %v5036_v0, %s5113_s16 }
 0x2dd   :  { %v6648_v41 = vpop.permute.xlu2 %4967 }
 0x2de   :  { %v4970_v28 = vunpack.i.h.bf16 %v6648_v41  ;;  %v4969_v51 = vunpack.i.l.bf16 %v6648_v41 }
 0x2e0   :  { %v1892_v4 = vsel %vm1880_vm2, %v4969_v51, %v4970_v28  ;;  %v9126_v51 = vunpack.i.h.bf16 %v6628_v9 }
 0x2e2   :  { %v6632_v55 = vpop.permute.xlu1 %4972 }
 0x2e3   :  { %v4974_v30 = vunpack.i.l.bf16 %v6632_v55  ;;  %v9289_v47 = vunpack.i.h.bf16 %v6632_v55 }
 0x2ea   :  { %v6638_v50 = vpop.permute.xlu1 %4977 }
 0x2eb   :  { %v4979_v34 = vunpack.i.l.bf16 %v6638_v50  ;;  %v9287_v31 = vunpack.i.h.bf16 %v6638_v50 }
 0x2ed   :  { %v1894_v61 = vsel %vm1880_vm2, %v4979_v34, %v9287_v31  ;;  %v9128_v34 = vunpack.i.h.bf16 %v6630_v52  ;;  %v4959_v31 = vunpack.i.l.bf16 %v6630_v52 }
 0x2f2   :  { %v6636_v59 = vpop.permute.xlu0 %4987 }
 0x2f3   :  { %v9121_v0 = vunpack.i.h.bf16 %v6636_v59  ;;  %v4989_v38 = vunpack.i.l.bf16 %v6636_v59 }
 0x2f5   :  { %v1895_v18 = vsel %vm1880_vm2, %v4989_v38, %v9121_v0  ;;  %v4964_v38 = vunpack.i.l.bf16 %v6634_v32 }
 0x2fa   :  { %v6642_v33 = vpop.permute.xlu0 %4992 }
 0x2fb   :  { %v9120_v58 = vunpack.i.h.bf16 %v6642_v33  ;;  %v4994_v39 = vunpack.i.l.bf16 %v6642_v33 }
 0x2fd   :  { %v1896_v20 = vsel %vm1880_vm2, %v4994_v39, %v9120_v58  ;;  %v1981_v39 = vmax.f32 %v9288_v26, %v1895_v18  ;;  %v9129_v58 = vunpack.i.h.bf16 %v6634_v32  ;;  %v9291_v18 = vmax.f32 %v6317_v10, 0.0 }
 0x2fe   :  { %v1983_v44 = vmax.f32 %v9286_v19, %v1896_v20  ;;  %v1893_v19 = vsel %vm1880_vm2, %v4974_v30, %v9289_v47  ;;  %v9290_v20 = vmax.f32 %v6343_v16, 0.0  ;;  %v9127_v30 = vunpack.i.h.bf16 %v6626_v63 }
 0x2ff   :  { %v1977_v26 = vmax.f32 %v9291_v18, %v1893_v19  ;;  %v1891_v16 = vsel %vm1880_vm2, %v4964_v38, %v9129_v58  ;;  %v1890_v10 = vsel %vm1880_vm2, %v4959_v31, %v9128_v34  ;;  %v9293_v47 = vmax.f32 %v6283_v8, 0.0 }
 0x300   :  { %2067 = vmatpush.msrb.mxu2 %v1983_v44  ;;  %2356 = vmatpush.msrb.mxu0 %v1983_v44  ;;  %v1979_v0 = vmax.f32 %v9290_v20, %v1894_v61  ;;  %v4954_v44 = vunpack.i.l.bf16 %v6626_v63  ;;  %v9292_v61 = vmax.f32 %v6300_v46, 0.0  ;;  %v9125_v38 = vunpack.i.h.bf16 %v6620_v13 }
 0x301   :  { %v1973_v19 = vmax.f32 %v9293_v47, %v1891_v16  ;;  %v4944_v20 = vunpack.i.l.bf16 %v6620_v13  ;;  %v9124_v31 = vunpack.i.h.bf16 %v6624_v53  ;;  %v6707_v16 = vpop.permute.xlu1 %4982  ;;  %v9296_v47 = vmax.f32 %v6228_v27, 0.0 }
 0x302   :  { %2068 = vmatpush.msrb.mxu2 %v1981_v39  ;;  %2357 = vmatpush.msrb.mxu0 %v1981_v39  ;;  %v1975_v39 = vmax.f32 %v9292_v61, %v1892_v4  ;;  %v1889_v46 = vsel %vm1880_vm2, %v4954_v44, %v9127_v30  ;;  %v9294_v4 = vmax.f32 %v6266_v45, 0.0  ;;  %v9295_v61 = vmax.f32 %v6248_v57, 0.0 }
 0x303   :  { %v4934_v45 = vunpack.i.l.bf16 %v6622_v54  ;;  %v9298_v27 = vmax.f32 %v6184_v40, 0.0 }
 0x304   :  { %2069 = vmatpush.msrb.mxu2 %v1979_v0  ;;  %2358 = vmatpush.msrb.mxu0 %v1979_v0  ;;  %v4949_v0 = vunpack.i.l.bf16 %v6628_v9  ;;  %v1971_v18 = vmax.f32 %v9294_v4, %v1890_v10  ;;  %v1969_v44 = vmax.f32 %v9295_v61, %v1889_v46  ;;  %v1887_v10 = vsel %vm1880_vm2, %v4944_v20, %v9125_v38 }
 0x305   :  { %v4984_v4 = vunpack.i.l.bf16 %v6707_v16  ;;  %v9297_v46 = vmax.f32 %v6207_v56, 0.0  ;;  %v9300_v56 = vmax.f32 %v6353_v43, 0.0 }
 0x306   :  { %2070 = vmatpush.msrb.mxu2 %v1977_v26  ;;  %2359 = vmatpush.msrb.mxu0 %v1977_v26  ;;  %v4939_v26 = vunpack.i.l.bf16 %v6624_v53  ;;  %v1888_v8 = vsel %vm1880_vm2, %v4949_v0, %v9126_v51 }
 0x307   :  { %v1967_v0 = vmax.f32 %v9296_v47, %v1888_v8 }
 0x308   :  { %2071 = vmatpush.msrb.mxu2 %v1975_v39  ;;  %2360 = vmatpush.msrb.mxu0 %v1975_v39  ;;  %v9123_v39 = vunpack.i.h.bf16 %v6622_v54  ;;  %v1886_v57 = vsel %vm1880_vm2, %v4939_v26, %v9124_v31  ;;  %v9299_v26 = vmax.f32 %v6158_v29, 0.0 }
 0x309   :  { %v1963_v8 = vmax.f32 %v9298_v27, %v1886_v57 }
 0x30a   :  { %2072 = vmatpush.msrb.mxu2 %v1973_v19  ;;  %2361 = vmatpush.msrb.mxu0 %v1973_v19  ;;  %v9122_v19 = vunpack.i.h.bf16 %v6707_v16  ;;  %v1885_v20 = vsel %vm1880_vm2, %v4934_v45, %v9123_v39  ;;  %v6737_v45 = vpop.permute.xlu2 %4997  ;;  %v9301_v39 = vmax.f32 %v6549_v17, 0.0 }
 0x30c   :  { %2073 = vmatpush.msrb.mxu2 %v1971_v18  ;;  %2362 = vmatpush.msrb.mxu0 %v1971_v18  ;;  %v1965_v18 = vmax.f32 %v9297_v46, %v1887_v10  ;;  %v1884_v61 = vsel %vm1880_vm2, %v4984_v4, %v9122_v19  ;;  %v4999_v19 = vunpack.i.l.bf16 %v6737_v45 }
 0x30d   :  { %v1959_v10 = vmax.f32 %v9300_v56, %v1884_v61 }
 0x30e   :  { %2074 = vmatpush.msrb.mxu2 %v1969_v44  ;;  %2363 = vmatpush.msrb.mxu0 %v1969_v44  ;;  %v1961_v44 = vmax.f32 %v9299_v26, %v1885_v20 }
 0x310   :  { %2075 = vmatpush.msrb.mxu2 %v1967_v0  ;;  %2364 = vmatpush.msrb.mxu0 %v1967_v0 }
 0x312   :  { %2076 = vmatpush.msrb.mxu2 %v1965_v18  ;;  %2365 = vmatpush.msrb.mxu0 %v1965_v18 }
 0x314   :  { %2077 = vmatpush.msrb.mxu2 %v1963_v8  ;;  %2366 = vmatpush.msrb.mxu0 %v1963_v8 }
 0x316   :  { %2078 = vmatpush.msrb.mxu2 %v1961_v44  ;;  %2367 = vmatpush.msrb.mxu0 %v1961_v44 }
 0x318   :  { %2079 = vmatpush.msrb.mxu2 %v1959_v10  ;;  %2368 = vmatpush.msrb.mxu0 %v1959_v10  ;;  %v5000_v10 = vunpack.i.h.bf16 %v6737_v45  ;;  %v9336_v45 = vunpack.i.h.bf16 %v6628_v9  ;;  %v9340_v9 = vunpack.i.h.bf16 %v6620_v13  ;;  %v9347_v13 = vld [vmem:[#allocation71_spill] sm:$0xff] }
 0x31a   :  { %v6741_v47 = vpop.permute.xlu2 %5012 }
 0x31b   :  { %v9131_v29 = vunpack.i.h.bf16 %v6741_v47  ;;  %v5014_v57 = vunpack.i.l.bf16 %v6741_v47 }
 0x31d   :  { %v1903_v56 = vsel %vm1880_vm2, %v5014_v57, %v9131_v29 }
 0x322   :  { %v6743_v0 = vpop.permute.xlu0 %5002  ;;  %v6755_v8 = vpop.permute.xlu2 %5032 }
 0x323   :  { %v5005_v61 = vunpack.i.h.bf16 %v6743_v0  ;;  %v5004_v26 = vunpack.i.l.bf16 %v6743_v0  ;;  %v9133_v51 = vunpack.i.h.bf16 %v6755_v8  ;;  %v5034_v34 = vunpack.i.l.bf16 %v6755_v8  ;;  %v9334_v0 = vld [vmem:[#allocation60_spill] sm:$0xff] }
 0x32a   :  { %v6739_v40 = vpop.permute.xlu1 %5007 }
 0x32b   :  { %v9130_v43 = vunpack.i.h.bf16 %v6739_v40  ;;  %v5009_v18 = vunpack.i.l.bf16 %v6739_v40 }
 0x32d   :  { %v1902_v38 = vsel %vm1880_vm2, %v5009_v18, %v9130_v43 }
 0x332   :  { %v6745_v4 = vpop.permute.xlu1 %5027 }
 0x333   :  { %v5030_v58 = vunpack.i.h.bf16 %v6745_v4  ;;  %v5029_v17 = vunpack.i.l.bf16 %v6745_v4 }
 0x33a   :  { %v6749_v46 = vpop.permute.xlu0 %5017 }
 0x33b   :  { %v5020_v20 = vunpack.i.h.bf16 %v6749_v46  ;;  %v5019_v27 = vunpack.i.l.bf16 %v6749_v46  ;;  %v6773_v30 = vpop.permute.xlu1 %5042  ;;  %v9322_v46 = vunpack.i.h.bf16 %v6741_v47  ;;  %v9327_v47 = vmax.f32 %v6456_v11, 0.0  ;;  %v6939_v11 = vld [vmem:[%s9051_s3 + $0x18] sm:$0xff] }
 0x33d   :  { %v1904_v44 = vsel %vm1880_vm2, %v5019_v27, %v5020_v20  ;;  %v9302_v27 = vmax.f32 %v6497_v37, 0.0  ;;  %v1900_v37 = vsel %vm1880_vm2, %v4999_v19, %v5000_v10  ;;  %v1882_v19 = vsel %vm1880_vm2, %v5034_v34, %v9133_v51 }
 0x33e   :  { %v1999_v31 = vmax.f32 %v9301_v39, %v1904_v44  ;;  %v1901_v39 = vsel %vm1880_vm2, %v5004_v26, %v5005_v61  ;;  %v9303_v44 = vmax.f32 %v6460_v22, 0.0  ;;  %v9304_v26 = vmax.f32 %v6439_v62, 0.0 }
 0x33f   :  { %v1997_v57 = vmax.f32 %v9302_v27, %v1903_v56  ;;  %v5045_v56 = vunpack.i.h.bf16 %v6773_v30  ;;  %v5044_v27 = vunpack.i.l.bf16 %v6773_v30  ;;  %v9308_v34 = vmax.f32 %v6515_v12, 0.0  ;;  %v7072_v30 = vld [vmem:[%s9052_s4 + $0x40] sm:$0xff] }
 0x340   :  { %2131 = vmatpush.msra.mxu3 %v1999_v31  ;;  %2420 = vmatpush.msrb.mxu1 %v1999_v31  ;;  %v1995_v31 = vmax.f32 %v9303_v44, %v1902_v38  ;;  %v1899_v38 = vsel %vm1880_vm2, %v5029_v17, %v5030_v58  ;;  %v6805_v44 = vpop.permute.xlu2 %5047  ;;  %v9307_v17 = vmax.f32 %v6471_v15, 0.0  ;;  %v6827_v15 = vld [vmem:[%s9051_s3] sm:$0xff] }
 0x341   :  { %v1955_v51 = vmax.f32 %v9308_v34, %v1882_v19  ;;  %v9310_v19 = vunpack.i.h.bf16 %v6642_v33 }
 0x342   :  { %2132 = vmatpush.msra.mxu3 %v1997_v57  ;;  %2421 = vmatpush.msrb.mxu1 %v1997_v57  ;;  %v6783_v18 = vpop.permute.xlu0 %5022  ;;  %v1993_v57 = vmax.f32 %v9304_v26, %v1901_v39  ;;  %v9306_v39 = vmax.f32 %v6422_v48, 0.0 }
 0x343   :  { %v9132_v43 = vunpack.i.h.bf16 %v6783_v18  ;;  %v5024_v29 = vunpack.i.l.bf16 %v6783_v18 }
 0x344   :  { %2133 = vmatpush.msra.mxu3 %v1995_v31  ;;  %2422 = vmatpush.msrb.mxu1 %v1995_v31  ;;  %v9305_v31 = vmax.f32 %v6561_v35, 0.0  ;;  %v1991_v26 = vmax.f32 %v9306_v39, %v1900_v37  ;;  %v5049_v35 = vunpack.i.l.bf16 %v6805_v44  ;;  %v9309_v37 = vmax.f32 %v6529_v3, 0.0 }
 0x345   :  { %v1883_v22 = vsel %vm1880_vm2, %v5024_v29, %v9132_v43  ;;  %v1881_v29 = vsel %vm1880_vm2, %v5044_v27, %v5045_v56  ;;  %v1989_v43 = vmax.f32 %v9307_v17, %v1899_v38  ;;  %v6834_v38 = vld [vmem:[%s9052_s4] sm:$0xff]  ;;  %v9311_v3 = vmax.f32 %v6390_v7, 0.0 }
 0x346   :  { %2134 = vmatpush.msra.mxu3 %v1993_v57  ;;  %2423 = vmatpush.msrb.mxu1 %v1993_v57  ;;  %v1957_v62 = vmax.f32 %v9305_v31, %v1883_v22  ;;  %v5050_v57 = vunpack.i.h.bf16 %v6805_v44  ;;  %v1953_v27 = vmax.f32 %v9309_v37, %v1881_v29  ;;  %v9313_v39 = vmax.f32 %v6365_v36, 0.0  ;;  %v7017_v44 = vld [vmem:[%s9051_s3 + $0x30] sm:$0xff] }
 0x347   :  { %v6840_v31 = vmax.f32 %v9311_v3, %v9310_v19  ;;  %v9314_v7 = vmax.f32 %v6598_v25, 0.0  ;;  %v9315_v29 = vunpack.i.h.bf16 %v6638_v50  ;;  %v9316_v17 = vmax.f32 %v6335_v23, 0.0 }
 0x348   :  { %2080 = vmatpush.msrb.mxu2 %v1957_v62  ;;  %2135 = vmatpush.msra.mxu3 %v1991_v26  ;;  %v9317_v36 = vmax.f32 %v6564_v42, 0.0  ;;  %v9318_v25 = vunpack.i.h.bf16 %v6632_v55  ;;  %v9319_v50 = vmax.f32 %v6313_v14, 0.0  ;;  %v6885_v42 = vld [vmem:[%s9051_s3 + $0x10] sm:$0xff]  ;;  %v6890_v55 = vld [vmem:[%s9052_s4 + $0x8] sm:$0xff]  ;;  %v9321_v14 = vmax.f32 %v6296_v5, 0.0 }
 0x349   :  { %2369 = vmatpush.msrb.mxu0 %v1957_v62  ;;  %2424 = vmatpush.msrb.mxu1 %v1991_v26  ;;  %v9312_v62 = vunpack.i.h.bf16 %v6636_v59  ;;  %v6861_v34 = vmax.f32 %v9316_v17, %v9315_v29  ;;  %v9324_v5 = vunpack.i.h.bf16 %v6634_v32  ;;  %v9328_v3 = vunpack.i.h.bf16 %v6630_v52  ;;  %v9332_v52 = vld [vmem:[#allocation76_spill] sm:$0xff] }
 0x34a   :  { %2136 = vmatpush.msra.mxu3 %v1989_v43  ;;  %v6820_v48 = vpop.permute.xlu0 %5037  ;;  %2081 = vmatpush.msrb.mxu2 %v1955_v51  ;;  %v6875_v23 = vmax.f32 %v9319_v50, %v9318_v25  ;;  %v9339_v29 = vmax.f32 %v6484_v49, 0.0  ;;  %v9343_v49 = vmax.f32 %v6609_v1, 0.0  ;;  %v9344_v50 = vunpack.i.h.bf16 %v6624_v53  ;;  %v7007_v1 = vld [vmem:[%s9051_s3 + $0x28] sm:$0xff]  ;;  %v9350_v53 = vld [vmem:[#allocation72_spill] sm:$0xff] }
 0x34b   :  { %2425 = vmatpush.msrb.mxu1 %v1989_v43  ;;  %v5040_v12 = vunpack.i.h.bf16 %v6820_v48  ;;  %v5039_v22 = vunpack.i.l.bf16 %v6820_v48  ;;  %2370 = vmatpush.msrb.mxu0 %v1955_v51  ;;  %v1897_v51 = vsel %vm1880_vm2, %v5049_v35, %v5050_v57  ;;  %v6851_v26 = vmax.f32 %v9313_v39, %v9312_v62  ;;  %v6869_v35 = vld [vmem:[%s9051_s3 + $0x8] sm:$0xff] }
 0x34c   :  { %2082 = vmatpush.msrb.mxu2 %v1953_v27  ;;  %v1985_v59 = vmax.f32 %v9317_v36, %v1897_v51  ;;  %v9320_v48 = vmax.f32 %v6536_v2, 0.0  ;;  %v6898_v2 = vmax.f32 %v9321_v14, %v4970_v28  ;;  %v9325_v28 = vmax.f32 %v6279_v24, 0.0  ;;  %v6978_v36 = vld [vmem:[%s9052_s4 + $0x20] sm:$0xff] }
 0x34d   :  { %2371 = vmatpush.msrb.mxu0 %v1953_v27  ;;  %2083 = vmatmul.f32.vlgmr.msrb.gmra.mxu2 %v6827_v15  ;;  %v1898_v43 = vsel %vm1880_vm2, %v5039_v22, %v5040_v12  ;;  %v6908_v22 = vld [vmem:[%s9052_s4 + $0x10] sm:$0xff]  ;;  %v9330_v24 = vmax.f32 %v6435_v21, 0.0  ;;  %v9333_v62 = vmax.f32 %v9332_v52, 0.0  ;;  %v9335_v39 = vmax.f32 %v9334_v0, 0.0  ;;  %v9359_v0 = vld [vmem:[#allocation9_spill] sm:$0xff] }
 0x34e   :  { %2179 = vmatpush.msra.mxu2 %v6840_v31  ;;  %v1987_v33 = vmax.f32 %v9314_v7, %v1898_v43  ;;  %2372 = vmatmul.f32.vlgmr.msrb.gmra.mxu0 %v6834_v38  ;;  %v2000_v37 = vmax.f32 %v9320_v48, %v5020_v20  ;;  %v9323_v20 = vmax.f32 %v6487_v60, 0.0  ;;  %v6917_v41 = vmax.f32 %v9325_v28, %v9324_v5  ;;  %v9337_v7 = vld [vmem:[#allocation75_spill] sm:$0xff]  ;;  %v9345_v48 = vld [vmem:[#allocation73_spill] sm:$0xff] }
 0x34f   :  { %v9326_v60 = vunpack.i.h.bf16 %v6739_v40  ;;  %v9329_v43 = vmax.f32 %v6262_v6, 0.0  ;;  %v1994_v32 = vmax.f32 %v9330_v24, %v5005_v61  ;;  %v9331_v40 = vunpack.i.h.bf16 %v6626_v63  ;;  %v6955_v61 = vld [vmem:[%s9051_s3 + $0x20] sm:$0xff]  ;;  %v6960_v63 = vld [vmem:[%s9052_s4 + $0x18] sm:$0xff]  ;;  %v7033_v24 = vld [vmem:[%s9052_s4 + $0x30] sm:$0xff] }
 0x350   :  { %2180 = vmatpush.msra.mxu2 %v6851_v26  ;;  %2137 = vmatpush.msra.mxu3 %v1987_v33  ;;  %v1998_v27 = vmax.f32 %v9323_v20, %v9322_v46  ;;  %v1992_v21 = vmax.f32 %v9335_v39, %v5000_v10  ;;  %v9338_v10 = vmax.f32 %v9337_v7, 0.0  ;;  %v1990_v17 = vmax.f32 %v9339_v29, %v5030_v58  ;;  %v7169_v29 = vld [vmem:[%s9051_s3 + $0x78] sm:$0xff] }
 0x351   :  { %2426 = vmatpush.msrb.mxu1 %v1987_v33  ;;  %v1996_v19 = vmax.f32 %v9327_v47, %v9326_v60  ;;  %v6929_v51 = vmax.f32 %v9329_v43, %v9328_v3  ;;  %v6945_v6 = vmax.f32 %v9333_v62, %v9331_v40  ;;  %v1988_v58 = vmax.f32 %v9343_v49, %v5040_v12  ;;  %v9356_v40 = vld [vmem:[#allocation57_spill] sm:$0xff]  ;;  %v7205_v49 = vld [vmem:[%s9052_s4 + $0x88] sm:$0xff] }
 0x352   :  { %2181 = vmatpush.msra.mxu2 %v6861_v34  ;;  %2138 = vmatpush.msra.mxu3 %v1985_v59  ;;  %v6968_v33 = vmax.f32 %v9338_v10, %v9336_v45  ;;  %v9346_v14 = vmax.f32 %v9345_v48, 0.0  ;;  %v9348_v20 = vmax.f32 %v9347_v13, 0.0  ;;  %v9349_v12 = vunpack.i.h.bf16 %v6622_v54  ;;  %v9353_v54 = vld [vmem:[#allocation34_spill] sm:$0xff]  ;;  %v7247_v13 = vld [vmem:[%s9051_s3 + $0xa8] sm:$0xff] }
 0x353   :  { %2427 = vmatpush.msrb.mxu1 %v1985_v59  ;;  %4625 = vmatmul.msk.f32.vlgmr.msra.gmra.mxu3 %vm2027_vm3, %v6869_v35  ;;  %v9341_v59 = vld [vmem:[#allocation74_spill] sm:$0xff]  ;;  %v9351_v28 = vmax.f32 %v9350_v53, 0.0  ;;  %v9352_v47 = vunpack.i.h.bf16 %v6707_v16  ;;  %v9354_v3 = vmax.f32 %v9353_v54, 0.0  ;;  %v9357_v52 = vmax.f32 %v9356_v40, 0.0  ;;  %v4707_v53 = vld [vmem:[%s9053_s5 + $0x210] sm:$0xff]  ;;  %v7289_v54 = vld [vmem:[%s9052_s4 + $0xb8] sm:$0xff] }
 0x354   :  { %2182 = vmatpush.msra.mxu2 %v6875_v23  ;;  %2243 = vmatpush.msrb.mxu3 %v2000_v37  ;;  %v9342_v4 = vmax.f32 %v9341_v59, 0.0  ;;  %v6997_v46 = vmax.f32 %v9346_v14, %v9344_v50  ;;  %v1986_v5 = vmax.f32 %v9348_v20, %v5050_v57  ;;  %v7022_v57 = vld [vmem:[%s9052_s4 + $0x28] sm:$0xff]  ;;  %v9358_v62 = vunpack.i.h.bf16 %v6755_v8  ;;  %v7059_v8 = vld [vmem:[%s9051_s3 + $0x40] sm:$0xff]  ;;  %v7221_v50 = vld [vmem:[%s9051_s3 + $0x98] sm:$0xff] }
 0x355   :  { %2086 = vmatmul.f32.gmra.mxu2 %v6885_v42  ;;  %4651 = vmatmul.msk.f32.vlgmr.msrb.gmra.mxu1 %vm2027_vm3, %v6890_v55  ;;  %v1962_v60 = vmax.f32 %v9351_v28, %v9349_v12  ;;  %v1960_v43 = vmax.f32 %v9354_v3, %v9352_v47  ;;  %v9360_v39 = vmax.f32 %v9359_v0, 0.0  ;;  %v7186_v59 = vld [vmem:[%s9052_s4 + $0x80] sm:$0xff]  ;;  %v7231_v14 = vld [vmem:[%s9052_s4 + $0x98] sm:$0xff]  ;;  %v7252_v20 = vld [vmem:[%s9051_s3 + $0xb0] sm:$0xff] }
 0x356   :  { %2183 = vmatpush.msra.mxu2 %v6898_v2  ;;  %2244 = vmatpush.msrb.mxu3 %v1998_v27  ;;  %v6987_v25 = vmax.f32 %v9342_v4, %v9340_v9  ;;  %v7179_v9 = vld [vmem:[%s9052_s4 + $0x78] sm:$0xff]  ;;  %v7195_v4 = vld [vmem:[%s9051_s3 + $0x88] sm:$0xff]  ;;  %v7226_v48 = vld [vmem:[%s9051_s3 + $0xa0] sm:$0xff] }
 0x357   :  { %2375 = vmatmul.f32.gmra.mxu0 %v6908_v22  ;;  %v1956_v45 = vmax.f32 %v9360_v39, %v9358_v62  ;;  %v7264_v12 = vld [vmem:[%s9052_s4 + $0xb0] sm:$0xff]  ;;  %v4705_v28 = vld [vmem:[%s9053_s5 + $0x200] sm:$0xff]  ;;  %v7322_v62 = vld [vmem:[%s9052_s4 + $0xc8] sm:$0xff] }
 0x358   :  { %2184 = vmatpush.msra.mxu2 %v6917_v41  ;;  %2245 = vmatpush.msrb.mxu3 %v1996_v19  ;;  %v7284_v47 = vld [vmem:[%s9051_s3 + $0xc0] sm:$0xff]  ;;  %v4703_v3 = vld [vmem:[%s9053_s5 + $0x1f0] sm:$0xff] }
 0x359   :  { %2800 = vmatpush.msra.mxu0 %v4707_v53  ;;  %v4699_v40 = vld [vmem:[%s9053_s5 + $0x1d0] sm:$0xff]  ;;  %v4693_v39 = vld [vmem:[%s9053_s5 + $0x1a0] sm:$0xff] }
 0x35a   :  { %2185 = vmatpush.msra.mxu2 %v6929_v51  ;;  %2246 = vmatpush.msrb.mxu3 %v1994_v32  ;;  %v4695_v0 = vld [vmem:[%s9053_s5 + $0x1b0] sm:$0xff]  ;;  %v4677_v53 = vld [vmem:[%s9053_s5 + $0x120] sm:$0xff] }
 0x35b   :  { %4626 = vmatmul.msk.f32.gmra.mxu3 %vm2027_vm3, %v6939_v11  ;;  %2801 = vmatpush.msra.mxu0 %v4705_v28 }
 0x35c   :  { %2186 = vmatpush.msra.mxu2 %v6945_v6  ;;  %2247 = vmatpush.msrb.mxu3 %v1992_v21 }
 0x35d   :  { %2089 = vmatmul.f32.gmra.mxu2 %v6955_v61  ;;  %4652 = vmatmul.msk.f32.gmra.mxu1 %vm2027_vm3, %v6960_v63 }
 0x35e   :  { %2187 = vmatpush.msra.mxu2 %v6968_v33  ;;  %2248 = vmatpush.msrb.mxu3 %v1990_v17 }
 0x35f   :  { %2378 = vmatmul.f32.gmra.mxu0 %v6978_v36 }
 0x360   :  { %2188 = vmatpush.msra.mxu2 %v6987_v25  ;;  %2249 = vmatpush.msrb.mxu3 %v1988_v58 }
 0x361   :  { %2802 = vmatpush.msra.mxu0 %v4703_v3 }
 0x362   :  { %2189 = vmatpush.msra.mxu2 %v6997_v46  ;;  %2250 = vmatpush.msrb.mxu3 %v1986_v5 }
 0x363   :  { %4627 = vmatmul.msk.f32.gmra.mxu3 %vm2027_vm3, %v7007_v1 }
 0x364   :  { %2532 = vmatpush.msra.mxu3 %v2000_v37  ;;  %2190 = vmatpush.msra.mxu2 %v1962_v60  ;;  %v9355_v37 = vunpack.i.h.bf16 %v6783_v18  ;;  %v7050_v18 = vld [vmem:[%s9051_s3 + $0x38] sm:$0xff] }
 0x365   :  { %2092 = vmatmul.f32.gmra.mxu2 %v7017_v44  ;;  %4653 = vmatmul.msk.f32.gmra.mxu1 %vm2027_vm3, %v7022_v57 }
 0x366   :  { %2533 = vmatpush.msra.mxu3 %v1998_v27  ;;  %v1958_v16 = vmax.f32 %v9357_v52, %v9355_v37  ;;  %2191 = vmatpush.msra.mxu2 %v1960_v43  ;;  %v9361_v27 = vld [vmem:[#allocation36_spill] sm:$0xff]  ;;  %v4701_v37 = vld [vmem:[%s9053_s5 + $0x1e0] sm:$0xff] }
 0x367   :  { %2381 = vmatmul.f32.gmra.mxu0 %v7033_v24  ;;  %v9362_v7 = vmax.f32 %v9361_v27, 0.0  ;;  %v4697_v52 = vld [vmem:[%s9053_s5 + $0x1c0] sm:$0xff] }
 0x368   :  { %2534 = vmatpush.msra.mxu3 %v1996_v19  ;;  %2192 = vmatpush.msra.mxu2 %v1958_v16  ;;  %v7064_v19 = vld [vmem:[%s9052_s4 + $0x38] sm:$0xff]  ;;  %v4689_v27 = vld [vmem:[%s9053_s5 + $0x180] sm:$0xff] }
 0x369   :  { %v1954_v10 = vmax.f32 %v9362_v7, %v5045_v56  ;;  %v7083_v56 = vld [vmem:[%s9051_s3 + $0x48] sm:$0xff]  ;;  %2803 = vmatpush.msra.mxu0 %v4701_v37  ;;  %v4685_v7 = vld [vmem:[%s9053_s5 + $0x160] sm:$0xff] }
 0x36a   :  { %2535 = vmatpush.msra.mxu3 %v1994_v32  ;;  %2193 = vmatpush.msra.mxu2 %v1956_v45  ;;  %v7143_v32 = vld [vmem:[%s9051_s3 + $0x68] sm:$0xff] }
 0x36b   :  { %4628 = vmatmul.msk.f32.gmra.mxu3 %vm2027_vm3, %v7050_v18  ;;  %2804 = vmatpush.msra.mxu0 %v4699_v40 }
 0x36c   :  { %2536 = vmatpush.msra.mxu3 %v1992_v21  ;;  %2194 = vmatpush.msra.mxu2 %v1954_v10  ;;  %v7153_v21 = vld [vmem:[%s9052_s4 + $0x68] sm:$0xff] }
 0x36d   :  { %2095 = vmatmul.f32.gmra.mxu2 %v7059_v8  ;;  %4654 = vmatmul.msk.f32.gmra.mxu1 %vm2027_vm3, %v7064_v19 }
 0x36e   :  { %2468 = vmatpush.msrb.mxu2 %v6840_v31  ;;  %2537 = vmatpush.msra.mxu3 %v1990_v17  ;;  %v7089_v31 = vld [vmem:[%s9051_s3 + $0x50] sm:$0xff]  ;;  %v7174_v17 = vld [vmem:[%s9051_s3 + $0x80] sm:$0xff] }
 0x36f   :  { %2384 = vmatmul.f32.gmra.mxu0 %v7072_v30 }
 0x370   :  { %2469 = vmatpush.msrb.mxu2 %v6851_v26  ;;  %2538 = vmatpush.msra.mxu3 %v1988_v58  ;;  %v7094_v26 = vld [vmem:[%s9052_s4 + $0x48] sm:$0xff]  ;;  %v7212_v58 = vld [vmem:[%s9052_s4 + $0x90] sm:$0xff] }
 0x371   :  { %2805 = vmatpush.msra.mxu0 %v4697_v52 }
 0x372   :  { %2470 = vmatpush.msrb.mxu2 %v6861_v34  ;;  %2539 = vmatpush.msra.mxu3 %v1986_v5  ;;  %v7102_v34 = vld [vmem:[%s9052_s4 + $0x50] sm:$0xff]  ;;  %v7257_v5 = vld [vmem:[%s9052_s4 + $0xa8] sm:$0xff] }
 0x373   :  { %4629 = vmatmul.msk.f32.gmra.mxu3 %vm2027_vm3, %v7083_v56  ;;  %2806 = vmatpush.msra.mxu0 %v4695_v0 }
 0x374   :  { %2471 = vmatpush.msrb.mxu2 %v6875_v23  ;;  %v7113_v23 = vld [vmem:[%s9051_s3 + $0x58] sm:$0xff] }
 0x375   :  { %2098 = vmatmul.f32.gmra.mxu2 %v7089_v31  ;;  %4655 = vmatmul.msk.f32.gmra.mxu1 %vm2027_vm3, %v7094_v26 }
 0x376   :  { %2472 = vmatpush.msrb.mxu2 %v6898_v2  ;;  %v7119_v2 = vld [vmem:[%s9051_s3 + $0x60] sm:$0xff]  ;;  %2807 = vmatpush.msra.mxu0 %v4693_v39 }
 0x377   :  { %2387 = vmatmul.f32.gmra.mxu0 %v7102_v34 }
 0x378   :  { %2473 = vmatpush.msrb.mxu2 %v6917_v41  ;;  %v7124_v41 = vld [vmem:[%s9052_s4 + $0x58] sm:$0xff] }
 0x37a   :  { %2474 = vmatpush.msrb.mxu2 %v6929_v51  ;;  %v7132_v51 = vld [vmem:[%s9052_s4 + $0x60] sm:$0xff] }
 0x37b   :  { %4630 = vmatmul.msk.f32.gmra.mxu3 %vm2027_vm3, %v7113_v23 }
 0x37c   :  { %2475 = vmatpush.msrb.mxu2 %v6945_v6  ;;  %v7148_v6 = vld [vmem:[%s9051_s3 + $0x70] sm:$0xff] }
 0x37d   :  { %2101 = vmatmul.f32.gmra.mxu2 %v7119_v2  ;;  %4656 = vmatmul.msk.f32.gmra.mxu1 %vm2027_vm3, %v7124_v41 }
 0x37e   :  { %2476 = vmatpush.msrb.mxu2 %v6968_v33  ;;  %v7160_v33 = vld [vmem:[%s9052_s4 + $0x70] sm:$0xff] }
 0x37f   :  { %2390 = vmatmul.f32.gmra.mxu0 %v7132_v51 }
 0x380   :  { %2477 = vmatpush.msrb.mxu2 %v6987_v25  ;;  %v7200_v25 = vld [vmem:[%s9051_s3 + $0x90] sm:$0xff] }
 0x382   :  { %2478 = vmatpush.msrb.mxu2 %v6997_v46  ;;  %v7238_v46 = vld [vmem:[%s9052_s4 + $0xa0] sm:$0xff] }
 0x383   :  { %4631 = vmatmul.msk.f32.gmra.mxu3 %vm2027_vm3, %v7143_v32 }
 0x384   :  { %2479 = vmatpush.msrb.mxu2 %v1962_v60  ;;  %v7279_v60 = vld [vmem:[%s9051_s3 + $0xb8] sm:$0xff] }
 0x385   :  { %2104 = vmatmul.f32.gmra.mxu2 %v7148_v6  ;;  %4657 = vmatmul.msk.f32.gmra.mxu1 %vm2027_vm3, %v7153_v21 }
 0x386   :  { %2480 = vmatpush.msrb.mxu2 %v1960_v43  ;;  %v7299_v43 = vld [vmem:[%s9052_s4 + $0xc0] sm:$0xff] }
 0x387   :  { %2393 = vmatmul.f32.gmra.mxu0 %v7160_v33 }
 0x388   :  { %2481 = vmatpush.msrb.mxu2 %v1958_v16  ;;  %v7317_v16 = vld [vmem:[%s9051_s3 + $0xc8] sm:$0xff] }
 0x38a   :  { %2482 = vmatpush.msrb.mxu2 %v1956_v45  ;;  %v4691_v45 = vld [vmem:[%s9053_s5 + $0x190] sm:$0xff] }
 0x38b   :  { %4632 = vmatmul.msk.f32.gmra.mxu3 %vm2027_vm3, %v7169_v29  ;;  %2808 = vmatpush.msra.mxu0 %v4691_v45 }
 0x38c   :  { %2483 = vmatpush.msrb.mxu2 %v1954_v10  ;;  %v4683_v10 = vld [vmem:[%s9053_s5 + $0x150] sm:$0xff] }
 0x38d   :  { %2107 = vmatmul.f32.gmra.mxu2 %v7174_v17  ;;  %4658 = vmatmul.msk.f32.gmra.mxu1 %vm2027_vm3, %v7179_v9 }
 0x38e   :  { %2809 = vmatpush.msra.mxu0 %v4689_v27 }
 0x38f   :  { %2396 = vmatmul.f32.gmra.mxu0 %v7186_v59 }
 0x393   :  { %4633 = vmatmul.msk.f32.gmra.mxu3 %vm2027_vm3, %v7195_v4 }
 0x395   :  { %2110 = vmatmul.f32.gmra.mxu2 %v7200_v25  ;;  %4659 = vmatmul.msk.f32.gmra.mxu1 %vm2027_vm3, %v7205_v49 }
 0x397   :  { %2399 = vmatmul.f32.gmra.mxu0 %v7212_v58 }
 0x39b   :  { %4634 = vmatmul.msk.f32.gmra.mxu3 %vm2027_vm3, %v7221_v50 }
 0x39d   :  { %2113 = vmatmul.f32.gmra.mxu2 %v7226_v48  ;;  %4660 = vmatmul.msk.f32.gmra.mxu1 %vm2027_vm3, %v7231_v14 }
 0x39f   :  { %2402 = vmatmul.f32.gmra.mxu0 %v7238_v46 }
 0x3a3   :  { %4635 = vmatmul.msk.f32.gmra.mxu3 %vm2027_vm3, %v7247_v13 }
 0x3a5   :  { %2116 = vmatmul.f32.gmra.mxu2 %v7252_v20  ;;  %4661 = vmatmul.msk.f32.gmra.mxu1 %vm2027_vm3, %v7257_v5 }
 0x3a7   :  { %2405 = vmatmul.f32.gmra.mxu0 %v7264_v12 }
 0x3ab   :  { %4636 = vmatmul.msk.f32.gmra.mxu3 %vm2027_vm3, %v7279_v60 }
 0x3ad   :  { %2119 = vmatmul.f32.gmra.mxu2 %v7284_v47  ;;  %4662 = vmatmul.msk.f32.gmra.mxu1 %vm2027_vm3, %v7289_v54 }
 0x3af   :  { %2408 = vmatmul.f32.gmra.mxu0 %v7299_v43 }
 0x3b3   :  { %4637 = vmatmul.msk.f32.gmra.mxu3 %vm2027_vm3, %v7317_v16 }
 0x3b5   :  { %2195 = vmatmul.f32.vlgmr.msra.gmra.mxu2 %v6827_v15  ;;  %4663 = vmatmul.msk.f32.gmra.mxu1 %vm2027_vm3, %v7322_v62  ;;  %v4687_v15 = vld [vmem:[%s9053_s5 + $0x170] sm:$0xff] }
 0x3b6   :  { %2810 = vmatpush.msra.mxu0 %v4687_v15 }
 0x3b8   :  { %2811 = vmatpush.msra.mxu0 %v4685_v7 }
 0x3ba   :  { %2812 = vmatpush.msra.mxu0 %v4683_v10 }
 0x3bb   :  { %4638 = vmatmul.msk.f32.vlgmr.msrb.gmra.mxu3 %vm2027_vm3, %v6869_v35  ;;  %v4681_v35 = vld [vmem:[%s9053_s5 + $0x140] sm:$0xff] }
 0x3bc   :  { %2813 = vmatpush.msra.mxu0 %v4681_v35 }
 0x3bd   :  { %2198 = vmatmul.f32.gmra.mxu2 %v6885_v42  ;;  %v4679_v42 = vld [vmem:[%s9053_s5 + $0x130] sm:$0xff] }
 0x3be   :  { %2814 = vmatpush.msra.mxu0 %v4679_v42 }
 0x3c0   :  { %2815 = vmatpush.msra.mxu0 %v4677_v53 }
 0x3c3   :  { %4639 = vmatmul.msk.f32.gmra.mxu3 %vm2027_vm3, %v6939_v11 }
 0x3c5   :  { %2201 = vmatmul.f32.gmra.mxu2 %v6955_v61 }
 0x3cb   :  { %v2373_v28 = vpop.f32.mrf.mxu0  ;;  %4640 = vmatmul.msk.f32.gmra.mxu3 %vm2027_vm3, %v7007_v1 }
 0x3cd   :  { %2204 = vmatmul.f32.gmra.mxu2 %v7017_v44 }
 0x3d0   :  { %v2084_v3 = vpop.f32.mrf.mxu2 }
 0x3d2   :  { %v2429_v11 = vpop.f32.mrf.mxu1 }
 0x3d3   :  { %4641 = vmatmul.msk.f32.gmra.mxu3 %vm2027_vm3, %v7050_v18  ;;  %v2430_v39 = vadd.f32 %v2429_v11, %v2373_v28 }
 0x3d4   :  { %v2376_v37 = vpop.f32.mrf.mxu0 }
 0x3d5   :  { %2207 = vmatmul.f32.gmra.mxu2 %v7059_v8 }
 0x3d6   :  { %v2140_v61 = vpop.f32.mrf.mxu3 }
 0x3d7   :  { %v2141_v0 = vadd.f32 %v2140_v61, %v2084_v3 }
 0x3d8   :  { %v2087_v40 = vpop.f32.mrf.mxu2 }
 0x3d9   :  { %v7374_v27 = vmax.f32 %v2141_v0, %v2430_v39 }
 0x3da   :  { %v2432_v52 = vpop.f32.mrf.mxu1 }
 0x3db   :  { %4642 = vmatmul.msk.f32.gmra.mxu3 %vm2027_vm3, %v7083_v56  ;;  %v2433_v1 = vadd.f32 %v2432_v52, %v2376_v37  ;;  %v2706_v10 = vrot.slane %v7374_v27, 1 }
 0x3dc   :  { %v2379_v45 = vpop.f32.mrf.mxu0 }
 0x3dd   :  { %2210 = vmatmul.f32.gmra.mxu2 %v7089_v31 }
 0x3de   :  { %v2143_v44 = vpop.f32.mrf.mxu3 }
 0x3df   :  { %v2144_v15 = vadd.f32 %v2143_v44, %v2087_v40 }
 0x3e0   :  { %v2090_v18 = vpop.f32.mrf.mxu2 }
 0x3e1   :  { %v7376_v7 = vmax.f32 %v2144_v15, %v2433_v1 }
 0x3e2   :  { %v2435_v8 = vpop.f32.mrf.mxu1 }
 0x3e3   :  { %v2707_v35 = vrot.slane %v7376_v7, 1  ;;  %4643 = vmatmul.msk.f32.gmra.mxu3 %vm2027_vm3, %v7113_v23  ;;  %v2436_v31 = vadd.f32 %v2435_v8, %v2379_v45 }
 0x3e4   :  { %v2382_v56 = vpop.f32.mrf.mxu0 }
 0x3e5   :  { %v7383_v42 = vsel %vm2705_vm4, %v2706_v10, %v2707_v35  ;;  %2213 = vmatmul.f32.gmra.mxu2 %v7119_v2 }
 0x3e6   :  { %2816 = vmatmul.f32.vlgmr.msra.gmra.mxu0 %v7383_v42  ;;  %v2146_v53 = vpop.f32.mrf.mxu3 }
 0x3e7   :  { %v2147_v28 = vadd.f32 %v2146_v53, %v2090_v18 }
 0x3e8   :  { %v2093_v3 = vpop.f32.mrf.mxu2 }
 0x3e9   :  { %v7387_v11 = vmax.f32 %v2147_v28, %v2436_v31 }
 0x3ea   :  { %v2438_v37 = vpop.f32.mrf.mxu1 }
 0x3eb   :  { %4644 = vmatmul.msk.f32.gmra.mxu3 %vm2027_vm3, %v7143_v32  ;;  %v2712_v23 = vrot.slane %v7387_v11, 1  ;;  %v2439_v40 = vadd.f32 %v2438_v37, %v2382_v56 }
 0x3ec   :  { %v2385_v61 = vpop.f32.mrf.mxu0 }
 0x3ed   :  { %2216 = vmatmul.f32.gmra.mxu2 %v7148_v6  ;;  %v7394_v2 = vsel %vm2705_vm4, %v2707_v35, %v2712_v23 }
 0x3ee   :  { %v2149_v52 = vpop.f32.mrf.mxu3  ;;  %2819 = vmatmul.f32.gmra.mxu0 %v7394_v2 }
 0x3ef   :  { %v2150_v0 = vadd.f32 %v2149_v52, %v2093_v3 }
 0x3f0   :  { %v2096_v39 = vpop.f32.mrf.mxu2 }
 0x3f1   :  { %v7397_v45 = vmax.f32 %v2150_v0, %v2439_v40 }
 0x3f2   :  { %v2441_v1 = vpop.f32.mrf.mxu1 }
 0x3f3   :  { %4645 = vmatmul.msk.f32.gmra.mxu3 %vm2027_vm3, %v7169_v29  ;;  %v2716_v32 = vrot.slane %v7397_v45, 1  ;;  %v2442_v6 = vadd.f32 %v2441_v1, %v2385_v61  ;;  %v2636_v1 = vld [vmem:[%s9053_s5 + $0xf0] sm:$0xff] }
 0x3f4   :  { %v2388_v44 = vpop.f32.mrf.mxu0  ;;  %3042 = vmatpush.msrb.mxu0 %v2636_v1 }
 0x3f5   :  { %2219 = vmatmul.f32.gmra.mxu2 %v7174_v17  ;;  %v7404_v15 = vsel %vm2705_vm4, %v2712_v23, %v2716_v32 }
 0x3f6   :  { %v2152_v18 = vpop.f32.mrf.mxu3  ;;  %2822 = vmatmul.f32.gmra.mxu0 %v7404_v15 }
 0x3f7   :  { %v2153_v8 = vadd.f32 %v2152_v18, %v2096_v39  ;;  %v2632_v18 = vld [vmem:[%s9053_s5 + $0xd0] sm:$0xff] }
 0x3f8   :  { %v2099_v10 = vpop.f32.mrf.mxu2 }
 0x3f9   :  { %v7407_v35 = vmax.f32 %v2153_v8, %v2442_v6 }
 0x3fa   :  { %v2444_v56 = vpop.f32.mrf.mxu1 }
 0x3fb   :  { %4646 = vmatmul.msk.f32.gmra.mxu3 %vm2027_vm3, %v7195_v4  ;;  %v2720_v29 = vrot.slane %v7407_v35, 1  ;;  %v2445_v17 = vadd.f32 %v2444_v56, %v2388_v44 }
 0x3fc   :  { %v2391_v31 = vpop.f32.mrf.mxu0 }
 0x3fd   :  { %2222 = vmatmul.f32.gmra.mxu2 %v7200_v25  ;;  %v7414_v53 = vsel %vm2705_vm4, %v2716_v32, %v2720_v29 }
 0x3fe   :  { %v2155_v28 = vpop.f32.mrf.mxu3  ;;  %2825 = vmatmul.f32.gmra.mxu0 %v7414_v53 }
 0x3ff   :  { %v2156_v3 = vadd.f32 %v2155_v28, %v2099_v10 }
 0x400   :  { %v2102_v37 = vpop.f32.mrf.mxu2 }
 0x401   :  { %v7417_v23 = vmax.f32 %v2156_v3, %v2445_v17  ;;  %v2628_v17 = vld [vmem:[%s9053_s5 + $0xb0] sm:$0xff] }
 0x402   :  { %v2447_v61 = vpop.f32.mrf.mxu1 }
 0x403   :  { %4647 = vmatmul.msk.f32.gmra.mxu3 %vm2027_vm3, %v7221_v50  ;;  %v2724_v4 = vrot.slane %v7417_v23, 1  ;;  %v2448_v25 = vadd.f32 %v2447_v61, %v2391_v31 }
 0x404   :  { %v2394_v40 = vpop.f32.mrf.mxu0 }
 0x405   :  { %2225 = vmatmul.f32.gmra.mxu2 %v7226_v48  ;;  %v7424_v52 = vsel %vm2705_vm4, %v2720_v29, %v2724_v4  ;;  %v2634_v48 = vld [vmem:[%s9053_s5 + $0xe0] sm:$0xff] }
 0x406   :  { %v2158_v0 = vpop.f32.mrf.mxu3  ;;  %2828 = vmatmul.f32.gmra.mxu0 %v7424_v52  ;;  %v2630_v29 = vld [vmem:[%s9053_s5 + $0xc0] sm:$0xff] }
 0x407   :  { %v2159_v39 = vadd.f32 %v2158_v0, %v2102_v37  ;;  %3043 = vmatpush.msrb.mxu0 %v2634_v48 }
 0x408   :  { %v2105_v32 = vpop.f32.mrf.mxu2 }
 0x409   :  { %v7430_v50 = vmax.f32 %v2159_v39, %v2448_v25  ;;  %3044 = vmatpush.msrb.mxu0 %v2632_v18  ;;  %v2622_v39 = vld [vmem:[%s9053_s5 + $0x80] sm:$0xff] }
 0x40a   :  { %v2450_v44 = vpop.f32.mrf.mxu1 }
 0x40b   :  { %4648 = vmatmul.msk.f32.gmra.mxu3 %vm2027_vm3, %v7247_v13  ;;  %v2728_v6 = vrot.slane %v7430_v50, 1  ;;  %v2451_v10 = vadd.f32 %v2450_v44, %v2394_v40  ;;  %3045 = vmatpush.msrb.mxu0 %v2630_v29  ;;  %v2618_v44 = vld [vmem:[%s9053_s5 + $0x60] sm:$0xff] }
 0x40c   :  { %v2397_v8 = vpop.f32.mrf.mxu0 }
 0x40d   :  { %2228 = vmatmul.f32.gmra.mxu2 %v7252_v20  ;;  %v7443_v56 = vsel %vm2705_vm4, %v2724_v4, %v2728_v6  ;;  %3046 = vmatpush.msrb.mxu0 %v2628_v17  ;;  %v2626_v20 = vld [vmem:[%s9053_s5 + $0xa0] sm:$0xff]  ;;  %v2624_v4 = vld [vmem:[%s9053_s5 + $0x90] sm:$0xff] }
 0x40e   :  { %v2161_v31 = vpop.f32.mrf.mxu3  ;;  %2831 = vmatmul.f32.gmra.mxu0 %v7443_v56 }
 0x40f   :  { %v2162_v13 = vadd.f32 %v2161_v31, %v2105_v32  ;;  %3047 = vmatpush.msrb.mxu0 %v2626_v20  ;;  %v2620_v32 = vld [vmem:[%s9053_s5 + $0x70] sm:$0xff]  ;;  %v2614_v31 = vld [vmem:[%s9053_s5 + $0x40] sm:$0xff] }
 0x410   :  { %v2108_v28 = vpop.f32.mrf.mxu2  ;;  %v2610_v20 = vld [vmem:[%s9053_s5 + $0x20] sm:$0xff] }
 0x411   :  { %v7452_v3 = vmax.f32 %v2162_v13, %v2451_v10  ;;  %3048 = vmatpush.msrb.mxu0 %v2624_v4 }
 0x412   :  { %v2453_v37 = vpop.f32.mrf.mxu1 }
 0x413   :  { %4649 = vmatmul.msk.f32.gmra.mxu3 %vm2027_vm3, %v7279_v60  ;;  %v2732_v61 = vrot.slane %v7452_v3, 1  ;;  %v2454_v25 = vadd.f32 %v2453_v37, %v2397_v8  ;;  %3049 = vmatpush.msrb.mxu0 %v2622_v39  ;;  %v2616_v8 = vld [vmem:[%s9053_s5 + $0x50] sm:$0xff] }
 0x414   :  { %v2400_v40 = vpop.f32.mrf.mxu0 }
 0x415   :  { %2231 = vmatmul.f32.gmra.mxu2 %v7284_v47  ;;  %v7465_v0 = vsel %vm2705_vm4, %v2728_v6, %v2732_v61  ;;  %3050 = vmatpush.msrb.mxu0 %v2620_v32 }
 0x416   :  { %v2164_v60 = vpop.f32.mrf.mxu3  ;;  %2834 = vmatmul.f32.gmra.mxu0 %v7465_v0 }
 0x417   :  { %v2165_v1 = vadd.f32 %v2164_v60, %v2108_v28  ;;  %3051 = vmatpush.msrb.mxu0 %v2618_v44  ;;  %v2612_v28 = vld [vmem:[%s9053_s5 + $0x30] sm:$0xff]  ;;  %v2606_v60 = vld [vmem:[%s9053_s5] sm:$0xff] }
 0x418   :  { %v2111_v48 = vpop.f32.mrf.mxu2 }
 0x419   :  { %v7474_v47 = vmax.f32 %v2165_v1, %v2454_v25  ;;  %3052 = vmatpush.msrb.mxu0 %v2616_v8 }
 0x41a   :  { %v2456_v6 = vpop.f32.mrf.mxu1 }
 0x41b   :  { %4650 = vmatmul.msk.f32.gmra.mxu3 %vm2027_vm3, %v7317_v16  ;;  %v2736_v18 = vrot.slane %v7474_v47, 1  ;;  %v2457_v10 = vadd.f32 %v2456_v6, %v2400_v40  ;;  %3053 = vmatpush.msrb.mxu0 %v2614_v31  ;;  %v2608_v40 = vld [vmem:[%s9053_s5 + $0x10] sm:$0xff] }
 0x41c   :  { %v2403_v16 = vpop.f32.mrf.mxu0 }
 0x41d   :  { %2484 = vmatmul.f32.vlgmr.msrb.gmra.mxu2 %v6834_v38  ;;  %v7487_v29 = vsel %vm2705_vm4, %v2732_v61, %v2736_v18  ;;  %3054 = vmatpush.msrb.mxu0 %v2612_v28 }
 0x41e   :  { %v2167_v13 = vpop.f32.mrf.mxu3  ;;  %2837 = vmatmul.f32.gmra.mxu0 %v7487_v29 }
 0x41f   :  { %v2168_v17 = vadd.f32 %v2167_v13, %v2111_v48  ;;  %3055 = vmatpush.msrb.mxu0 %v2610_v20 }
 0x420   :  { %v2114_v38 = vpop.f32.mrf.mxu2 }
 0x421   :  { %v7499_v37 = vmax.f32 %v2168_v17, %v2457_v10  ;;  %3056 = vmatpush.msrb.mxu0 %v2608_v40 }
 0x422   :  { %v2459_v61 = vpop.f32.mrf.mxu1 }
 0x423   :  { %4664 = vmatmul.msk.f32.vlgmr.msra.gmra.mxu3 %vm2027_vm3, %v6890_v55  ;;  %v2740_v4 = vrot.slane %v7499_v37, 1  ;;  %v2460_v25 = vadd.f32 %v2459_v61, %v2403_v16  ;;  %3057 = vmatpush.msrb.mxu0 %v2606_v60 }
 0x424   :  { %v2406_v48 = vpop.f32.mrf.mxu0 }
 0x425   :  { %2487 = vmatmul.f32.gmra.mxu2 %v6908_v22  ;;  %v7509_v39 = vsel %vm2705_vm4, %v2736_v18, %v2740_v4 }
 0x426   :  { %v2170_v1 = vpop.f32.mrf.mxu3  ;;  %2840 = vmatmul.f32.gmra.mxu0 %v7509_v39 }
 0x427   :  { %v2171_v55 = vadd.f32 %v2170_v1, %v2114_v38 }
 0x428   :  { %v2117_v32 = vpop.f32.mrf.mxu2 }
 0x429   :  { %v7515_v44 = vmax.f32 %v2171_v55, %v2460_v25 }
 0x42a   :  { %v2462_v6 = vpop.f32.mrf.mxu1 }
 0x42b   :  { %4665 = vmatmul.msk.f32.gmra.mxu3 %vm2027_vm3, %v6960_v63  ;;  %v2744_v22 = vrot.slane %v7515_v44, 1  ;;  %v2463_v18 = vadd.f32 %v2462_v6, %v2406_v48  ;;  %v4706_v48 = vld [vmem:[%s9053_s5 + $0x208] sm:$0xff] }
 0x42c   :  { %v2409_v17 = vpop.f32.mrf.mxu0 }
 0x42d   :  { %2490 = vmatmul.f32.gmra.mxu2 %v6978_v36  ;;  %v7522_v8 = vsel %vm2705_vm4, %v2740_v4, %v2744_v22 }
 0x42e   :  { %v2173_v10 = vpop.f32.mrf.mxu3  ;;  %2843 = vmatmul.f32.gmra.mxu0 %v7522_v8 }
 0x42f   :  { %v2174_v31 = vadd.f32 %v2173_v10, %v2117_v32  ;;  %v4694_v10 = vld [vmem:[%s9053_s5 + $0x1a8] sm:$0xff] }
 0x430   :  { %v2120_v13 = vpop.f32.mrf.mxu2 }
 0x431   :  { %v7525_v16 = vmax.f32 %v2174_v31, %v2463_v18 }
 0x432   :  { %v2465_v28 = vpop.f32.mrf.mxu1 }
 0x433   :  { %4666 = vmatmul.msk.f32.gmra.mxu3 %vm2027_vm3, %v7022_v57  ;;  %v2748_v63 = vrot.slane %v7525_v16, 1  ;;  %v2466_v36 = vadd.f32 %v2465_v28, %v2409_v17  ;;  %v4686_v28 = vld [vmem:[%s9053_s5 + $0x168] sm:$0xff] }
 0x435   :  { %2493 = vmatmul.f32.gmra.mxu2 %v7033_v24  ;;  %v7532_v38 = vsel %vm2705_vm4, %v2744_v22, %v2748_v63  ;;  %v4700_v22 = vld [vmem:[%s9053_s5 + $0x1d8] sm:$0xff] }
 0x436   :  { %v2176_v20 = vpop.f32.mrf.mxu3  ;;  %2846 = vmatmul.f32.gmra.mxu0 %v7532_v38 }
 0x437   :  { %v2177_v61 = vadd.f32 %v2176_v20, %v2120_v13  ;;  %v4692_v13 = vld [vmem:[%s9053_s5 + $0x198] sm:$0xff] }
 0x438   :  { %v2196_v4 = vpop.f32.mrf.mxu2 }
 0x439   :  { %v7535_v40 = vmax.f32 %v2177_v61, %v2466_v36  ;;  %v4684_v36 = vld [vmem:[%s9053_s5 + $0x158] sm:$0xff]  ;;  %v4678_v61 = vld [vmem:[%s9053_s5 + $0x128] sm:$0xff] }
 0x43b   :  { %v2752_v25 = vrot.slane %v7535_v40, 1  ;;  %4667 = vmatmul.msk.f32.gmra.mxu3 %vm2027_vm3, %v7064_v19  ;;  %v4708_v19 = vld [vmem:[%s9053_s5 + $0x218] sm:$0xff] }
 0x43c   :  { %2906 = vmatpush.msra.mxu2 %v4708_v19 }
 0x43d   :  { %2496 = vmatmul.f32.gmra.mxu2 %v7072_v30  ;;  %v7542_v57 = vsel %vm2705_vm4, %v2748_v63, %v2752_v25  ;;  %v4795_v25 = vld [vmem:[%s9053_s5 + $0x330] sm:$0xff] }
 0x43e   :  { %v2252_v24 = vpop.f32.mrf.mxu3  ;;  %2849 = vmatmul.f32.gmra.mxu0 %v7542_v57  ;;  %2907 = vmatpush.msra.mxu2 %v4706_v48  ;;  %v4785_v48 = vld [vmem:[%s9053_s5 + $0x2e0] sm:$0xff] }
 0x43f   :  { %v7545_v60 = vadd.f32 %v2252_v24, %v2196_v4  ;;  %3384 = vmatpush.msra.mxu0 %v4795_v25  ;;  %v4710_v25 = vld [vmem:[%s9053_s5 + $0x228] sm:$0xff] }
 0x440   :  { %v2199_v1 = vpop.f32.mrf.mxu2 }
 0x443   :  { %4668 = vmatmul.msk.f32.gmra.mxu3 %vm2027_vm3, %v7094_v26  ;;  %v4704_v26 = vld [vmem:[%s9053_s5 + $0x1f8] sm:$0xff] }
 0x444   :  { %2908 = vmatpush.msra.mxu2 %v4704_v26  ;;  %v4781_v26 = vld [vmem:[%s9053_s5 + $0x2c0] sm:$0xff] }
 0x445   :  { %2499 = vmatmul.f32.gmra.mxu2 %v7102_v34  ;;  %v4702_v34 = vld [vmem:[%s9053_s5 + $0x1e8] sm:$0xff] }
 0x446   :  { %v2255_v55 = vpop.f32.mrf.mxu3  ;;  %3058 = vmatmul.f32.vlgmr.msrb.gmra.mxu0 %v7374_v27  ;;  %2909 = vmatpush.msra.mxu2 %v4702_v34 }
 0x447   :  { %v7554_v30 = vadd.f32 %v2255_v55, %v2199_v1  ;;  %v4789_v1 = vld [vmem:[%s9053_s5 + $0x300] sm:$0xff] }
 0x448   :  { %v7556_v32 = vpop.f32.mrf.mxu2  ;;  %2910 = vmatpush.msra.mxu2 %v4700_v22 }
 0x44b   :  { %4669 = vmatmul.msk.f32.gmra.mxu3 %vm2027_vm3, %v7124_v41  ;;  %v4698_v41 = vld [vmem:[%s9053_s5 + $0x1c8] sm:$0xff] }
 0x44c   :  { %2911 = vmatpush.msra.mxu2 %v4698_v41  ;;  %v4775_v41 = vld [vmem:[%s9053_s5 + $0x290] sm:$0xff] }
 0x44d   :  { %2502 = vmatmul.f32.gmra.mxu2 %v7132_v51  ;;  %v4696_v51 = vld [vmem:[%s9053_s5 + $0x1b8] sm:$0xff] }
 0x44e   :  { %v7570_v6 = vpop.f32.mrf.mxu3  ;;  %3061 = vmatmul.f32.gmra.mxu0 %v7376_v7  ;;  %2912 = vmatpush.msra.mxu2 %v4696_v51  ;;  %v4773_v51 = vld [vmem:[%s9053_s5 + $0x280] sm:$0xff] }
 0x450   :  { %v7576_v18 = vpop.f32.mrf.mxu2  ;;  %2913 = vmatpush.msra.mxu2 %v4694_v10 }
 0x452   :  { %2914 = vmatpush.msra.mxu2 %v4692_v13 }
 0x453   :  { %4670 = vmatmul.msk.f32.gmra.mxu3 %vm2027_vm3, %v7153_v21  ;;  %v4690_v21 = vld [vmem:[%s9053_s5 + $0x188] sm:$0xff] }
 0x454   :  { %2915 = vmatpush.msra.mxu2 %v4690_v21  ;;  %v4767_v21 = vld [vmem:[%s9053_s5 + $0x250] sm:$0xff] }
 0x455   :  { %2505 = vmatmul.f32.gmra.mxu2 %v7160_v33  ;;  %v4688_v33 = vld [vmem:[%s9053_s5 + $0x178] sm:$0xff] }
 0x456   :  { %v7590_v31 = vpop.f32.mrf.mxu3  ;;  %3064 = vmatmul.f32.gmra.mxu0 %v7387_v11  ;;  %2916 = vmatpush.msra.mxu2 %v4688_v33  ;;  %v4765_v33 = vld [vmem:[%s9053_s5 + $0x240] sm:$0xff] }
 0x458   :  { %v7596_v17 = vpop.f32.mrf.mxu2  ;;  %2917 = vmatpush.msra.mxu2 %v4686_v28 }
 0x45a   :  { %2918 = vmatpush.msra.mxu2 %v4684_v36 }
 0x45b   :  { %4671 = vmatmul.msk.f32.gmra.mxu3 %vm2027_vm3, %v7179_v9  ;;  %v4682_v9 = vld [vmem:[%s9053_s5 + $0x148] sm:$0xff] }
 0x45c   :  { %2919 = vmatpush.msra.mxu2 %v4682_v9 }
 0x45d   :  { %2508 = vmatmul.f32.gmra.mxu2 %v7186_v59  ;;  %v4680_v59 = vld [vmem:[%s9053_s5 + $0x138] sm:$0xff] }
 0x45e   :  { %v7610_v63 = vpop.f32.mrf.mxu3  ;;  %3067 = vmatmul.f32.gmra.mxu0 %v7397_v45  ;;  %2920 = vmatpush.msra.mxu2 %v4680_v59  ;;  %v4711_v59 = vld [vmem:[%s9053_s5 + $0x230] sm:$0x3] }
 0x45f   :  { %4713 = vmatpush.msk.msra.mxu1 %vm2793_vm5, %v4711_v59 }
 0x460   :  { %v7616_v20 = vpop.f32.mrf.mxu2  ;;  %2921 = vmatpush.msra.mxu2 %v4678_v61  ;;  %v4712_v61 = vld [vmem:[%s9053_s5 + $0x238] sm:$0x3] }
 0x461   :  { %4726 = vmatpush.msk.msrb.mxu3 %vm2793_vm5, %v4712_v61  ;;  %v2629_v61 = vld [vmem:[%s9053_s5 + $0xb8] sm:$0xff] }
 0x463   :  { %4672 = vmatmul.msk.f32.gmra.mxu3 %vm2027_vm3, %v7205_v49  ;;  %v4793_v49 = vld [vmem:[%s9053_s5 + $0x320] sm:$0xff] }
 0x464   :  { %3385 = vmatpush.msra.mxu0 %v4793_v49  ;;  %2974 = vmatpush.msrb.mxu3 %v4710_v25 }
 0x465   :  { %2511 = vmatmul.f32.gmra.mxu2 %v7212_v58  ;;  %v4791_v58 = vld [vmem:[%s9053_s5 + $0x310] sm:$0xff] }
 0x466   :  { %v7630_v4 = vpop.f32.mrf.mxu3  ;;  %3070 = vmatmul.f32.gmra.mxu0 %v7407_v35 }
 0x467   :  { %3386 = vmatpush.msra.mxu0 %v4791_v58 }
 0x468   :  { %v7636_v24 = vpop.f32.mrf.mxu2 }
 0x469   :  { %3387 = vmatpush.msra.mxu0 %v4789_v1 }
 0x46b   :  { %4673 = vmatmul.msk.f32.gmra.mxu3 %vm2027_vm3, %v7231_v14  ;;  %v4787_v14 = vld [vmem:[%s9053_s5 + $0x2f0] sm:$0xff] }
 0x46c   :  { %3388 = vmatpush.msra.mxu0 %v4787_v14 }
 0x46d   :  { %2514 = vmatmul.f32.gmra.mxu2 %v7238_v46  ;;  %v4783_v46 = vld [vmem:[%s9053_s5 + $0x2d0] sm:$0xff] }
 0x46e   :  { %v7650_v55 = vpop.f32.mrf.mxu3  ;;  %3073 = vmatmul.f32.gmra.mxu0 %v7417_v23 }
 0x46f   :  { %3389 = vmatpush.msra.mxu0 %v4785_v48  ;;  %v3293_v48 = vrot.slane %v7376_v7, 2 }
 0x470   :  { %v7656_v19 = vpop.f32.mrf.mxu2 }
 0x471   :  { %3390 = vmatpush.msra.mxu0 %v4783_v46  ;;  %v3292_v46 = vrot.slane %v7374_v27, 2 }
 0x473   :  { %4674 = vmatmul.msk.f32.gmra.mxu3 %vm2027_vm3, %v7257_v5  ;;  %3391 = vmatpush.msra.mxu0 %v4781_v26  ;;  %v4779_v5 = vld [vmem:[%s9053_s5 + $0x2b0] sm:$0xff] }
 0x475   :  { %2517 = vmatmul.f32.gmra.mxu2 %v7264_v12  ;;  %v4777_v12 = vld [vmem:[%s9053_s5 + $0x2a0] sm:$0xff]  ;;  %3392 = vmatpush.msra.mxu0 %v4779_v5  ;;  %v7755_v5 = vsel %vm3291_vm6, %v3292_v46, %v3293_v48 }
 0x476   :  { %v7670_v34 = vpop.f32.mrf.mxu3  ;;  %3076 = vmatmul.f32.gmra.mxu0 %v7430_v50 }
 0x477   :  { %3393 = vmatpush.msra.mxu0 %v4777_v12 }
 0x478   :  { %v7676_v22 = vpop.f32.mrf.mxu2 }
 0x479   :  { %3394 = vmatpush.msra.mxu0 %v4775_v41 }
 0x47b   :  { %4675 = vmatmul.msk.f32.gmra.mxu3 %vm2027_vm3, %v7289_v54  ;;  %3395 = vmatpush.msra.mxu0 %v4773_v51  ;;  %v4771_v54 = vld [vmem:[%s9053_s5 + $0x270] sm:$0xff]  ;;  %v2635_v51 = vld [vmem:[%s9053_s5 + $0xe8] sm:$0xff] }
 0x47d   :  { %2520 = vmatmul.f32.gmra.mxu2 %v7299_v43  ;;  %v4769_v43 = vld [vmem:[%s9053_s5 + $0x260] sm:$0xff]  ;;  %3396 = vmatpush.msra.mxu0 %v4771_v54  ;;  %v3298_v54 = vrot.slane %v7387_v11, 2 }
 0x47e   :  { %v7690_v10 = vpop.f32.mrf.mxu3  ;;  %3079 = vmatmul.f32.gmra.mxu0 %v7452_v3 }
 0x47f   :  { %3397 = vmatpush.msra.mxu0 %v4769_v43 }
 0x480   :  { %v7696_v13 = vpop.f32.mrf.mxu2 }
 0x481   :  { %3398 = vmatpush.msra.mxu0 %v4767_v21  ;;  %v2631_v21 = vld [vmem:[%s9053_s5 + $0xc8] sm:$0xff] }
 0x483   :  { %4676 = vmatmul.msk.f32.gmra.mxu3 %vm2027_vm3, %v7322_v62  ;;  %3399 = vmatpush.msra.mxu0 %v4765_v33  ;;  %v7773_v33 = vsel %vm3291_vm6, %v3293_v48, %v3298_v54 }
 0x485   :  { %2922 = vmatmul.f32.vlgmr.msra.gmra.mxu2 %v7383_v42  ;;  %v7721_v42 = vpop.f32.mrf.mxu0 }
 0x486   :  { %v7710_v28 = vpop.f32.mrf.mxu3  ;;  %3082 = vmatmul.f32.gmra.mxu0 %v7474_v47 }
 0x488   :  { %v7713_v36 = vpop.f32.mrf.mxu2 }
 0x48d   :  { %2925 = vmatmul.f32.gmra.mxu2 %v7394_v2  ;;  %v4709_v2 = vld [vmem:[%s9053_s5 + $0x220] sm:$0xff]  ;;  %v7743_v1 = vpop.f32.mrf.mxu0 }
 0x48e   :  { %v7716_v62 = vpop.f32.mrf.mxu3  ;;  %3085 = vmatmul.f32.gmra.mxu0 %v7499_v37  ;;  %2868 = vmatpush.msra.mxu1 %v4709_v2 }
 0x490   :  { %v7719_v9 = vpop.f32.mrf.mxu2 }
 0x495   :  { %2928 = vmatmul.f32.gmra.mxu2 %v7404_v15  ;;  %v7751_v26 = vpop.f32.mrf.mxu0 }
 0x496   :  { %v7738_v49 = vpop.f32.mrf.mxu3  ;;  %3088 = vmatmul.f32.gmra.mxu0 %v7515_v44 }
 0x498   :  { %v7741_v58 = vpop.f32.mrf.mxu2 }
 0x49d   :  { %2931 = vmatmul.f32.gmra.mxu2 %v7414_v53  ;;  %v2637_v53 = vld [vmem:[%s9053_s5 + $0xf8] sm:$0xff]  ;;  %v7779_v2 = vpop.f32.mrf.mxu0 }
 0x49e   :  { %v7746_v14 = vpop.f32.mrf.mxu3  ;;  %3091 = vmatmul.f32.gmra.mxu0 %v7525_v16  ;;  %3148 = vmatpush.msrb.mxu2 %v2637_v53  ;;  %9363 = vst [vmem:[#allocation10_spill] sm:$0xff] %v7779_v2  ;;  %v3302_v53 = vrot.slane %v7397_v45, 2 }
 0x4a0   :  { %v2485_v15 = vpop.f32.mrf.mxu2  ;;  %3149 = vmatpush.msrb.mxu2 %v2635_v51  ;;  %v2623_v51 = vld [vmem:[%s9053_s5 + $0x88] sm:$0xff] }
 0x4a5   :  { %2934 = vmatmul.f32.gmra.mxu2 %v7424_v52  ;;  %v2633_v52 = vld [vmem:[%s9053_s5 + $0xd8] sm:$0xff] }
 0x4a6   :  { %v2541_v12 = vpop.f32.mrf.mxu3  ;;  %3400 = vmatmul.f32.vlgmr.msra.gmra.mxu0 %v7755_v5  ;;  %3150 = vmatpush.msrb.mxu2 %v2633_v52 }
 0x4a7   :  { %v2542_v43 = vadd.f32 %v2541_v12, %v2485_v15  ;;  %v2625_v12 = vld [vmem:[%s9053_s5 + $0x98] sm:$0xff] }
 0x4a8   :  { %v2488_v41 = vpop.f32.mrf.mxu2  ;;  %3151 = vmatpush.msrb.mxu2 %v2631_v21  ;;  %v2621_v21 = vld [vmem:[%s9053_s5 + $0x78] sm:$0xff] }
 0x4a9   :  { %v7782_v25 = vmax.f32 %v7545_v60, %v2542_v43  ;;  %v7804_v43 = vsel %vm3291_vm6, %v3298_v54, %v3302_v53 }
 0x4aa   :  { %3152 = vmatpush.msrb.mxu2 %v2629_v61 }
 0x4ab   :  { %v2709_v60 = vrot.slane %v7782_v25, 1 }
 0x4ad   :  { %2937 = vmatmul.f32.gmra.mxu2 %v7443_v56  ;;  %v2627_v56 = vld [vmem:[%s9053_s5 + $0xa8] sm:$0xff] }
 0x4ae   :  { %v2544_v59 = vpop.f32.mrf.mxu3  ;;  %3403 = vmatmul.f32.gmra.mxu0 %v7773_v33  ;;  %3153 = vmatpush.msrb.mxu2 %v2627_v56  ;;  %v7815_v56 = vpop.f32.mrf.mxu0 }
 0x4af   :  { %v2545_v15 = vadd.f32 %v2544_v59, %v2488_v41  ;;  %v2259_v59 = vadd.f32 %v7570_v6, %v7556_v32  ;;  %9364 = vst [vmem:[#allocation37_spill] sm:$0xff] %v7815_v56  ;;  %v2617_v32 = vld [vmem:[%s9053_s5 + $0x58] sm:$0xff] }
 0x4b0   :  { %v2491_v46 = vpop.f32.mrf.mxu2  ;;  %3154 = vmatpush.msrb.mxu2 %v2625_v12  ;;  %v3306_v12 = vrot.slane %v7407_v35, 2 }
 0x4b1   :  { %v7788_v48 = vmax.f32 %v7554_v30, %v2545_v15  ;;  %v2619_v15 = vld [vmem:[%s9053_s5 + $0x68] sm:$0xff] }
 0x4b2   :  { %3155 = vmatpush.msrb.mxu2 %v2623_v51  ;;  %v7829_v51 = vsel %vm3291_vm6, %v3302_v53, %v3306_v12  ;;  %v3310_v53 = vrot.slane %v7417_v23, 2 }
 0x4b3   :  { %v2710_v41 = vrot.slane %v7788_v48, 1 }
 0x4b4   :  { %3156 = vmatpush.msrb.mxu2 %v2621_v21 }
 0x4b5   :  { %2940 = vmatmul.f32.gmra.mxu2 %v7465_v0  ;;  %v2711_v30 = vsel %vm2705_vm4, %v2709_v60, %v2710_v41 }
 0x4b6   :  { %v2547_v52 = vpop.f32.mrf.mxu3  ;;  %4714 = vmatmul.msk.f32.vlgmr.msra.gmra.mxu1 %vm2768_vm7, %v2711_v30  ;;  %4727 = vmatmul.msk.f32.vlgmr.msrb.gmra.mxu3 %vm2768_vm7, %v2711_v30  ;;  %v2615_v30 = vld [vmem:[%s9053_s5 + $0x48] sm:$0xff] }
 0x4b7   :  { %v2548_v61 = vadd.f32 %v2547_v52, %v2491_v46  ;;  %3406 = vmatmul.f32.gmra.mxu0 %v7804_v43  ;;  %3157 = vmatpush.msrb.mxu2 %v2619_v15  ;;  %v2262_v52 = vadd.f32 %v7590_v31, %v7576_v18  ;;  %v2611_v18 = vld [vmem:[%s9053_s5 + $0x28] sm:$0xff] }
 0x4b8   :  { %v2494_v0 = vpop.f32.mrf.mxu2 }
 0x4b9   :  { %v7817_v54 = vmax.f32 %v2259_v59, %v2548_v61  ;;  %3158 = vmatpush.msrb.mxu2 %v2617_v32  ;;  %v7843_v61 = vpop.f32.mrf.mxu0  ;;  %v7854_v32 = vsel %vm3291_vm6, %v3306_v12, %v3310_v53  ;;  %v3314_v12 = vrot.slane %v7430_v50, 2 }
 0x4ba   :  { %9365 = vst [vmem:[#allocation70_spill] sm:$0xff] %v7843_v61 }
 0x4bb   :  { %v2714_v60 = vrot.slane %v7817_v54, 1  ;;  %3159 = vmatpush.msrb.mxu2 %v2615_v30 }
 0x4bd   :  { %2943 = vmatmul.f32.gmra.mxu2 %v7487_v29  ;;  %v2715_v6 = vsel %vm2705_vm4, %v2710_v41, %v2714_v60  ;;  %v2613_v41 = vld [vmem:[%s9053_s5 + $0x38] sm:$0xff] }
 0x4be   :  { %v2550_v46 = vpop.f32.mrf.mxu3  ;;  %4715 = vmatmul.msk.f32.gmra.mxu1 %vm2768_vm7, %v2715_v6  ;;  %4728 = vmatmul.msk.f32.gmra.mxu3 %vm2768_vm7, %v2715_v6  ;;  %v2609_v6 = vld [vmem:[%s9053_s5 + $0x18] sm:$0xff] }
 0x4bf   :  { %v2551_v21 = vadd.f32 %v2550_v46, %v2494_v0  ;;  %3409 = vmatmul.f32.gmra.mxu0 %v7829_v51  ;;  %3160 = vmatpush.msrb.mxu2 %v2613_v41  ;;  %v2265_v46 = vadd.f32 %v7610_v63, %v7596_v17 }
 0x4c0   :  { %v2497_v29 = vpop.f32.mrf.mxu2 }
 0x4c1   :  { %v7840_v59 = vmax.f32 %v2262_v52, %v2551_v21  ;;  %3161 = vmatpush.msrb.mxu2 %v2611_v18  ;;  %v7869_v41 = vpop.f32.mrf.mxu0  ;;  %v2268_v18 = vadd.f32 %v7630_v4, %v7616_v20  ;;  %v2271_v4 = vadd.f32 %v7650_v55, %v7636_v24  ;;  %v2274_v55 = vadd.f32 %v7670_v34, %v7656_v19 }
 0x4c2   :  { %v2277_v34 = vadd.f32 %v7690_v10, %v7676_v22  ;;  %v2280_v10 = vadd.f32 %v7710_v28, %v7696_v13  ;;  %v2638_v13 = vld [vmem:[%s9053_s5 + $0x100] sm:$0xff] }
 0x4c3   :  { %v2718_v15 = vrot.slane %v7840_v59, 1  ;;  %3162 = vmatpush.msrb.mxu2 %v2609_v6 }
 0x4c5   :  { %2946 = vmatmul.f32.gmra.mxu2 %v7509_v39  ;;  %v2719_v31 = vsel %vm2705_vm4, %v2714_v60, %v2718_v15  ;;  %v2607_v60 = vld [vmem:[%s9053_s5 + $0x8] sm:$0xff] }
 0x4c6   :  { %v2553_v0 = vpop.f32.mrf.mxu3  ;;  %4716 = vmatmul.msk.f32.gmra.mxu1 %vm2768_vm7, %v2719_v31  ;;  %4729 = vmatmul.msk.f32.gmra.mxu3 %vm2768_vm7, %v2719_v31 }
 0x4c7   :  { %v2554_v30 = vadd.f32 %v2553_v0, %v2497_v29  ;;  %3412 = vmatmul.f32.gmra.mxu0 %v7854_v32  ;;  %3163 = vmatpush.msrb.mxu2 %v2607_v60  ;;  %v7876_v29 = vsel %vm3291_vm6, %v3310_v53, %v3314_v12 }
 0x4c8   :  { %v2500_v39 = vpop.f32.mrf.mxu2 }
 0x4c9   :  { %v7865_v52 = vmax.f32 %v2265_v46, %v2554_v30  ;;  %v7894_v53 = vpop.f32.mrf.mxu0 }
 0x4cb   :  { %v2722_v21 = vrot.slane %v7865_v52, 1 }
 0x4cd   :  { %2949 = vmatmul.f32.gmra.mxu2 %v7522_v8  ;;  %v2723_v17 = vsel %vm2705_vm4, %v2718_v15, %v2722_v21  ;;  %v3318_v8 = vrot.slane %v7452_v3, 2 }
 0x4ce   :  { %v2556_v63 = vpop.f32.mrf.mxu3  ;;  %4717 = vmatmul.msk.f32.gmra.mxu1 %vm2768_vm7, %v2723_v17  ;;  %4730 = vmatmul.msk.f32.gmra.mxu3 %vm2768_vm7, %v2723_v17 }
 0x4cf   :  { %v2557_v31 = vadd.f32 %v2556_v63, %v2500_v39  ;;  %3415 = vmatmul.f32.gmra.mxu0 %v7876_v29  ;;  %v7890_v20 = vsel %vm3291_vm6, %v3314_v12, %v3318_v8 }
 0x4d0   :  { %v2503_v0 = vpop.f32.mrf.mxu2 }
 0x4d1   :  { %v7881_v6 = vmax.f32 %v2268_v18, %v2557_v31 }
 0x4d3   :  { %v2726_v15 = vrot.slane %v7881_v6, 1 }
 0x4d5   :  { %2952 = vmatmul.f32.gmra.mxu2 %v7532_v38  ;;  %v2727_v46 = vsel %vm2705_vm4, %v2722_v21, %v2726_v15  ;;  %v3322_v21 = vrot.slane %v7474_v47, 2 }
 0x4d6   :  { %v2559_v30 = vpop.f32.mrf.mxu3  ;;  %4718 = vmatmul.msk.f32.gmra.mxu1 %vm2768_vm7, %v2727_v46  ;;  %4731 = vmatmul.msk.f32.gmra.mxu3 %vm2768_vm7, %v2727_v46 }
 0x4d7   :  { %v2560_v39 = vadd.f32 %v2559_v30, %v2503_v0  ;;  %3418 = vmatmul.f32.gmra.mxu0 %v7890_v20  ;;  %v7906_v24 = vsel %vm3291_vm6, %v3318_v8, %v3322_v21  ;;  %v7911_v0 = vpop.f32.mrf.mxu0 }
 0x4d8   :  { %v2506_v60 = vpop.f32.mrf.mxu2  ;;  %9366 = vst [vmem:[#allocation11_spill] sm:$0xff] %v7911_v0 }
 0x4d9   :  { %v7897_v38 = vmax.f32 %v2271_v4, %v2560_v39 }
 0x4db   :  { %v2730_v17 = vrot.slane %v7897_v38, 1 }
 0x4dd   :  { %2955 = vmatmul.f32.gmra.mxu2 %v7542_v57  ;;  %v2731_v12 = vsel %vm2705_vm4, %v2726_v15, %v2730_v17  ;;  %v3326_v15 = vrot.slane %v7499_v37, 2 }
 0x4de   :  { %v2562_v63 = vpop.f32.mrf.mxu3  ;;  %4719 = vmatmul.msk.f32.gmra.mxu1 %vm2768_vm7, %v2731_v12  ;;  %4732 = vmatmul.msk.f32.gmra.mxu3 %vm2768_vm7, %v2731_v12 }
 0x4df   :  { %v2563_v18 = vadd.f32 %v2562_v63, %v2506_v60  ;;  %3421 = vmatmul.f32.gmra.mxu0 %v7906_v24  ;;  %v7922_v19 = vsel %vm3291_vm6, %v3322_v21, %v3326_v15 }
 0x4e0   :  { %v2509_v31 = vpop.f32.mrf.mxu2 }
 0x4e1   :  { %v7913_v57 = vmax.f32 %v2274_v55, %v2563_v18 }
 0x4e3   :  { %v2734_v46 = vrot.slane %v7913_v57, 1 }
 0x4e5   :  { %3164 = vmatmul.f32.vlgmr.msrb.gmra.mxu2 %v7374_v27  ;;  %v2735_v8 = vsel %vm2705_vm4, %v2730_v17, %v2734_v46  ;;  %v3330_v27 = vrot.slane %v7515_v44, 2  ;;  %v7930_v17 = vpop.f32.mrf.mxu0 }
 0x4e6   :  { %v2565_v30 = vpop.f32.mrf.mxu3  ;;  %4720 = vmatmul.msk.f32.gmra.mxu1 %vm2768_vm7, %v2735_v8  ;;  %4733 = vmatmul.msk.f32.gmra.mxu3 %vm2768_vm7, %v2735_v8  ;;  %v2640_v8 = vld [vmem:[%s9053_s5 + $0x110] sm:$0x3] }
 0x4e7   :  { %v2566_v4 = vadd.f32 %v2565_v30, %v2509_v31  ;;  %3424 = vmatmul.f32.gmra.mxu0 %v7922_v19  ;;  %v7938_v22 = vsel %vm3291_vm6, %v3326_v15, %v3330_v27  ;;  %v2641_v15 = vld [vmem:[%s9053_s5 + $0x118] sm:$0x3]  ;;  %4739 = vmatpush.msk.msrb.mxu1 %vm2793_vm5, %v2640_v8 }
 0x4e8   :  { %v2512_v39 = vpop.f32.mrf.mxu2  ;;  %4752 = vmatpush.msk.msra.mxu3 %vm2793_vm5, %v2641_v15 }
 0x4e9   :  { %v7927_v60 = vmax.f32 %v2277_v34, %v2566_v4  ;;  %v2639_v34 = vld [vmem:[%s9053_s5 + $0x108] sm:$0xff]  ;;  %3110 = vmatpush.msrb.mxu1 %v2638_v13 }
 0x4ea   :  { %3216 = vmatpush.msra.mxu3 %v2639_v34 }
 0x4eb   :  { %v2738_v12 = vrot.slane %v7927_v60, 1 }
 0x4ed   :  { %3167 = vmatmul.f32.gmra.mxu2 %v7376_v7  ;;  %v2739_v21 = vsel %vm2705_vm4, %v2734_v46, %v2738_v12  ;;  %v3334_v7 = vrot.slane %v7525_v16, 2  ;;  %v7958_v28 = vpop.f32.mrf.mxu0 }
 0x4ee   :  { %v2568_v63 = vpop.f32.mrf.mxu3  ;;  %4721 = vmatmul.msk.f32.gmra.mxu1 %vm2768_vm7, %v2739_v21  ;;  %4734 = vmatmul.msk.f32.gmra.mxu3 %vm2768_vm7, %v2739_v21  ;;  %v2283_v21 = vadd.f32 %v7716_v62, %v7713_v36  ;;  %v2286_v62 = vadd.f32 %v7738_v49, %v7719_v9  ;;  %v4796_v9 = vld [vmem:[%s9053_s5 + $0x338] sm:$0xff]  ;;  %v2289_v49 = vadd.f32 %v7746_v14, %v7741_v58  ;;  %v4790_v58 = vld [vmem:[%s9053_s5 + $0x308] sm:$0xff] }
 0x4ef   :  { %v2569_v55 = vadd.f32 %v2568_v63, %v2512_v39  ;;  %3427 = vmatmul.f32.gmra.mxu0 %v7938_v22  ;;  %v7968_v39 = vsel %vm3291_vm6, %v3330_v27, %v3334_v7  ;;  %3490 = vmatpush.msra.mxu2 %v4796_v9  ;;  %v4768_v9 = vld [vmem:[%s9053_s5 + $0x258] sm:$0xff] }
 0x4f0   :  { %v2515_v18 = vpop.f32.mrf.mxu2 }
 0x4f1   :  { %v7943_v31 = vmax.f32 %v2280_v10, %v2569_v55  ;;  %v3338_v10 = vrot.slane %v7535_v40, 2 }
 0x4f3   :  { %v2742_v46 = vrot.slane %v7943_v31, 1  ;;  %v7982_v36 = vsel %vm3291_vm6, %v3334_v7, %v3338_v10 }
 0x4f5   :  { %3170 = vmatmul.f32.gmra.mxu2 %v7387_v11  ;;  %v2743_v30 = vsel %vm2705_vm4, %v2738_v12, %v2742_v46 }
 0x4f6   :  { %v2571_v4 = vpop.f32.mrf.mxu3  ;;  %4722 = vmatmul.msk.f32.gmra.mxu1 %vm2768_vm7, %v2743_v30  ;;  %4735 = vmatmul.msk.f32.gmra.mxu3 %vm2768_vm7, %v2743_v30 }
 0x4f7   :  { %v2572_v63 = vadd.f32 %v2571_v4, %v2515_v18  ;;  %3430 = vmatmul.f32.gmra.mxu0 %v7968_v39  ;;  %v7986_v18 = vpop.f32.mrf.mxu0  ;;  %v4792_v4 = vld [vmem:[%s9053_s5 + $0x318] sm:$0xff] }
 0x4f8   :  { %v2518_v11 = vpop.f32.mrf.mxu2  ;;  %9367 = vst [vmem:[#allocation38_spill] sm:$0xff] %v7986_v18 }
 0x4f9   :  { %v7973_v12 = vmax.f32 %v2283_v21, %v2572_v63 }
 0x4fb   :  { %v2746_v55 = vrot.slane %v7973_v12, 1 }
 0x4fd   :  { %3173 = vmatmul.f32.gmra.mxu2 %v7397_v45  ;;  %v2747_v27 = vsel %vm2705_vm4, %v2742_v46, %v2746_v55 }
 0x4fe   :  { %v2574_v8 = vpop.f32.mrf.mxu3  ;;  %4723 = vmatmul.msk.f32.gmra.mxu1 %vm2768_vm7, %v2747_v27  ;;  %4736 = vmatmul.msk.f32.gmra.mxu3 %vm2768_vm7, %v2747_v27  ;;  %v4782_v27 = vld [vmem:[%s9053_s5 + $0x2c8] sm:$0xff] }
 0x4ff   :  { %v2575_v40 = vadd.f32 %v2574_v8, %v2518_v11  ;;  %3433 = vmatmul.f32.gmra.mxu0 %v7982_v36  ;;  %v4788_v11 = vld [vmem:[%s9053_s5 + $0x2f8] sm:$0xff] }
 0x500   :  { %v2521_v15 = vpop.f32.mrf.mxu2 }
 0x501   :  { %v7989_v45 = vmax.f32 %v2286_v62, %v2575_v40  ;;  %v4780_v62 = vld [vmem:[%s9053_s5 + $0x2b8] sm:$0xff] }
 0x502   :  { %v4776_v40 = vld [vmem:[%s9053_s5 + $0x298] sm:$0xff] }
 0x503   :  { %v2750_v46 = vrot.slane %v7989_v45, 1 }
 0x505   :  { %3176 = vmatmul.f32.gmra.mxu2 %v7407_v35  ;;  %v2751_v13 = vsel %vm2705_vm4, %v2746_v55, %v2750_v46  ;;  %v4794_v35 = vld [vmem:[%s9053_s5 + $0x328] sm:$0xff] }
 0x506   :  { %v2577_v30 = vpop.f32.mrf.mxu3  ;;  %4724 = vmatmul.msk.f32.gmra.mxu1 %vm2768_vm7, %v2751_v13  ;;  %4737 = vmatmul.msk.f32.gmra.mxu3 %vm2768_vm7, %v2751_v13  ;;  %v4786_v55 = vld [vmem:[%s9053_s5 + $0x2e8] sm:$0xff] }
 0x507   :  { %v2578_v7 = vadd.f32 %v2577_v30, %v2521_v15  ;;  %3491 = vmatpush.msra.mxu2 %v4794_v35  ;;  %v4770_v13 = vld [vmem:[%s9053_s5 + $0x268] sm:$0xff] }
 0x508   :  { %v2923_v34 = vpop.f32.mrf.mxu2 }
 0x509   :  { %v8007_v21 = vmax.f32 %v2289_v49, %v2578_v7  ;;  %3492 = vmatpush.msra.mxu2 %v4792_v4 }
 0x50b   :  { %v2754_v63 = vrot.slane %v8007_v21, 1  ;;  %3493 = vmatpush.msra.mxu2 %v4790_v58 }
 0x50d   :  { %3179 = vmatmul.f32.gmra.mxu2 %v7417_v23  ;;  %v2755_v14 = vsel %vm2705_vm4, %v2750_v46, %v2754_v63  ;;  %v4784_v23 = vld [vmem:[%s9053_s5 + $0x2d8] sm:$0xff]  ;;  %v4774_v46 = vld [vmem:[%s9053_s5 + $0x288] sm:$0xff] }
 0x50e   :  { %4725 = vmatmul.msk.f32.gmra.mxu1 %vm2768_vm7, %v2755_v14  ;;  %4738 = vmatmul.msk.f32.gmra.mxu3 %vm2768_vm7, %v2755_v14 }
 0x50f   :  { %3494 = vmatpush.msra.mxu2 %v4788_v11 }
 0x510   :  { %v2926_v10 = vpop.f32.mrf.mxu2 }
 0x511   :  { %3495 = vmatpush.msra.mxu2 %v4786_v55 }
 0x513   :  { %3496 = vmatpush.msra.mxu2 %v4784_v23 }
 0x515   :  { %3182 = vmatmul.f32.gmra.mxu2 %v7430_v50  ;;  %v4778_v50 = vld [vmem:[%s9053_s5 + $0x2a8] sm:$0xff] }
 0x516   :  { %4740 = vmatmul.msk.f32.vlgmr.msrb.gmra.mxu1 %vm2768_vm7, %v7782_v25  ;;  %4753 = vmatmul.msk.f32.vlgmr.msra.gmra.mxu3 %vm2768_vm7, %v7782_v25 }
 0x517   :  { %3497 = vmatpush.msra.mxu2 %v4782_v27 }
 0x518   :  { %v2929_v8 = vpop.f32.mrf.mxu2 }
 0x519   :  { %3498 = vmatpush.msra.mxu2 %v4780_v62 }
 0x51b   :  { %3499 = vmatpush.msra.mxu2 %v4778_v50  ;;  %v4797_v50 = vld [vmem:[%s9053_s5 + $0x340] sm:$0xff] }
 0x51d   :  { %3185 = vmatmul.f32.gmra.mxu2 %v7452_v3  ;;  %v4772_v3 = vld [vmem:[%s9053_s5 + $0x278] sm:$0xff] }
 0x51e   :  { %4741 = vmatmul.msk.f32.gmra.mxu1 %vm2768_vm7, %v7788_v48  ;;  %4754 = vmatmul.msk.f32.gmra.mxu3 %vm2768_vm7, %v7788_v48 }
 0x51f   :  { %3500 = vmatpush.msra.mxu2 %v4776_v40  ;;  %v4798_v40 = vld [vmem:[%s9053_s5 + $0x348] sm:$0xff] }
 0x520   :  { %v2932_v15 = vpop.f32.mrf.mxu2 }
 0x521   :  { %3501 = vmatpush.msra.mxu2 %v4774_v46 }
 0x523   :  { %3502 = vmatpush.msra.mxu2 %v4772_v3 }
 0x525   :  { %3188 = vmatmul.f32.gmra.mxu2 %v7474_v47  ;;  %v4766_v47 = vld [vmem:[%s9053_s5 + $0x248] sm:$0xff] }
 0x526   :  { %4742 = vmatmul.msk.f32.gmra.mxu1 %vm2768_vm7, %v7817_v54  ;;  %4755 = vmatmul.msk.f32.gmra.mxu3 %vm2768_vm7, %v7817_v54 }
 0x527   :  { %3503 = vmatpush.msra.mxu2 %v4770_v13 }
 0x528   :  { %v2935_v30 = vpop.f32.mrf.mxu2 }
 0x529   :  { %3504 = vmatpush.msra.mxu2 %v4768_v9 }
 0x52b   :  { %3505 = vmatpush.msra.mxu2 %v4766_v47 }
 0x52d   :  { %3191 = vmatmul.f32.gmra.mxu2 %v7499_v37 }
 0x52e   :  { %4743 = vmatmul.msk.f32.gmra.mxu1 %vm2768_vm7, %v7840_v59  ;;  %4756 = vmatmul.msk.f32.gmra.mxu3 %vm2768_vm7, %v7840_v59 }
 0x530   :  { %v2938_v49 = vpop.f32.mrf.mxu2 }
 0x533   :  { %v8073_v7 = vpop.f32.mrf.mxu1 }
 0x535   :  { %3194 = vmatmul.f32.gmra.mxu2 %v7515_v44 }
 0x536   :  { %4744 = vmatmul.msk.f32.gmra.mxu1 %vm2768_vm7, %v7865_v52  ;;  %4757 = vmatmul.msk.f32.gmra.mxu3 %vm2768_vm7, %v7865_v52 }
 0x538   :  { %v2941_v35 = vpop.f32.mrf.mxu2 }
 0x539   :  { %v2976_v37 = vpop.f32.mrf.mxu3 }
 0x53a   :  { %v8080_v4 = vadd.f32 %v2976_v37, %v2923_v34 }
 0x53b   :  { %v8082_v63 = vpop.f32.mrf.mxu1 }
 0x53d   :  { %3197 = vmatmul.f32.gmra.mxu2 %v7525_v16 }
 0x53e   :  { %4745 = vmatmul.msk.f32.gmra.mxu1 %vm2768_vm7, %v7881_v6  ;;  %4758 = vmatmul.msk.f32.gmra.mxu3 %vm2768_vm7, %v7881_v6 }
 0x540   :  { %v2944_v44 = vpop.f32.mrf.mxu2 }
 0x541   :  { %v2979_v58 = vpop.f32.mrf.mxu3 }
 0x542   :  { %v8089_v14 = vadd.f32 %v2979_v58, %v2926_v10 }
 0x543   :  { %v8091_v11 = vpop.f32.mrf.mxu1 }
 0x544   :  { %9368 = vst [vmem:[#allocation12_spill] sm:$0xff] %v8091_v11 }
 0x545   :  { %3506 = vmatmul.f32.vlgmr.msra.gmra.mxu2 %v7755_v5 }
 0x546   :  { %4746 = vmatmul.msk.f32.gmra.mxu1 %vm2768_vm7, %v7897_v38  ;;  %4759 = vmatmul.msk.f32.gmra.mxu3 %vm2768_vm7, %v7897_v38 }
 0x548   :  { %v2947_v16 = vpop.f32.mrf.mxu2 }
 0x549   :  { %v2982_v34 = vpop.f32.mrf.mxu3 }
 0x54a   :  { %v8098_v55 = vadd.f32 %v2982_v34, %v2929_v8  ;;  %v4799_v8 = vld [vmem:[%s9053_s5 + $0x350] sm:$0x3] }
 0x54b   :  { %v8100_v23 = vpop.f32.mrf.mxu1  ;;  %4801 = vmatpush.msk.msra.mxu1 %vm2793_vm5, %v4799_v8 }
 0x54c   :  { %9369 = vst [vmem:[#allocation39_spill] sm:$0xff] %v8100_v23 }
 0x54d   :  { %3509 = vmatmul.f32.gmra.mxu2 %v7773_v33  ;;  %v4800_v33 = vld [vmem:[%s9053_s5 + $0x358] sm:$0x3]  ;;  %3452 = vmatpush.msra.mxu1 %v4797_v50 }
 0x54e   :  { %4747 = vmatmul.msk.f32.gmra.mxu1 %vm2768_vm7, %v7913_v57  ;;  %4760 = vmatmul.msk.f32.gmra.mxu3 %vm2768_vm7, %v7913_v57 }
 0x54f   :  { %4814 = vmatpush.msk.msrb.mxu3 %vm2793_vm5, %v4800_v33 }
 0x550   :  { %v2950_v5 = vpop.f32.mrf.mxu2 }
 0x551   :  { %v2985_v10 = vpop.f32.mrf.mxu3  ;;  %3558 = vmatpush.msrb.mxu3 %v4798_v40 }
 0x552   :  { %v8107_v27 = vadd.f32 %v2985_v10, %v2932_v15 }
 0x553   :  { %v8109_v62 = vpop.f32.mrf.mxu1 }
 0x554   :  { %9370 = vst [vmem:[#allocation19_spill] sm:$0xff] %v8109_v62 }
 0x555   :  { %3512 = vmatmul.f32.gmra.mxu2 %v7804_v43 }
 0x556   :  { %4748 = vmatmul.msk.f32.gmra.mxu1 %vm2768_vm7, %v7927_v60  ;;  %4761 = vmatmul.msk.f32.gmra.mxu3 %vm2768_vm7, %v7927_v60 }
 0x558   :  { %v2953_v15 = vpop.f32.mrf.mxu2 }
 0x559   :  { %v2988_v46 = vpop.f32.mrf.mxu3 }
 0x55a   :  { %v8130_v3 = vadd.f32 %v2988_v46, %v2935_v30 }
 0x55b   :  { %v8132_v13 = vpop.f32.mrf.mxu1 }
 0x55c   :  { %9371 = vst [vmem:[#allocation48_spill] sm:$0xff] %v8132_v13 }
 0x55d   :  { %3515 = vmatmul.f32.gmra.mxu2 %v7829_v51  ;;  %v8148_v51 = vpop.f32.mrf.mxu0 }
 0x55e   :  { %4749 = vmatmul.msk.f32.gmra.mxu1 %vm2768_vm7, %v7943_v31  ;;  %4762 = vmatmul.msk.f32.gmra.mxu3 %vm2768_vm7, %v7943_v31 }
 0x560   :  { %v2956_v43 = vpop.f32.mrf.mxu2 }
 0x561   :  { %v2991_v9 = vpop.f32.mrf.mxu3 }
 0x562   :  { %v8139_v47 = vadd.f32 %v2991_v9, %v2938_v49  ;;  %v3296_v49 = vrot.slane %v7788_v48, 2  ;;  %v3300_v48 = vrot.slane %v7817_v54, 2 }
 0x563   :  { %v8141_v37 = vpop.f32.mrf.mxu1 }
 0x564   :  { %9372 = vst [vmem:[#allocation20_spill] sm:$0xff] %v8139_v47 }
 0x565   :  { %3518 = vmatmul.f32.gmra.mxu2 %v7854_v32  ;;  %v8164_v8 = vpop.f32.mrf.mxu0 }
 0x566   :  { %4750 = vmatmul.msk.f32.gmra.mxu1 %vm2768_vm7, %v7973_v12  ;;  %4763 = vmatmul.msk.f32.gmra.mxu3 %vm2768_vm7, %v7973_v12 }
 0x568   :  { %v8150_v30 = vpop.f32.mrf.mxu2 }
 0x569   :  { %v2994_v58 = vpop.f32.mrf.mxu3 }
 0x56a   :  { %v8152_v34 = vadd.f32 %v2994_v58, %v2941_v35  ;;  %v3295_v35 = vrot.slane %v7782_v25, 2  ;;  %v3301_v25 = vsel %vm3291_vm6, %v3296_v49, %v3300_v48 }
 0x56b   :  { %v8154_v10 = vpop.f32.mrf.mxu1 }
 0x56d   :  { %3521 = vmatmul.f32.gmra.mxu2 %v7876_v29  ;;  %v3297_v29 = vsel %vm3291_vm6, %v3295_v35, %v3296_v49  ;;  %v8176_v62 = vpop.f32.mrf.mxu0  ;;  %v3304_v35 = vrot.slane %v7840_v59, 2 }
 0x56e   :  { %4751 = vmatmul.msk.f32.gmra.mxu1 %vm2768_vm7, %v7989_v45  ;;  %4764 = vmatmul.msk.f32.gmra.mxu3 %vm2768_vm7, %v7989_v45  ;;  %9374 = vst [vmem:[#allocation21_spill] sm:$0xff] %v8176_v62 }
 0x570   :  { %v8161_v32 = vpop.f32.mrf.mxu2 }
 0x571   :  { %v2997_v33 = vpop.f32.mrf.mxu3 }
 0x572   :  { %v2998_v50 = vadd.f32 %v2997_v33, %v2944_v44 }
 0x573   :  { %v8167_v40 = vpop.f32.mrf.mxu1 }
 0x574   :  { %9373 = vst [vmem:[#allocation51_spill] sm:$0xff] %v8167_v40 }
 0x575   :  { %3524 = vmatmul.f32.gmra.mxu2 %v7890_v20 }
 0x576   :  { %4802 = vmatmul.msk.f32.vlgmr.msra.gmra.mxu1 %vm2768_vm7, %v3297_v29  ;;  %4815 = vmatmul.msk.f32.vlgmr.msrb.gmra.mxu3 %vm2768_vm7, %v3297_v29 }
 0x578   :  { %v8173_v46 = vpop.f32.mrf.mxu2 }
 0x579   :  { %v3000_v9 = vpop.f32.mrf.mxu3 }
 0x57a   :  { %v3001_v58 = vadd.f32 %v3000_v9, %v2947_v16  ;;  %v8189_v16 = vpop.f32.mrf.mxu0 }
 0x57b   :  { %v8178_v44 = vpop.f32.mrf.mxu1  ;;  %9375 = vst [vmem:[#allocation52_spill] sm:$0xff] %v8189_v16 }
 0x57d   :  { %3527 = vmatmul.f32.gmra.mxu2 %v7906_v24  ;;  %v3305_v24 = vsel %vm3291_vm6, %v3300_v48, %v3304_v35 }
 0x57e   :  { %4803 = vmatmul.msk.f32.gmra.mxu1 %vm2768_vm7, %v3301_v25  ;;  %4816 = vmatmul.msk.f32.gmra.mxu3 %vm2768_vm7, %v3301_v25  ;;  %v3308_v25 = vrot.slane %v7865_v52, 2 }
 0x580   :  { %v8184_v20 = vpop.f32.mrf.mxu2 }
 0x581   :  { %v3003_v33 = vpop.f32.mrf.mxu3 }
 0x582   :  { %v3004_v29 = vadd.f32 %v3003_v33, %v2950_v5  ;;  %v3309_v5 = vsel %vm3291_vm6, %v3304_v35, %v3308_v25 }
 0x583   :  { %v8187_v54 = vpop.f32.mrf.mxu1 }
 0x585   :  { %3530 = vmatmul.f32.gmra.mxu2 %v7922_v19  ;;  %v8204_v19 = vpop.f32.mrf.mxu0 }
 0x586   :  { %4804 = vmatmul.msk.f32.gmra.mxu1 %vm2768_vm7, %v3305_v24  ;;  %4817 = vmatmul.msk.f32.gmra.mxu3 %vm2768_vm7, %v3305_v24  ;;  %9377 = vst [vmem:[#allocation54_spill] sm:$0xff] %v8204_v19  ;;  %v3312_v24 = vrot.slane %v7881_v6, 2 }
 0x588   :  { %v8195_v49 = vpop.f32.mrf.mxu2 }
 0x589   :  { %v3006_v9 = vpop.f32.mrf.mxu3 }
 0x58a   :  { %v3007_v56 = vadd.f32 %v3006_v9, %v2953_v15 }
 0x58b   :  { %v8198_v59 = vpop.f32.mrf.mxu1 }
 0x58c   :  { %9376 = vst [vmem:[#allocation22_spill] sm:$0xff] %v8198_v59 }
 0x58d   :  { %3533 = vmatmul.f32.gmra.mxu2 %v7938_v22  ;;  %v3313_v22 = vsel %vm3291_vm6, %v3308_v25, %v3312_v24  ;;  %v8217_v35 = vpop.f32.mrf.mxu0 }
 0x58e   :  { %4805 = vmatmul.msk.f32.gmra.mxu1 %vm2768_vm7, %v3309_v5  ;;  %4818 = vmatmul.msk.f32.gmra.mxu3 %vm2768_vm7, %v3309_v5  ;;  %9379 = vst [vmem:[#allocation55_spill] sm:$0xff] %v8217_v35  ;;  %v3316_v5 = vrot.slane %v7897_v38, 2 }
 0x590   :  { %v8206_v48 = vpop.f32.mrf.mxu2 }
 0x591   :  { %9378 = vst [vmem:[#allocation23_spill] sm:$0xff] %v8206_v48  ;;  %v3009_v33 = vpop.f32.mrf.mxu3 }
 0x592   :  { %v3010_v13 = vadd.f32 %v3009_v33, %v2956_v43 }
 0x593   :  { %v8209_v52 = vpop.f32.mrf.mxu1 }
 0x595   :  { %3536 = vmatmul.f32.gmra.mxu2 %v7968_v39  ;;  %v3317_v39 = vsel %vm3291_vm6, %v3312_v24, %v3316_v5  ;;  %v8231_v19 = vpop.f32.mrf.mxu0 }
 0x596   :  { %4806 = vmatmul.msk.f32.gmra.mxu1 %vm2768_vm7, %v3313_v22  ;;  %4819 = vmatmul.msk.f32.gmra.mxu3 %vm2768_vm7, %v3313_v22  ;;  %v3320_v22 = vrot.slane %v7913_v57, 2 }
 0x598   :  { %v8215_v15 = vpop.f32.mrf.mxu2  ;;  %v3321_v38 = vsel %vm3291_vm6, %v3316_v5, %v3320_v22 }
 0x599   :  { %v8219_v9 = vpop.f32.mrf.mxu3 }
 0x59b   :  { %v8222_v6 = vpop.f32.mrf.mxu1 }
 0x59d   :  { %3539 = vmatmul.f32.gmra.mxu2 %v7982_v36 }
 0x59e   :  { %4807 = vmatmul.msk.f32.gmra.mxu1 %vm2768_vm7, %v3317_v39  ;;  %4820 = vmatmul.msk.f32.gmra.mxu3 %vm2768_vm7, %v3317_v39 }
 0x5a0   :  { %v3186_v43 = vpop.f32.mrf.mxu2 }
 0x5a1   :  { %v3187_v25 = vadd.f32 %v3186_v43, %v2998_v50  ;;  %v8228_v33 = vpop.f32.mrf.mxu3  ;;  %v3324_v50 = vrot.slane %v7927_v60, 2  ;;  %v8243_v43 = vpop.f32.mrf.mxu0 }
 0x5a3   :  { %v8233_v35 = vpop.f32.mrf.mxu1  ;;  %v3325_v57 = vsel %vm3291_vm6, %v3320_v22, %v3324_v50 }
 0x5a4   :  { %9380 = vst [vmem:[#allocation24_spill] sm:$0xff] %v8233_v35 }
 0x5a6   :  { %4808 = vmatmul.msk.f32.gmra.mxu1 %vm2768_vm7, %v3321_v38  ;;  %4821 = vmatmul.msk.f32.gmra.mxu3 %vm2768_vm7, %v3321_v38 }
 0x5a8   :  { %v3189_v36 = vpop.f32.mrf.mxu2 }
 0x5a9   :  { %v3190_v24 = vadd.f32 %v3189_v36, %v3001_v58  ;;  %v8238_v61 = vpop.f32.mrf.mxu3  ;;  %v3328_v58 = vrot.slane %v7943_v31, 2  ;;  %v8256_v36 = vpop.f32.mrf.mxu0 }
 0x5aa   :  { %9383 = vst [vmem:[#allocation47_spill] sm:$0xff] %v8256_v36 }
 0x5ab   :  { %v8241_v39 = vpop.f32.mrf.mxu1  ;;  %v3329_v60 = vsel %vm3291_vm6, %v3324_v50, %v3328_v58 }
 0x5ac   :  { %9381 = vst [vmem:[#allocation58_spill] sm:$0xff] %v8241_v39 }
 0x5ae   :  { %4809 = vmatmul.msk.f32.gmra.mxu1 %vm2768_vm7, %v3325_v57  ;;  %4822 = vmatmul.msk.f32.gmra.mxu3 %vm2768_vm7, %v3325_v57 }
 0x5b0   :  { %v3192_v5 = vpop.f32.mrf.mxu2 }
 0x5b1   :  { %v3193_v35 = vadd.f32 %v3192_v5, %v3004_v29  ;;  %v8248_v40 = vpop.f32.mrf.mxu3  ;;  %v3332_v29 = vrot.slane %v7973_v12, 2  ;;  %v8266_v5 = vpop.f32.mrf.mxu0 }
 0x5b3   :  { %v8251_v38 = vpop.f32.mrf.mxu1  ;;  %v3333_v31 = vsel %vm3291_vm6, %v3328_v58, %v3332_v29  ;;  %v3340_v58 = vrot.slane %v8007_v21, 2 }
 0x5b4   :  { %9382 = vst [vmem:[#allocation18_spill] sm:$0xff] %v8251_v38 }
 0x5b6   :  { %4810 = vmatmul.msk.f32.gmra.mxu1 %vm2768_vm7, %v3329_v60  ;;  %4823 = vmatmul.msk.f32.gmra.mxu3 %vm2768_vm7, %v3329_v60 }
 0x5b8   :  { %v3195_v22 = vpop.f32.mrf.mxu2 }
 0x5b9   :  { %v3196_v0 = vadd.f32 %v3195_v22, %v3007_v56  ;;  %v8258_v39 = vpop.f32.mrf.mxu3  ;;  %v3336_v56 = vrot.slane %v7989_v45, 2 }
 0x5bb   :  { %v8261_v57 = vpop.f32.mrf.mxu1  ;;  %v3337_v12 = vsel %vm3291_vm6, %v3332_v29, %v3336_v56 }
 0x5bc   :  { %9384 = vst [vmem:[#allocation17_spill] sm:$0xff] %v8261_v57 }
 0x5be   :  { %4811 = vmatmul.msk.f32.gmra.mxu1 %vm2768_vm7, %v3333_v31  ;;  %4824 = vmatmul.msk.f32.gmra.mxu3 %vm2768_vm7, %v3333_v31  ;;  %v8279_v31 = vpop.f32.mrf.mxu0 }
 0x5c0   :  { %v3198_v50 = vpop.f32.mrf.mxu2 }
 0x5c1   :  { %v3199_v60 = vadd.f32 %v3198_v50, %v3010_v13  ;;  %v8268_v38 = vpop.f32.mrf.mxu3  ;;  %v3341_v13 = vsel %vm3291_vm6, %v3336_v56, %v3340_v58 }
 0x5c2   :  { %9385 = vst [vmem:[#allocation44_spill] sm:$0xff] %v8268_v38 }
 0x5c3   :  { %v8271_v22 = vpop.f32.mrf.mxu1 }
 0x5c6   :  { %4812 = vmatmul.msk.f32.gmra.mxu1 %vm2768_vm7, %v3337_v12  ;;  %4825 = vmatmul.msk.f32.gmra.mxu3 %vm2768_vm7, %v3337_v12  ;;  %v8290_v12 = vpop.f32.mrf.mxu0 }
 0x5c7   :  { %9388 = vst [vmem:[#allocation27_spill] sm:$0xff] %v8290_v12 }
 0x5c8   :  { %v3507_v58 = vpop.f32.mrf.mxu2 }
 0x5c9   :  { %v8277_v57 = vpop.f32.mrf.mxu3 }
 0x5cb   :  { %v8281_v36 = vpop.f32.mrf.mxu1 }
 0x5cc   :  { %9386 = vst [vmem:[#allocation25_spill] sm:$0xff] %v8281_v36 }
 0x5ce   :  { %4813 = vmatmul.msk.f32.gmra.mxu1 %vm2768_vm7, %v3341_v13  ;;  %4826 = vmatmul.msk.f32.gmra.mxu3 %vm2768_vm7, %v3341_v13  ;;  %v8296_v47 = vpop.f32.mrf.mxu0 }
 0x5d0   :  { %v3510_v12 = vpop.f32.mrf.mxu2 }
 0x5d1   :  { %v3239_v45 = vpop.f32.mrf.mxu3 }
 0x5d2   :  { %v8286_v29 = vadd.f32 %v3239_v45, %v3187_v25 }
 0x5d3   :  { %v8288_v50 = vpop.f32.mrf.mxu1 }
 0x5d4   :  { %9387 = vst [vmem:[#allocation59_spill] sm:$0xff] %v8288_v50 }
 0x5d6   :  { %v8302_v13 = vpop.f32.mrf.mxu0 }
 0x5d9   :  { %v3242_v21 = vpop.f32.mrf.mxu3 }
 0x5da   :  { %v8292_v38 = vadd.f32 %v3242_v21, %v3190_v24 }
 0x5db   :  { %v8294_v48 = vpop.f32.mrf.mxu1 }
 0x5de   :  { %v8310_v59 = vpop.f32.mrf.mxu0 }
 0x5df   :  { %9392 = vst [vmem:[#allocation2_spill] sm:$0xff] %v8310_v59 }
 0x5e1   :  { %v3245_v16 = vpop.f32.mrf.mxu3 }
 0x5e2   :  { %v8298_v56 = vadd.f32 %v3245_v16, %v3193_v35  ;;  %v3513_v16 = vpop.f32.mrf.mxu2  ;;  %v3166_v35 = vadd.f32 %v8150_v30, %v8080_v4 }
 0x5e3   :  { %v8300_v62 = vpop.f32.mrf.mxu1 }
 0x5e4   :  { %v3219_v23 = vadd.f32 %v8219_v9, %v3166_v35 }
 0x5e9   :  { %v3248_v25 = vpop.f32.mrf.mxu3 }
 0x5ea   :  { %v8304_v45 = vadd.f32 %v3248_v25, %v3196_v0 }
 0x5eb   :  { %v8306_v50 = vpop.f32.mrf.mxu1 }
 0x5ec   :  { %9389 = vst [vmem:[#allocation61_spill] sm:$0xff] %v8304_v45 }
 0x5ed   :  { %9390 = vst [vmem:[#allocation6_spill] sm:$0xff] %v8306_v50  ;;  %v8321_v50 = vpop.f32.mrf.mxu0 }
 0x5ee   :  { %9393 = vst [vmem:[#allocation35_spill] sm:$0xff] %v8321_v50 }
 0x5f1   :  { %v3251_v24 = vpop.f32.mrf.mxu3 }
 0x5f2   :  { %v8308_v21 = vadd.f32 %v3251_v24, %v3199_v60  ;;  %v3169_v60 = vadd.f32 %v8161_v32, %v8089_v14  ;;  %v3516_v24 = vpop.f32.mrf.mxu2 }
 0x5f3   :  { %v8312_v18 = vpop.f32.mrf.mxu1 }
 0x5f4   :  { %9391 = vst [vmem:[#allocation31_spill] sm:$0xff] %v8308_v21  ;;  %v3222_v59 = vadd.f32 %v8228_v33, %v3169_v60 }
 0x5f5   :  { %v8330_v30 = vpop.f32.mrf.mxu0 }
 0x5f6   :  { %9396 = vst [vmem:[#allocation5_spill] sm:$0xff] %v8330_v30 }
 0x5f9   :  { %v3560_v36 = vpop.f32.mrf.mxu3 }
 0x5fa   :  { %v3561_v2 = vadd.f32 %v3560_v36, %v3507_v58  ;;  %v8335_v58 = vpop.f32.mrf.mxu2 }
 0x5fb   :  { %v8317_v0 = vpop.f32.mrf.mxu1 }
 0x5fc   :  { %v8319_v25 = vadd.f32 %v3561_v2, %v3219_v23  ;;  %v3172_v2 = vadd.f32 %v8173_v46, %v8098_v55 }
 0x5fd   :  { %v8341_v33 = vpop.f32.mrf.mxu0 }
 0x5fe   :  { %v3225_v9 = vadd.f32 %v8238_v61, %v3172_v2  ;;  %9399 = vst [vmem:[#allocation62_spill] sm:$0xff] %v8341_v33 }
 0x601   :  { %v3563_v21 = vpop.f32.mrf.mxu3 }
 0x602   :  { %v3564_v45 = vadd.f32 %v3563_v21, %v3510_v12 }
 0x603   :  { %v8326_v11 = vpop.f32.mrf.mxu1 }
 0x604   :  { %9394 = vst [vmem:[#allocation4_spill] sm:$0xff] %v8326_v11  ;;  %v8328_v4 = vadd.f32 %v3564_v45, %v3222_v59  ;;  %v8345_v45 = vpop.f32.mrf.mxu2 }
 0x605   :  { %9401 = vst [vmem:[#allocation26_spill] sm:$0xff] %v8345_v45  ;;  %v3419_v55 = vpop.f32.mrf.mxu0 }
 0x606   :  { %9395 = vst [vmem:[#allocation28_spill] sm:$0xff] %v8328_v4 }
 0x609   :  { %v3566_v23 = vpop.f32.mrf.mxu3 }
 0x60a   :  { %v3567_v36 = vadd.f32 %v3566_v23, %v3513_v16 }
 0x60b   :  { %v8337_v14 = vpop.f32.mrf.mxu1 }
 0x60c   :  { %9397 = vst [vmem:[#allocation29_spill] sm:$0xff] %v8337_v14  ;;  %v8339_v32 = vadd.f32 %v3567_v36, %v3225_v9  ;;  %v3525_v61 = vpop.f32.mrf.mxu2  ;;  %v3184_v36 = vadd.f32 %v8215_v15, %v8152_v34  ;;  %v2898_v15 = vadd.f32 %v8178_v44, %v7930_v17 }
 0x60d   :  { %v8353_v60 = vpop.f32.mrf.mxu0 }
 0x60e   :  { %9398 = vst [vmem:[#allocation50_spill] sm:$0xff] %v8339_v32  ;;  %v3237_v30 = vadd.f32 %v8277_v57, %v3184_v36  ;;  %v3175_v57 = vadd.f32 %v8184_v20, %v8107_v27  ;;  %v3087_v17 = vadd.f32 %v8266_v5, %v2898_v15  ;;  %v2874_v5 = vadd.f32 %v8082_v63, %v7743_v1 }
 0x60f   :  { %v2871_v1 = vadd.f32 %v8073_v7, %v7721_v42 }
 0x611   :  { %v3569_v12 = vpop.f32.mrf.mxu3 }
 0x613   :  { %v8343_v59 = vpop.f32.mrf.mxu1 }
 0x614   :  { %9400 = vst [vmem:[#allocation3_spill] sm:$0xff] %v8343_v59  ;;  %v3528_v2 = vpop.f32.mrf.mxu2 }
 0x615   :  { %v8360_v32 = vpop.f32.mrf.mxu0 }
 0x619   :  { %v8347_v21 = vpop.f32.mrf.mxu3 }
 0x61a   :  { %v3573_v42 = vadd.f32 %v8347_v21, %v8335_v58  ;;  %v3455_v21 = vadd.f32 %v8312_v18, %v8296_v47 }
 0x61b   :  { %v8349_v46 = vpop.f32.mrf.mxu1 }
 0x61c   :  { %9402 = vst [vmem:[#allocation46_spill] sm:$0xff] %v8349_v46  ;;  %v3620_v46 = vld [vmem:[%s9054_s6] sm:$0x3]  ;;  %v3531_v11 = vpop.f32.mrf.mxu2  ;;  %s5114_s6 = smov 112  }
 0x61d   :  { %v8365_v45 = vperm.slane %v3620_v46, 1  ;;  %v8398_v15 = vperm.slane %v3620_v46, 0 }
 0x621   :  { %v8351_v16 = vpop.f32.mrf.mxu3 }
 0x622   :  { %9403 = vst [vmem:[#allocation49_spill] sm:$0xff] %v8351_v16 }
 0x623   :  { %v3472_v35 = vpop.f32.mrf.mxu1 }
 0x629   :  { %v3578_v23 = vpop.f32.mrf.mxu3 }
 0x62a   :  { %v3579_v59 = vadd.f32 %v3578_v23, %v3525_v61  ;;  %v2889_v61 = vadd.f32 %v8141_v37, %v7869_v41  ;;  %v3140_v37 = vadd.f32 %v8294_v48, %v3087_v17  ;;  %v2901_v23 = vadd.f32 %v8187_v54, %v7958_v28 }
 0x62b   :  { %v8355_v9 = vpop.f32.mrf.mxu1  ;;  %v3063_v28 = vadd.f32 %v8164_v8, %v2874_v5 }
 0x62c   :  { %v3609_v33 = vadd.f32 %v3579_v59, %v3237_v30  ;;  %v3570_v30 = vadd.f32 %v3569_v12, %v3516_v24  ;;  %v3078_v20 = vadd.f32 %v8231_v19, %v2889_v61  ;;  %v3473_v24 = vadd.f32 %v3472_v35, %v3419_v55 }
 0x62d   :  { %v3090_v63 = vadd.f32 %v8279_v31, %v2901_v23  ;;  %v3116_v58 = vadd.f32 %v8222_v6, %v3063_v28 }
 0x62e   :  { %v8370_v50 = vadd.f32 %v8365_v45, %v3609_v33  ;;  %v3131_v36 = vadd.f32 %v8271_v22, %v3078_v20  ;;  %v3178_v22 = vadd.f32 %v8195_v49, %v8130_v3 }
 0x62f   :  { %v3143_v61 = vadd.f32 %v8300_v62, %v3090_v63 }
 0x630   :  { %v3663_v33 = vmax.f32 %v8370_v50, 0.0 }
 0x631   :  { %v3581_v16 = vpop.f32.mrf.mxu3 }
 0x632   :  { %v3582_v4 = vadd.f32 %v3581_v16, %v3528_v2  ;;  %v3228_v16 = vadd.f32 %v8248_v40, %v3175_v57 }
 0x633   :  { %v8367_v14 = vpop.f32.mrf.mxu1 }
 0x634   :  { %v3611_v34 = vadd.f32 %v3582_v4, %v8286_v29  ;;  %v3428_v29 = vpop.f32.mrf.mxu0  ;;  %v3603_v44 = vadd.f32 %v3570_v30, %v3228_v16  ;;  %v3458_v16 = vadd.f32 %v8317_v0, %v8302_v13  ;;  %v2892_v13 = vadd.f32 %v8154_v10, %v7894_v53 }
 0x635   :  { %v3060_v0 = vadd.f32 %v8148_v51, %v2871_v1 }
 0x636   :  { %v8378_v59 = vadd.f32 %v8365_v45, %v3611_v34  ;;  %v3534_v34 = vpop.f32.mrf.mxu2  ;;  %v8401_v19 = vadd.f32 %v8365_v45, %v3603_v44  ;;  %v3598_v51 = vadd.f32 %v3458_v16, %v3116_v58  ;;  %v9411_v16 = vld [vmem:[#allocation52_spill] sm:$0xff]  ;;  %v9415_v58 = vld [vmem:[#allocation27_spill] sm:$0xff] }
 0x637   :  { %v3113_v53 = vadd.f32 %v8209_v52, %v3060_v0 }
 0x638   :  { %v3665_v2 = vmax.f32 %v8378_v59, 0.0  ;;  %v3657_v46 = vmax.f32 %v8401_v19, 0.0  ;;  %v8466_v23 = vadd.f32 %v8398_v15, %v3598_v51 }
 0x639   :  { %v3584_v4 = vpop.f32.mrf.mxu3 }
 0x63a   :  { %v5061_v27 = vpack.i.bf16 %v3663_v33, %v3665_v2  ;;  %v3585_v40 = vadd.f32 %v3584_v4, %v3531_v11  ;;  %v3608_v11 = vadd.f32 %v3473_v24, %v3131_v36  ;;  %v3476_v24 = vadd.f32 %v8355_v9, %v8353_v60  ;;  %v9407_v36 = vld [vmem:[#allocation25_spill] sm:$0xff] }
 0x63b   :  { %v3481_v41 = vpop.f32.mrf.mxu1 }
 0x63c   :  { %v3482_v12 = vadd.f32 %v3481_v41, %v3428_v29  ;;  %5062 = vrot.lane.b32.xlu2 %v5061_v27, %s5114_s6  ;;  %v3613_v55 = vadd.f32 %v3585_v40, %v8292_v38  ;;  %v3431_v38 = vpop.f32.mrf.mxu0  ;;  %v8421_v7 = vadd.f32 %v8398_v15, %v3608_v11  ;;  %v3231_v29 = vadd.f32 %v8258_v39, %v3178_v22  ;;  %v9409_v11 = vld [vmem:[#allocation22_spill] sm:$0xff] }
 0x63d   :  { %v3081_v39 = vadd.f32 %v8243_v43, %v2892_v13  ;;  %v9406_v43 = vld [vmem:[#allocation39_spill] sm:$0xff] }
 0x63e   :  { %v3614_v48 = vadd.f32 %v3482_v12, %v3140_v37  ;;  %v8424_v3 = vadd.f32 %v8365_v45, %v3613_v55  ;;  %v3537_v10 = vpop.f32.mrf.mxu2  ;;  %v3605_v6 = vadd.f32 %v3573_v42, %v3231_v29  ;;  %v3662_v44 = vmax.f32 %v8421_v7, 0.0  ;;  %v9404_v37 = vld [vmem:[#allocation12_spill] sm:$0xff]  ;;  %v9405_v12 = vld [vmem:[#allocation10_spill] sm:$0xff]  ;;  %v9414_v13 = vld [vmem:[#allocation23_spill] sm:$0xff] }
 0x63f   :  { %v2877_v40 = vadd.f32 %v9404_v37, %v7751_v26  ;;  %v2880_v5 = vadd.f32 %v9406_v43, %v9405_v12  ;;  %v9408_v26 = vld [vmem:[#allocation38_spill] sm:$0xff] }
 0x640   :  { %v8405_v35 = vadd.f32 %v8398_v15, %v3614_v48  ;;  %v3667_v18 = vmax.f32 %v8424_v3, 0.0  ;;  %v8470_v60 = vadd.f32 %v8365_v45, %v3605_v6  ;;  %v2904_v55 = vadd.f32 %v9409_v11, %v9408_v26  ;;  %v9420_v43 = vld [vmem:[#allocation2_spill] sm:$0xff]  ;;  %v9424_v11 = vld [vmem:[#allocation49_spill] sm:$0xff] }
 0x641   :  { %v3587_v54 = vpop.f32.mrf.mxu3  ;;  %v3069_v42 = vadd.f32 %v9411_v16, %v2880_v5  ;;  %v9421_v5 = vld [vmem:[#allocation4_spill] sm:$0xff]  ;;  %v9423_v26 = vld [vmem:[#allocation26_spill] sm:$0xff]  ;;  %v9427_v16 = vld [vmem:[#allocation51_spill] sm:$0xff] }
 0x642   :  { %v3668_v57 = vmax.f32 %v8405_v35, 0.0  ;;  %v3588_v30 = vadd.f32 %v3587_v54, %v3534_v34  ;;  %v3134_v34 = vadd.f32 %v9407_v36, %v3081_v39  ;;  %v3652_v54 = vmax.f32 %v8466_v23, 0.0  ;;  %v4002_v23 = vld [vmem:[%s9057_s9 + $0x78] sm:$0xff] }
 0x643   :  { %v3484_v8 = vpop.f32.mrf.mxu1  ;;  %v3461_v36 = vadd.f32 %v9421_v5, %v9420_v43 }
 0x644   :  { %v3615_v49 = vadd.f32 %v3588_v30, %v8298_v56  ;;  %v3485_v31 = vadd.f32 %v3484_v8, %v3431_v38  ;;  %v5076_v62 = vpack.i.bf16 %v3668_v57, %v3657_v46  ;;  %v8440_v56 = vadd.f32 %v8365_v45, %v8319_v25  ;;  %v3434_v30 = vpop.f32.mrf.mxu0  ;;  %v9410_v38 = vld [vmem:[#allocation21_spill] sm:$0xff] }
 0x645   :  { %v3596_v25 = vadd.f32 %v3455_v21, %v3113_v53  ;;  %v3610_v28 = vadd.f32 %v3476_v24, %v3134_v34  ;;  %v3659_v8 = vmax.f32 %v8470_v60, 0.0  ;;  %v3093_v21 = vadd.f32 %v9415_v58, %v2904_v55  ;;  %v9417_v53 = vld [vmem:[#allocation29_spill] sm:$0xff]  ;;  %v9429_v58 = vld [vmem:[#allocation44_spill] sm:$0xff] }
 0x646   :  { %v8443_v4 = vadd.f32 %v8365_v45, %v3615_v49  ;;  %v3616_v17 = vadd.f32 %v3485_v31, %v3143_v61  ;;  %5077 = vrot.lane.b32.xlu2 %v5076_v62, %s5114_s6  ;;  %v3651_v20 = vmax.f32 %v8440_v56, 0.0  ;;  %v3066_v61 = vadd.f32 %v9410_v38, %v2877_v40  ;;  %v9412_v49 = vld [vmem:[#allocation61_spill] sm:$0xff]  ;;  %v9413_v62 = vld [vmem:[#allocation20_spill] sm:$0xff]  ;;  %v9419_v40 = vld [vmem:[#allocation6_spill] sm:$0xff] }
 0x647   :  { %v8480_v1 = vadd.f32 %v8398_v15, %v3596_v25  ;;  %v3181_v0 = vadd.f32 %v9414_v13, %v9413_v62  ;;  %v8496_v39 = vadd.f32 %v8398_v15, %v3610_v28  ;;  %v3146_v12 = vadd.f32 %v9419_v40, %v3093_v21  ;;  %v9426_v38 = vld [vmem:[#allocation11_spill] sm:$0xff]  ;;  %v3807_v56 = vld [vmem:[%s9056_s7] sm:$0xff] }
 0x648   :  { %v3669_v47 = vmax.f32 %v8443_v4, 0.0  ;;  %v8455_v52 = vadd.f32 %v8398_v15, %v3616_v17  ;;  %v5091_v48 = vpack.i.bf16 %v3662_v44, %v3651_v20  ;;  %v9416_v17 = vld [vmem:[#allocation35_spill] sm:$0xff]  ;;  %v3576_v55 = vadd.f32 %v9424_v11, %v9423_v26 }
 0x649   :  { %v3590_v27 = vpop.f32.mrf.mxu3  ;;  %v3650_v29 = vmax.f32 %v8480_v1, 0.0  ;;  %v3464_v51 = vadd.f32 %v9417_v53, %v9416_v17  ;;  %v3234_v21 = vadd.f32 %v9429_v58, %v3181_v0  ;;  %v3664_v17 = vmax.f32 %v8496_v39, 0.0  ;;  %v9430_v40 = vld [vmem:[#allocation47_spill] sm:$0xff]  ;;  %v3892_v39 = vld [vmem:[%s9055_s8] sm:$0xff]  ;;  %v3809_v1 = vld [vmem:[%s9056_s7 + $0x10] sm:$0xff] }
 0x64a   :  { %v5056_v41 = vpack.i.bf16 %v3667_v18, %v3669_v47  ;;  %v3591_v9 = vadd.f32 %v3590_v27, %v3537_v10  ;;  %v3670_v63 = vmax.f32 %v8455_v52, 0.0  ;;  %v3540_v10 = vpop.f32.mrf.mxu2  ;;  %v3479_v0 = vadd.f32 %v8367_v14, %v8360_v32  ;;  %v9432_v14 = vld [vmem:[#allocation70_spill] sm:$0xff]  ;;  %v9433_v32 = vld [vmem:[#allocation48_spill] sm:$0xff] }
 0x64b   :  { %v3487_v22 = vpop.f32.mrf.mxu1  ;;  %v5106_v34 = vpack.i.bf16 %v3650_v29, %v3652_v54 }
 0x64c   :  { %5057 = vrot.lane.b32.xlu1 %v5056_v41, %s5114_s6  ;;  %v3617_v31 = vadd.f32 %v3591_v9, %v9412_v49  ;;  %v3488_v25 = vadd.f32 %v3487_v22, %v3434_v30  ;;  %v5071_v24 = vpack.i.bf16 %v3670_v63, %v3659_v8  ;;  %v9418_v41 = vld [vmem:[#allocation58_spill] sm:$0xff]  ;;  %v9422_v9 = vld [vmem:[#allocation28_spill] sm:$0xff]  ;;  %v9425_v22 = vld [vmem:[#allocation31_spill] sm:$0xff] }
 0x64d   :  { %v3122_v37 = vadd.f32 %v9418_v41, %v3069_v42  ;;  %v2895_v42 = vadd.f32 %v9427_v16, %v9426_v38  ;;  %v9428_v49 = vld [vmem:[#allocation24_spill] sm:$0xff] }
 0x64e   :  { %5092 = vrot.lane.b32.xlu2 %v5091_v48, %s5114_s6  ;;  %v8512_v48 = vadd.f32 %v8365_v45, %v9422_v9  ;;  %v8517_v28 = vadd.f32 %v8365_v45, %v3617_v31  ;;  %v3119_v62 = vadd.f32 %v9428_v49, %v3066_v61  ;;  %v3618_v53 = vadd.f32 %v3488_v25, %v3146_v12  ;;  %v9431_v12 = vld [vmem:[#allocation59_spill] sm:$0xff] }
 0x64f   :  { %v3602_v13 = vadd.f32 %v3464_v51, %v3122_v37  ;;  %v3084_v43 = vadd.f32 %v9430_v40, %v2895_v42  ;;  %v2886_v9 = vadd.f32 %v9433_v32, %v9432_v14  ;;  %v9436_v42 = vld [vmem:[#allocation55_spill] sm:$0xff]  ;;  %v9440_v40 = vld [vmem:[#allocation17_spill] sm:$0xff] }
 0x650   :  { %v3600_v31 = vadd.f32 %v3461_v36, %v3119_v62  ;;  %v8537_v51 = vadd.f32 %v8398_v15, %v3618_v53  ;;  %v9437_v62 = vld [vmem:[#allocation62_spill] sm:$0xff] }
 0x651   :  { %v3593_v6 = vpop.f32.mrf.mxu3  ;;  %v8532_v61 = vadd.f32 %v8398_v15, %v3602_v13  ;;  %v3137_v5 = vadd.f32 %v9431_v12, %v3084_v43  ;;  %v3075_v49 = vadd.f32 %v9436_v42, %v2886_v9  ;;  %v9438_v13 = vld [vmem:[#allocation46_spill] sm:$0xff] }
 0x652   :  { %v3594_v27 = vadd.f32 %v3593_v6, %v3540_v10  ;;  %v3653_v6 = vmax.f32 %v8512_v48, 0.0  ;;  %v8545_v36 = vadd.f32 %v8398_v15, %v3600_v31  ;;  %v3470_v58 = vadd.f32 %v9438_v13, %v9437_v62  ;;  %v9439_v31 = vld [vmem:[#allocation54_spill] sm:$0xff] }
 0x653   :  { %v3656_v26 = vmax.f32 %v8532_v61, 0.0  ;;  %v3612_v11 = vadd.f32 %v3479_v0, %v3137_v5  ;;  %v3128_v43 = vadd.f32 %v9440_v40, %v3075_v49  ;;  %v9441_v0 = vld [vmem:[#allocation50_spill] sm:$0xff] }
 0x654   :  { %v3619_v30 = vadd.f32 %v3594_v27, %v9425_v22  ;;  %5072 = vrot.lane.b32.xlu1 %v5071_v24, %s5114_s6  ;;  %v3607_v27 = vadd.f32 %v3576_v55, %v3234_v21  ;;  %v3671_v24 = vmax.f32 %v8517_v28, 0.0  ;;  %v5086_v37 = vpack.i.bf16 %v3664_v17, %v3653_v6  ;;  %v9434_v28 = vld [vmem:[#allocation37_spill] sm:$0xff]  ;;  %v9435_v22 = vld [vmem:[#allocation19_spill] sm:$0xff]  ;;  %v9444_v5 = vld [vmem:[#allocation18_spill] sm:$0xff] }
 0x655   :  { %v3672_v55 = vmax.f32 %v8537_v51, 0.0  ;;  %v3654_v38 = vmax.f32 %v8545_v36, 0.0  ;;  %v8564_v21 = vadd.f32 %v8398_v15, %v3612_v11  ;;  %v8576_v51 = vadd.f32 %v8365_v45, %v9441_v0 }
 0x656   :  { %v3649_v10 = vadd.f32 %v8365_v45, %v3619_v30  ;;  %5107 = vrot.lane.b32.xlu2 %v5106_v34, %s5114_s6  ;;  %v8548_v34 = vadd.f32 %v8365_v45, %v3607_v27  ;;  %v2883_v30 = vadd.f32 %v9435_v22, %v9434_v28  ;;  %v3606_v32 = vadd.f32 %v3470_v58, %v3128_v43 }
 0x657   :  { %v5101_v53 = vpack.i.bf16 %v3654_v38, %v3656_v26  ;;  %v3666_v9 = vmax.f32 %v8564_v21, 0.0  ;;  %v3655_v11 = vmax.f32 %v8576_v51, 0.0 }
 0x658   :  { %v3673_v41 = vmax.f32 %v3649_v10, 0.0  ;;  %v3661_v16 = vmax.f32 %v8548_v34, 0.0  ;;  %v3072_v27 = vadd.f32 %v9439_v31, %v2883_v30  ;;  %v8586_v22 = vadd.f32 %v8398_v15, %v3606_v32 }
 0x659   :  { %v5081_v45 = vpack.i.bf16 %v3666_v9, %v3655_v11 }
 0x65a   :  { %v5051_v25 = vpack.i.bf16 %v3671_v24, %v3673_v41  ;;  %v5066_v10 = vpack.i.bf16 %v3672_v55, %v3661_v16  ;;  %v3125_v14 = vadd.f32 %v9444_v5, %v3072_v27  ;;  %v3660_v42 = vmax.f32 %v8586_v22, 0.0 }
 0x65c   :  { %5052 = vrot.lane.b32.xlu0 %v5051_v25, %s5114_s6  ;;  %5087 = vrot.lane.b32.xlu1 %v5086_v37, %s5114_s6  ;;  %v9442_v25 = vld [vmem:[#allocation5_spill] sm:$0xff]  ;;  %v9443_v37 = vld [vmem:[#allocation3_spill] sm:$0xff] }
 0x65d   :  { %v3467_v12 = vadd.f32 %v9443_v37, %v9442_v25 }
 0x65f   :  { %v3604_v28 = vadd.f32 %v3467_v12, %v3125_v14 }
 0x661   :  { %v8593_v30 = vadd.f32 %v8398_v15, %v3604_v28 }
 0x663   :  { %v3658_v49 = vmax.f32 %v8593_v30, 0.0  ;;  %v3893_v30 = vld [vmem:[%s9055_s8 + $0x8] sm:$0xff] }
 0x664   :  { %5102 = vrot.lane.b32.xlu1 %v5101_v53, %s5114_s6  ;;  %5067 = vrot.lane.b32.xlu0 %v5066_v10, %s5114_s6 }
 0x665   :  { %v5096_v62 = vpack.i.bf16 %v3658_v49, %v3660_v42 }
 0x66c   :  { %5082 = vrot.lane.b32.xlu0 %v5081_v45, %s5114_s6 }
 0x674   :  { %5097 = vrot.lane.b32.xlu0 %v5096_v62, %s5114_s6 }
 0x696   :  { %v8605_v58 = vpop.permute.xlu2 %5062 }
 0x697   :  { %v5064_v37 = vunpack.i.l.bf16 %v8605_v58  ;;  %v5065_v14 = vunpack.i.h.bf16 %v8605_v58 }
 0x699   :  { %v3798_v28 = vmax.f32 %v3665_v2, %v5064_v37 }
 0x6a0   :  { %v8610_v43 = vpop.permute.xlu2 %5077 }
 0x6a1   :  { %v5080_v4 = vunpack.i.h.bf16 %v8610_v43 }
 0x6a8   :  { %v8635_v58 = vpop.permute.xlu2 %5092 }
 0x6a9   :  { %v5095_v52 = vunpack.i.h.bf16 %v8635_v58 }
 0x6ab   :  { %v3753_v19 = vsel %vm3746_vm8, %v5095_v52, %v5065_v14  ;;  %v4882_v52 = vld [vmem:[%s9057_s9 + $0x198] sm:$0xff] }
 0x6be   :  { %v8603_v13 = vpop.permute.xlu1 %5057 }
 0x6bf   :  { %v5059_v27 = vunpack.i.l.bf16 %v8603_v13  ;;  %v5060_v0 = vunpack.i.h.bf16 %v8603_v13  ;;  %v3796_v13 = vmax.f32 %v3663_v33, %v5065_v14 }
 0x6c1   :  { %v3802_v12 = vmax.f32 %v3669_v47, %v5059_v27  ;;  %v3756_v2 = vsel %vm3746_vm8, %v5080_v4, %v5059_v27  ;;  %v3997_v4 = vld [vmem:[%s9057_s9 + $0x50] sm:$0xff] }
 0x6c6   :  { %v8607_v31 = vpop.permute.xlu1 %5072 }
 0x6c7   :  { %v5075_v32 = vunpack.i.h.bf16 %v8607_v31  ;;  %v5074_v59 = vunpack.i.l.bf16 %v8607_v31 }
 0x6ce   :  { %v5053_v53 = vpop.permute.xlu0 %5052 }
 0x6cf   :  { %v5055_v15 = vunpack.i.h.bf16 %v5053_v53  ;;  %v5054_v10 = vunpack.i.l.bf16 %v5053_v53 }
 0x6d1   :  { %v3806_v40 = vmax.f32 %v3673_v41, %v5054_v10  ;;  %v3804_v25 = vmax.f32 %v3671_v24, %v5055_v15  ;;  %v3800_v41 = vmax.f32 %v3667_v18, %v5060_v0  ;;  %v3757_v3 = vsel %vm3746_vm8, %v5075_v32, %v5055_v15  ;;  %v8629_v18 = vpop.permute.xlu1 %5087 }
 0x6d2   :  { %v3803_v53 = vmax.f32 %v3670_v63, %v3757_v3  ;;  %v5079_v15 = vunpack.i.l.bf16 %v8610_v43  ;;  %v3792_v63 = vmax.f32 %v3659_v8, %v5074_v59  ;;  %v3996_v3 = vld [vmem:[%s9057_s9 + $0x48] sm:$0xff] }
 0x6d3   :  { %3864 = vmatpush.msrb.mxu1 %v3806_v40  ;;  %3948 = vmatpush.msra.mxu3 %v3806_v40 }
 0x6d4   :  { %v3790_v35 = vmax.f32 %v3657_v46, %v5079_v15 }
 0x6d5   :  { %3865 = vmatpush.msrb.mxu1 %v3804_v25  ;;  %3949 = vmatpush.msra.mxu3 %v3804_v25 }
 0x6d6   :  { %v8616_v5 = vpop.permute.xlu0 %5067 }
 0x6d7   :  { %v5070_v24 = vunpack.i.h.bf16 %v8616_v5  ;;  %3866 = vmatpush.msrb.mxu1 %v3802_v12  ;;  %3950 = vmatpush.msra.mxu3 %v3802_v12  ;;  %v5069_v45 = vunpack.i.l.bf16 %v8616_v5 }
 0x6d9   :  { %v3758_v47 = vsel %vm3746_vm8, %v5070_v24, %v5054_v10  ;;  %3867 = vmatpush.msrb.mxu1 %v3800_v41  ;;  %3951 = vmatpush.msra.mxu3 %v3800_v41  ;;  %v3794_v50 = vmax.f32 %v3661_v16, %v5069_v45  ;;  %v3801_v10 = vmax.f32 %v3668_v57, %v3756_v2  ;;  %v5089_v57 = vunpack.i.l.bf16 %v8629_v18  ;;  %v5103_v46 = vpop.permute.xlu1 %5102  ;;  %v4863_v2 = vld [vmem:[%s9057_s9 + $0x108] sm:$0xff] }
 0x6da   :  { %v3805_v62 = vmax.f32 %v3672_v55, %v3758_v47  ;;  %v5090_v55 = vunpack.i.h.bf16 %v8629_v18  ;;  %v5094_v16 = vunpack.i.l.bf16 %v8635_v58  ;;  %v3895_v47 = vld [vmem:[%s9055_s8 + $0x18] sm:$0xff]  ;;  %v3995_v18 = vld [vmem:[%s9057_s9 + $0x40] sm:$0xff] }
 0x6db   :  { %3868 = vmatpush.msrb.mxu1 %v3798_v28  ;;  %3952 = vmatpush.msra.mxu3 %v3798_v28  ;;  %v3998_v28 = vld [vmem:[%s9057_s9 + $0x58] sm:$0xff]  ;;  %v4862_v58 = vld [vmem:[%s9057_s9 + $0x100] sm:$0xff] }
 0x6dc   :  { %3832 = vmatpush.msrb.mxu0 %v3805_v62  ;;  %3916 = vmatpush.msrb.mxu2 %v3805_v62  ;;  %v3754_v8 = vsel %vm3746_vm8, %v5090_v55, %v5064_v37  ;;  %v3786_v37 = vmax.f32 %v3653_v6, %v5089_v57  ;;  %v3784_v21 = vmax.f32 %v3651_v20, %v5094_v16  ;;  %v5108_v20 = vpop.permute.xlu2 %5107  ;;  %v3994_v62 = vld [vmem:[%s9057_s9 + $0x38] sm:$0xff]  ;;  %v3993_v55 = vld [vmem:[%s9057_s9 + $0x30] sm:$0xff] }
 0x6dd   :  { %3869 = vmatpush.msrb.mxu1 %v3796_v13  ;;  %3953 = vmatpush.msra.mxu3 %v3796_v13  ;;  %v5110_v5 = vunpack.i.h.bf16 %v5108_v20  ;;  %v5109_v41 = vunpack.i.l.bf16 %v5108_v20  ;;  %v3896_v13 = vld [vmem:[%s9055_s8 + $0x20] sm:$0xff]  ;;  %v4874_v20 = vld [vmem:[%s9057_s9 + $0x158] sm:$0xff] }
 0x6de   :  { %v8645_v33 = vpop.permute.xlu0 %5082  ;;  %3833 = vmatpush.msrb.mxu0 %v3803_v53  ;;  %3917 = vmatpush.msrb.mxu2 %v3803_v53  ;;  %v4861_v53 = vld [vmem:[%s9057_s9 + $0xf8] sm:$0xff] }
 0x6df   :  { %v5085_v27 = vunpack.i.h.bf16 %v8645_v33  ;;  %v5084_v34 = vunpack.i.l.bf16 %v8645_v33  ;;  %3870 = vmatpush.msrb.mxu1 %v3794_v50  ;;  %3954 = vmatpush.msra.mxu3 %v3794_v50  ;;  %v3747_v24 = vsel %vm3746_vm8, %v5110_v5, %v5094_v16  ;;  %v4004_v50 = vld [vmem:[%s9057_s9 + $0x88] sm:$0xff]  ;;  %v4879_v16 = vld [vmem:[%s9057_s9 + $0x180] sm:$0xff]  ;;  %v4849_v5 = vld [vmem:[%s9057_s9 + $0x98] sm:$0xff] }
 0x6e0   :  { %3834 = vmatpush.msrb.mxu0 %v3801_v10  ;;  %3918 = vmatpush.msrb.mxu2 %v3801_v10  ;;  %v3783_v36 = vmax.f32 %v3650_v29, %v3747_v24  ;;  %v4000_v29 = vld [vmem:[%s9057_s9 + $0x68] sm:$0xff]  ;;  %v3991_v10 = vld [vmem:[%s9057_s9 + $0x20] sm:$0xff] }
 0x6e1   :  { %3871 = vmatpush.msrb.mxu1 %v3792_v63  ;;  %3955 = vmatpush.msra.mxu3 %v3792_v63  ;;  %v3755_v60 = vsel %vm3746_vm8, %v5085_v27, %v5060_v0  ;;  %v3788_v25 = vmax.f32 %v3655_v11, %v5084_v34  ;;  %v3797_v0 = vmax.f32 %v3664_v17, %v3754_v8  ;;  %v5104_v11 = vunpack.i.l.bf16 %v5103_v46  ;;  %v3992_v33 = vld [vmem:[%s9057_s9 + $0x28] sm:$0xff]  ;;  %v4003_v63 = vld [vmem:[%s9057_s9 + $0x80] sm:$0xff]  ;;  %v4857_v8 = vld [vmem:[%s9057_s9 + $0xd8] sm:$0xff] }
 0x6e2   :  { %v3799_v40 = vmax.f32 %v3666_v9, %v3755_v60  ;;  %v3795_v9 = vmax.f32 %v3662_v44, %v3753_v19  ;;  %v5105_v17 = vunpack.i.h.bf16 %v5103_v46  ;;  %v4859_v27 = vld [vmem:[%s9057_s9 + $0xe8] sm:$0xff]  ;;  %v4878_v19 = vld [vmem:[%s9057_s9 + $0x178] sm:$0xff]  ;;  %v4867_v24 = vld [vmem:[%s9057_s9 + $0x120] sm:$0xff] }
 0x6e3   :  { %3872 = vmatpush.msrb.mxu1 %v3790_v35  ;;  %3956 = vmatpush.msra.mxu3 %v3790_v35  ;;  %v3750_v6 = vsel %vm3746_vm8, %v5104_v11, %v5079_v15  ;;  %v4860_v15 = vld [vmem:[%s9057_s9 + $0xf0] sm:$0xff]  ;;  %v4858_v35 = vld [vmem:[%s9057_s9 + $0xe0] sm:$0xff]  ;;  %v4880_v60 = vld [vmem:[%s9057_s9 + $0x188] sm:$0xff] }
 0x6e4   :  { %3835 = vmatpush.msrb.mxu0 %v3799_v40  ;;  %3919 = vmatpush.msrb.mxu2 %v3799_v40  ;;  %v3749_v32 = vsel %vm3746_vm8, %v5105_v17, %v5084_v34  ;;  %v3789_v22 = vmax.f32 %v3656_v26, %v3750_v6  ;;  %v3894_v26 = vld [vmem:[%s9055_s8 + $0x10] sm:$0xff]  ;;  %v3988_v46 = vld [vmem:[%s9057_s9 + $0x8] sm:$0xff]  ;;  %v4865_v11 = vld [vmem:[%s9057_s9 + $0x118] sm:$0xff] }
 0x6e5   :  { %3873 = vmatpush.msrb.mxu1 %v3788_v25  ;;  %3957 = vmatpush.msra.mxu3 %v3788_v25  ;;  %v3787_v43 = vmax.f32 %v3654_v38, %v3749_v32  ;;  %v3999_v38 = vld [vmem:[%s9057_s9 + $0x60] sm:$0xff]  ;;  %v4881_v34 = vld [vmem:[%s9057_s9 + $0x190] sm:$0xff] }
 0x6e6   :  { %v5098_v51 = vpop.permute.xlu0 %5097  ;;  %3836 = vmatpush.msrb.mxu0 %v3797_v0  ;;  %3920 = vmatpush.msrb.mxu2 %v3797_v0  ;;  %v4856_v40 = vld [vmem:[%s9057_s9 + $0xd0] sm:$0xff]  ;;  %v3987_v0 = vld [vmem:[%s9057_s9] sm:$0xff] }
 0x6e7   :  { %v5100_v12 = vunpack.i.h.bf16 %v5098_v51  ;;  %v5099_v14 = vunpack.i.l.bf16 %v5098_v51  ;;  %3874 = vmatpush.msrb.mxu1 %v3786_v37  ;;  %3958 = vmatpush.msra.mxu3 %v3786_v37  ;;  %v3989_v25 = vld [vmem:[%s9057_s9 + $0x10] sm:$0xff]  ;;  %v4884_v37 = vld [vmem:[%s9057_s9 + $0x1a8] sm:$0xff]  ;;  %v4850_v6 = vld [vmem:[%s9057_s9 + $0xa0] sm:$0xff] }
 0x6e8   :  { %3837 = vmatpush.msrb.mxu0 %v3795_v9  ;;  %3921 = vmatpush.msrb.mxu2 %v3795_v9  ;;  %v4855_v51 = vld [vmem:[%s9057_s9 + $0xc8] sm:$0xff]  ;;  %v4854_v9 = vld [vmem:[%s9057_s9 + $0xc0] sm:$0xff]  ;;  %v4873_v17 = vld [vmem:[%s9057_s9 + $0x150] sm:$0xff] }
 0x6e9   :  { %3875 = vmatpush.msrb.mxu1 %v3784_v21  ;;  %3959 = vmatpush.msra.mxu3 %v3784_v21  ;;  %v3752_v7 = vsel %vm3746_vm8, %v5099_v14, %v5069_v45  ;;  %v3751_v44 = vsel %vm3746_vm8, %v5100_v12, %v5074_v59  ;;  %v3810_v45 = vld [vmem:[%s9056_s7 + $0x18] sm:$0xff]  ;;  %v3811_v59 = vld [vmem:[%s9056_s7 + $0x20] sm:$0xff]  ;;  %v4877_v21 = vld [vmem:[%s9057_s9 + $0x170] sm:$0xff] }
 0x6ea   :  { %v3793_v48 = vmax.f32 %v3660_v42, %v3752_v7  ;;  %4842 = vmatmul.msk.f32.vlgmr.msra.gmra.mxu3 %vm3812_vm9, %v3892_v39  ;;  %4832 = vmatmul.msk.f32.vlgmr.msrb.gmra.mxu1 %vm3812_vm9, %v3807_v56  ;;  %v3791_v31 = vmax.f32 %v3658_v49, %v3751_v44  ;;  %v3748_v42 = vsel %vm3746_vm8, %v5109_v41, %v5089_v57  ;;  %v3808_v49 = vld [vmem:[%s9056_s7 + $0x8] sm:$0xff]  ;;  %v3990_v57 = vld [vmem:[%s9057_s9 + $0x18] sm:$0xff]  ;;  %v4883_v12 = vld [vmem:[%s9057_s9 + $0x1a0] sm:$0xff] }
 0x6eb   :  { %v3785_v61 = vmax.f32 %v3652_v54, %v3748_v42  ;;  %v4001_v54 = vld [vmem:[%s9057_s9 + $0x70] sm:$0xff]  ;;  %4043 = vmatpush.msra.mxu1 %v4004_v50  ;;  %4138 = vmatpush.msrb.mxu3 %v4882_v52  ;;  %v4876_v14 = vld [vmem:[%s9057_s9 + $0x168] sm:$0xff]  ;;  %v4875_v7 = vld [vmem:[%s9057_s9 + $0x160] sm:$0xff] }
 0x6ec   :  { %3838 = vmatpush.msrb.mxu0 %v3793_v48  ;;  %3922 = vmatpush.msrb.mxu2 %v3793_v48  ;;  %v4852_v44 = vld [vmem:[%s9057_s9 + $0xb0] sm:$0xff]  ;;  %v4851_v48 = vld [vmem:[%s9057_s9 + $0xa8] sm:$0xff]  ;;  %v4871_v41 = vld [vmem:[%s9057_s9 + $0x140] sm:$0xff] }
 0x6ed   :  { %4044 = vmatpush.msra.mxu1 %v4003_v63  ;;  %4139 = vmatpush.msrb.mxu3 %v4881_v34  ;;  %v4848_v32 = vld [vmem:[%s9057_s9 + $0x90] sm:$0xff]  ;;  %v4870_v42 = vld [vmem:[%s9057_s9 + $0x138] sm:$0xff]  ;;  %v4897_v52 = vld [vmem:[%s9057_s9 + $0x208] sm:$0xff] }
 0x6ee   :  { %3839 = vmatpush.msrb.mxu0 %v3791_v31  ;;  %3923 = vmatpush.msrb.mxu2 %v3791_v31  ;;  %v4872_v31 = vld [vmem:[%s9057_s9 + $0x148] sm:$0xff]  ;;  %v4917_v63 = vld [vmem:[%s9057_s9 + $0x2a0] sm:$0xff] }
 0x6ef   :  { %4140 = vmatpush.msrb.mxu3 %v4880_v60  ;;  %4172 = vmatpush.msrb.mxu1 %v4884_v37 }
 0x6f0   :  { %3840 = vmatpush.msrb.mxu0 %v3789_v22  ;;  %3924 = vmatpush.msrb.mxu2 %v3789_v22 }
 0x6f1   :  { %4141 = vmatpush.msrb.mxu3 %v4879_v16  ;;  %4173 = vmatpush.msrb.mxu1 %v4883_v12  ;;  %v4915_v16 = vld [vmem:[%s9057_s9 + $0x290] sm:$0xff]  ;;  %v4891_v12 = vld [vmem:[%s9057_s9 + $0x1d8] sm:$0xff] }
 0x6f2   :  { %3841 = vmatpush.msrb.mxu0 %v3787_v43  ;;  %3925 = vmatpush.msrb.mxu2 %v3787_v43  ;;  %v4869_v43 = vld [vmem:[%s9057_s9 + $0x130] sm:$0xff] }
 0x6f3   :  { %4843 = vmatmul.msk.f32.gmra.mxu3 %vm3812_vm9, %v3893_v30  ;;  %4833 = vmatmul.msk.f32.gmra.mxu1 %vm3812_vm9, %v3808_v49 }
 0x6f4   :  { %3842 = vmatpush.msrb.mxu0 %v3785_v61  ;;  %3926 = vmatpush.msrb.mxu2 %v3785_v61 }
 0x6f5   :  { %4142 = vmatpush.msrb.mxu3 %v4878_v19 }
 0x6f6   :  { %3843 = vmatpush.msrb.mxu0 %v3783_v36  ;;  %3927 = vmatpush.msrb.mxu2 %v3783_v36  ;;  %v4903_v36 = vld [vmem:[%s9057_s9 + $0x238] sm:$0xff] }
 0x6f7   :  { %4837 = vmatmul.msk.f32.vlgmr.msrb.gmra.mxu2 %vm3812_vm9, %v3892_v39  ;;  %4827 = vmatmul.msk.f32.vlgmr.msrb.gmra.mxu0 %vm3812_vm9, %v3807_v56  ;;  %v4853_v39 = vld [vmem:[%s9057_s9 + $0xb8] sm:$0xff]  ;;  %v4864_v56 = vld [vmem:[%s9057_s9 + $0x110] sm:$0xff] }
 0x6f8   :  { %4009 = vmatpush.msra.mxu0 %v4002_v23  ;;  %4075 = vmatpush.msra.mxu2 %v4863_v2  ;;  %v4899_v2 = vld [vmem:[%s9057_s9 + $0x218] sm:$0xff] }
 0x6f9   :  { %4143 = vmatpush.msrb.mxu3 %v4877_v21  ;;  %v4913_v21 = vld [vmem:[%s9057_s9 + $0x280] sm:$0xff] }
 0x6fa   :  { %4010 = vmatpush.msra.mxu0 %v4001_v54  ;;  %4076 = vmatpush.msra.mxu2 %v4862_v58  ;;  %v4902_v54 = vld [vmem:[%s9057_s9 + $0x230] sm:$0xff] }
 0x6fb   :  { %4844 = vmatmul.msk.f32.gmra.mxu3 %vm3812_vm9, %v3894_v26  ;;  %4834 = vmatmul.msk.f32.gmra.mxu1 %vm3812_vm9, %v3809_v1  ;;  %v4919_v58 = vld [vmem:[%s9057_s9 + $0x2b0] sm:$0xff] }
 0x6fc   :  { %4011 = vmatpush.msra.mxu0 %v4000_v29  ;;  %4077 = vmatpush.msra.mxu2 %v4861_v53  ;;  %v4922_v29 = vld [vmem:[%s9057_s9 + $0x2c8] sm:$0xff]  ;;  %v4898_v53 = vld [vmem:[%s9057_s9 + $0x210] sm:$0xff] }
 0x6fd   :  { %4144 = vmatpush.msrb.mxu3 %v4876_v14 }
 0x6fe   :  { %4012 = vmatpush.msra.mxu0 %v3999_v38  ;;  %4078 = vmatpush.msra.mxu2 %v4860_v15  ;;  %v4921_v38 = vld [vmem:[%s9057_s9 + $0x2c0] sm:$0xff] }
 0x6ff   :  { %4838 = vmatmul.msk.f32.gmra.mxu2 %vm3812_vm9, %v3893_v30  ;;  %4828 = vmatmul.msk.f32.gmra.mxu0 %vm3812_vm9, %v3808_v49  ;;  %v4868_v30 = vld [vmem:[%s9057_s9 + $0x128] sm:$0xff] }
 0x700   :  { %4013 = vmatpush.msra.mxu0 %v3998_v28  ;;  %4079 = vmatpush.msra.mxu2 %v4859_v27  ;;  %v4896_v27 = vld [vmem:[%s9057_s9 + $0x200] sm:$0xff] }
 0x701   :  { %4145 = vmatpush.msrb.mxu3 %v4875_v7  ;;  %v4890_v7 = vld [vmem:[%s9057_s9 + $0x1d0] sm:$0xff] }
 0x702   :  { %4014 = vmatpush.msra.mxu0 %v3997_v4  ;;  %4080 = vmatpush.msra.mxu2 %v4858_v35  ;;  %v4916_v35 = vld [vmem:[%s9057_s9 + $0x298] sm:$0xff] }
 0x703   :  { %4845 = vmatmul.msk.f32.gmra.mxu3 %vm3812_vm9, %v3895_v47  ;;  %4835 = vmatmul.msk.f32.gmra.mxu1 %vm3812_vm9, %v3810_v45 }
 0x704   :  { %4015 = vmatpush.msra.mxu0 %v3996_v3  ;;  %4081 = vmatpush.msra.mxu2 %v4857_v8  ;;  %v4900_v3 = vld [vmem:[%s9057_s9 + $0x220] sm:$0xff] }
 0x705   :  { %4146 = vmatpush.msrb.mxu3 %v4874_v20  ;;  %v4910_v20 = vld [vmem:[%s9057_s9 + $0x268] sm:$0xff] }
 0x706   :  { %4016 = vmatpush.msra.mxu0 %v3995_v18  ;;  %4082 = vmatpush.msra.mxu2 %v4856_v40  ;;  %v4894_v40 = vld [vmem:[%s9057_s9 + $0x1f0] sm:$0xff] }
 0x707   :  { %4839 = vmatmul.msk.f32.gmra.mxu2 %vm3812_vm9, %v3894_v26  ;;  %4829 = vmatmul.msk.f32.gmra.mxu0 %vm3812_vm9, %v3809_v1 }
 0x708   :  { %4017 = vmatpush.msra.mxu0 %v3994_v62  ;;  %4083 = vmatpush.msra.mxu2 %v4855_v51  ;;  %v4892_v51 = vld [vmem:[%s9057_s9 + $0x1e0] sm:$0xff] }
 0x709   :  { %4147 = vmatpush.msrb.mxu3 %v4873_v17  ;;  %v4909_v17 = vld [vmem:[%s9057_s9 + $0x260] sm:$0xff] }
 0x70a   :  { %4018 = vmatpush.msra.mxu0 %v3993_v55  ;;  %4084 = vmatpush.msra.mxu2 %v4854_v9 }
 0x70b   :  { %4846 = vmatmul.msk.f32.gmra.mxu3 %vm3812_vm9, %v3896_v13  ;;  %4836 = vmatmul.msk.f32.gmra.mxu1 %vm3812_vm9, %v3811_v59 }
 0x70c   :  { %4019 = vmatpush.msra.mxu0 %v3992_v33  ;;  %4085 = vmatpush.msra.mxu2 %v4853_v39 }
 0x70d   :  { %4148 = vmatpush.msrb.mxu3 %v4872_v31  ;;  %v4908_v31 = vld [vmem:[%s9057_s9 + $0x258] sm:$0xff] }
 0x70e   :  { %4020 = vmatpush.msra.mxu0 %v3991_v10  ;;  %4086 = vmatpush.msra.mxu2 %v4852_v44  ;;  %v4918_v10 = vld [vmem:[%s9057_s9 + $0x2a8] sm:$0xff] }
 0x70f   :  { %4840 = vmatmul.msk.f32.gmra.mxu2 %vm3812_vm9, %v3895_v47  ;;  %4830 = vmatmul.msk.f32.gmra.mxu0 %vm3812_vm9, %v3810_v45  ;;  %v4901_v45 = vld [vmem:[%s9057_s9 + $0x228] sm:$0xff] }
 0x710   :  { %4021 = vmatpush.msra.mxu0 %v3990_v57  ;;  %4087 = vmatpush.msra.mxu2 %v4851_v48  ;;  %v4895_v57 = vld [vmem:[%s9057_s9 + $0x1f8] sm:$0xff]  ;;  %v4889_v48 = vld [vmem:[%s9057_s9 + $0x1c8] sm:$0xff] }
 0x711   :  { %4149 = vmatpush.msrb.mxu3 %v4871_v41  ;;  %v4907_v41 = vld [vmem:[%s9057_s9 + $0x250] sm:$0xff] }
 0x712   :  { %4022 = vmatpush.msra.mxu0 %v3989_v25  ;;  %4088 = vmatpush.msra.mxu2 %v4850_v6  ;;  %v4888_v6 = vld [vmem:[%s9057_s9 + $0x1c0] sm:$0xff] }
 0x713   :  { %4150 = vmatpush.msrb.mxu3 %v4870_v42 }
 0x714   :  { %4023 = vmatpush.msra.mxu0 %v3988_v46  ;;  %4089 = vmatpush.msra.mxu2 %v4849_v5  ;;  %v4914_v46 = vld [vmem:[%s9057_s9 + $0x288] sm:$0xff]  ;;  %v4887_v5 = vld [vmem:[%s9057_s9 + $0x1b8] sm:$0xff] }
 0x715   :  { %4151 = vmatpush.msrb.mxu3 %v4869_v43 }
 0x716   :  { %4024 = vmatpush.msra.mxu0 %v3987_v0  ;;  %4090 = vmatpush.msra.mxu2 %v4848_v32  ;;  %v4893_v0 = vld [vmem:[%s9057_s9 + $0x1e8] sm:$0xff]  ;;  %v4886_v32 = vld [vmem:[%s9057_s9 + $0x1b0] sm:$0xff] }
 0x717   :  { %4841 = vmatmul.msk.f32.gmra.mxu2 %vm3812_vm9, %v3896_v13  ;;  %4831 = vmatmul.msk.f32.gmra.mxu0 %vm3812_vm9, %v3811_v59  ;;  %v4920_v59 = vld [vmem:[%s9057_s9 + $0x2b8] sm:$0xff] }
 0x718   :  { %4109 = vmatpush.msrb.mxu0 %v4865_v11  ;;  %4152 = vmatpush.msrb.mxu3 %v4868_v30  ;;  %v4912_v11 = vld [vmem:[%s9057_s9 + $0x278] sm:$0xff]  ;;  %v4906_v30 = vld [vmem:[%s9057_s9 + $0x248] sm:$0xff] }
 0x719   :  { %4298 = vmatpush.msrb.mxu2 %v4922_v29 }
 0x71a   :  { %4110 = vmatpush.msrb.mxu0 %v4864_v56  ;;  %4153 = vmatpush.msrb.mxu3 %v4867_v24  ;;  %v4911_v56 = vld [vmem:[%s9057_s9 + $0x270] sm:$0xff]  ;;  %v4905_v24 = vld [vmem:[%s9057_s9 + $0x240] sm:$0xff] }
 0x71b   :  { %4299 = vmatpush.msrb.mxu2 %v4921_v38 }
 0x767   :  { %v3877_v22 = vpop.f32.mrf.mxu1 }
 0x76d   :  { %v3961_v49 = vpop.f32.mrf.mxu3 }
 0x76e   :  { %v3977_v61 = vmax.f32 %v3877_v22, %v3961_v49 }
 0x770   :  { %v3880_v23 = vpop.f32.mrf.mxu1  ;;  %4847 = vmatmul.msk.f32.vlgmr.msra.gmra.mxu1 %vm4005_vm10, %v3977_v61  ;;  %v4309_v61 = vld [vmem:[%s9060_s11 + $0x18] sm:$0xff] }
 0x771   :  { %4235 = vmatpush.msra.mxu1 %v4903_v36  ;;  %4330 = vmatpush.msra.mxu3 %v4309_v61  ;;  %v4308_v36 = vld [vmem:[%s9060_s11 + $0x10] sm:$0xff] }
 0x773   :  { %4236 = vmatpush.msra.mxu1 %v4902_v54  ;;  %4331 = vmatpush.msra.mxu3 %v4308_v36  ;;  %v4306_v54 = vld [vmem:[%s9060_s11] sm:$0xff] }
 0x774   :  { %v3845_v26 = vpop.f32.mrf.mxu0 }
 0x776   :  { %v3964_v1 = vpop.f32.mrf.mxu3 }
 0x777   :  { %v3979_v50 = vmax.f32 %v3880_v23, %v3964_v1  ;;  %v4307_v23 = vld [vmem:[%s9060_s11 + $0x8] sm:$0xff] }
 0x778   :  { %v3883_v4 = vpop.f32.mrf.mxu1  ;;  %4332 = vmatpush.msra.mxu3 %v4307_v23 }
 0x77a   :  { %v3929_v28 = vpop.f32.mrf.mxu2  ;;  %4333 = vmatpush.msra.mxu3 %v4306_v54 }
 0x77b   :  { %v3976_v47 = vmax.f32 %v3845_v26, %v3929_v28 }
 0x77c   :  { %v3848_v62 = vpop.f32.mrf.mxu0 }
 0x77d   :  { %4025 = vmatmul.f32.vlgmr.msra.gmra.mxu0 %v3976_v47  ;;  %v5111_v47 = vld [vmem:[%s9058_s10] ss:$0 sm:$0xff] }
 0x77e   :  { %v3967_v18 = vpop.f32.mrf.mxu3  ;;  %4201 = vmatpush.msra.mxu0 %v4901_v45 }
 0x77f   :  { %v3981_v13 = vmax.f32 %v3883_v4, %v3967_v18 }
 0x780   :  { %4202 = vmatpush.msra.mxu0 %v4900_v3  ;;  %v3886_v55 = vpop.f32.mrf.mxu1 }
 0x781   :  { %4885 = vmatmul.msk.f32.vlgmr.msrb.gmra.mxu1 %vm4005_vm10, %v3981_v13 }
 0x782   :  { %4264 = vmatpush.msrb.mxu1 %v4920_v59  ;;  %4203 = vmatpush.msra.mxu0 %v4899_v2  ;;  %v3932_v15 = vpop.f32.mrf.mxu2 }
 0x783   :  { %v3978_v33 = vmax.f32 %v3848_v62, %v3932_v15 }
 0x784   :  { %4265 = vmatpush.msrb.mxu1 %v4919_v58  ;;  %4204 = vmatpush.msra.mxu0 %v4898_v53  ;;  %v3851_v8 = vpop.f32.mrf.mxu0 }
 0x785   :  { %4091 = vmatmul.f32.vlgmr.msra.gmra.mxu2 %v3978_v33  ;;  %4866 = vmatmul.msk.f32.vlgmr.msrb.gmra.mxu0 %vm4005_vm10, %v3979_v50 }
 0x786   :  { %4266 = vmatpush.msrb.mxu1 %v4918_v10  ;;  %4205 = vmatpush.msra.mxu0 %v4897_v52  ;;  %v3970_v34 = vpop.f32.mrf.mxu3 }
 0x787   :  { %v3983_v60 = vmax.f32 %v3886_v55, %v3970_v34 }
 0x788   :  { %4267 = vmatpush.msrb.mxu1 %v4917_v63  ;;  %4206 = vmatpush.msra.mxu0 %v4896_v27  ;;  %v3889_v37 = vpop.f32.mrf.mxu1  ;;  %v5112_v63 = vld [vmem:[%s9059_s12] ss:$0 sm:$0xff] }
 0x789   :  { %4904 = vmatmul.msk.f32.vlgmr.msra.gmra.mxu1 %vm4005_vm10, %v3983_v60 }
 0x78a   :  { %4268 = vmatpush.msrb.mxu1 %v4916_v35  ;;  %4207 = vmatpush.msra.mxu0 %v4895_v57  ;;  %v3935_v25 = vpop.f32.mrf.mxu2 }
 0x78b   :  { %v3980_v19 = vmax.f32 %v3851_v8, %v3935_v25 }
 0x78c   :  { %4269 = vmatpush.msrb.mxu1 %v4915_v16  ;;  %4208 = vmatpush.msra.mxu0 %v4894_v40  ;;  %v3854_v39 = vpop.f32.mrf.mxu0 }
 0x78d   :  { %4154 = vmatmul.f32.vlgmr.msrb.gmra.mxu3 %v3980_v19 }
 0x78e   :  { %4270 = vmatpush.msrb.mxu1 %v4914_v46  ;;  %4209 = vmatpush.msra.mxu0 %v4893_v0  ;;  %v3973_v9 = vpop.f32.mrf.mxu3 }
 0x78f   :  { %v3985_v14 = vmax.f32 %v3889_v37, %v3973_v9 }
 0x790   :  { %4271 = vmatpush.msrb.mxu1 %v4913_v21  ;;  %4210 = vmatpush.msra.mxu0 %v4892_v51 }
 0x791   :  { %4923 = vmatmul.msk.f32.vlgmr.msrb.gmra.mxu2 %vm4005_vm10, %v3985_v14 }
 0x792   :  { %4272 = vmatpush.msrb.mxu1 %v4912_v11  ;;  %4211 = vmatpush.msra.mxu0 %v4891_v12  ;;  %v3938_v44 = vpop.f32.mrf.mxu2 }
 0x793   :  { %v3982_v43 = vmax.f32 %v3854_v39, %v3938_v44 }
 0x794   :  { %4273 = vmatpush.msrb.mxu1 %v4911_v56  ;;  %4212 = vmatpush.msra.mxu0 %v4890_v7  ;;  %v3857_v22 = vpop.f32.mrf.mxu0 }
 0x796   :  { %4274 = vmatpush.msrb.mxu1 %v4910_v20  ;;  %4213 = vmatpush.msra.mxu0 %v4889_v48 }
 0x798   :  { %4275 = vmatpush.msrb.mxu1 %v4909_v17  ;;  %4214 = vmatpush.msra.mxu0 %v4888_v6 }
 0x79a   :  { %4276 = vmatpush.msrb.mxu1 %v4908_v31  ;;  %4215 = vmatpush.msra.mxu0 %v4887_v5  ;;  %v3941_v42 = vpop.f32.mrf.mxu2 }
 0x79b   :  { %v3984_v49 = vmax.f32 %v3857_v22, %v3941_v42 }
 0x79c   :  { %4277 = vmatpush.msrb.mxu1 %v4907_v41  ;;  %4216 = vmatpush.msra.mxu0 %v4886_v32 }
 0x79d   :  { %4217 = vmatmul.f32.vlgmr.msra.gmra.mxu0 %v3982_v43 }
 0x79e   :  { %4278 = vmatpush.msrb.mxu1 %v4906_v30 }
 0x7a0   :  { %4279 = vmatpush.msrb.mxu1 %v4905_v24 }
 0x7a1   :  { %4280 = vmatmul.f32.vlgmr.msrb.gmra.mxu1 %v3984_v49 }
 0x7ed   :  { %v4046_v26 = vpop.f32.mrf.mxu1 }
 0x7fa   :  { %v4026_v1 = vpop.f32.mrf.mxu0 }
 0x7fb   :  { %v4047_v4 = vadd.f32 %v4046_v26, %v4026_v1 }
 0x7fd   :  { %v4052_v62 = vadd.f32 %v5111_v47, %v4047_v4 }
 0x7fe   :  { %v4175_v29 = vpop.f32.mrf.mxu1 }
 0x802   :  { %v4112_v38 = vpop.f32.mrf.mxu0 }
 0x806   :  { %v4238_v18 = vpop.f32.mrf.mxu1 }
 0x808   :  { %v4092_v28 = vpop.f32.mrf.mxu2 }
 0x809   :  { %v4113_v3 = vadd.f32 %v4112_v38, %v4092_v28 }
 0x80b   :  { %v4115_v59 = vadd.f32 %v4113_v3, %v4052_v62 }
 0x810   :  { %v4155_v45 = vpop.f32.mrf.mxu3 }
 0x811   :  { %v4176_v13 = vadd.f32 %v4175_v29, %v4155_v45 }
 0x813   :  { %v4178_v58 = vadd.f32 %v4176_v13, %v4115_v59 }
 0x814   :  { %v4301_v15 = vpop.f32.mrf.mxu2 }
 0x81a   :  { %v4218_v2 = vpop.f32.mrf.mxu0 }
 0x81b   :  { %v4239_v53 = vadd.f32 %v4238_v18, %v4218_v2 }
 0x81d   :  { %v4241_v55 = vadd.f32 %v4239_v53, %v4178_v58 }
 0x81e   :  { %v4281_v50 = vpop.f32.mrf.mxu1 }
 0x81f   :  { %v4302_v33 = vadd.f32 %v4301_v15, %v4281_v50 }
 0x821   :  { %v4304_v10 = vadd.f32 %v4302_v33, %v4241_v55 }
 0x823   :  { %v4305_v52 = vmax.f32 %v4304_v10, 0.0 }
 0x825   :  { %4924 = vmatmul.msk.f32.vlgmr.msra.gmra.mxu3 %vm4314_vm11, %v4305_v52 }
 0x8a8   :  { %v4335_v27 = vpop.f32.mrf.mxu3 }
 0x8a9   :  { %v4336_v34 = vadd.f32 %v5112_v63, %v4335_v27 }
 0x8ab   :  { %4338 = vst.msk [vmem:[%s9061_s13] sm:$0xff] %vm2768_vm7, %v4336_v34 }

</bundles_post_ra>
